<compile_context>
chip_gen: v7x
topology: tpu7x:2x2x1
jax: 0.10.0
libtpu: 0.0.40
codegen_flags: <defaults>
</compile_context>

<pallas_src>
import functools
import math

import jax
import jax.numpy as jnp
from jax.experimental import pallas as pl
from jax.experimental.pallas import tpu as pltpu


# -----------------------------------------------------------------------------
# Kernel 1: resident-src (whole source axis in VMEM, no online softmax)
# -----------------------------------------------------------------------------
def _gat_resident_kernel(adj_ref, ft_ref, elT_ref, er_ref, out_ref, *,
                         num_heads, out_feats, negative_slope):
    """One dst tile against the full (VMEM-resident) source axis.

    adj_ref : (Ti, Ns) int8   0/1 adjacency tile, adj[i, j] != 0 iff edge j -> i
    ft_ref  : (Ns, H*F) bf16  projected source features (resident across dst)
    elT_ref : (H, Ns)  f32    source-side scores, src axis on lanes (resident)
    er_ref  : (Ti, H)  f32    dest-side scores
    out_ref : (Ti, H*F) f32   lane-dense output block
    """
    H, F = num_heads, out_feats
    NEG = -1e30  # finite sentinel: no inf-inf / NaN anywhere

    mask_f = adj_ref[...].astype(jnp.float32)        # 0/1, no compare needed
    addmask = (1.0 - mask_f) * NEG                   # additive mask, shared by heads
    er = er_ref[...]                                 # (Ti, H)

    out_parts = []
    for h in range(H):
        e = er[:, h:h + 1] + elT_ref[h:h + 1, :]     # outer sum     (Ti, Ns)
        e = jnp.maximum(e, negative_slope * e)       # LeakyReLU (0 < slope < 1)
        e = e + addmask                              # masked -> ~NEG (finite)

        m = jnp.max(e, axis=-1, keepdims=True)       # (Ti, 1)
        p = jnp.exp(e - m) * mask_f                  # masked entries -> exact 0
        denom = jnp.sum(p, axis=-1, keepdims=True)   # (Ti, 1)
        safe = jnp.where(denom > 0.0, denom, 1.0)
        inv = jnp.where(denom > 0.0,
                        pl.reciprocal(safe, approx=True), 0.0)  # EUP slot

        pv = jnp.dot(p.astype(ft_ref.dtype), ft_ref[:, h * F:(h + 1) * F],
                     preferred_element_type=jnp.float32)        # (Ti, F)
        out_parts.append(pv * inv)

    # one full-lane-width store (H*F = 128 lanes), no masked partial stores
    out_ref[...] = jnp.concatenate(out_parts, axis=-1).astype(out_ref.dtype)


# -----------------------------------------------------------------------------
# Kernel 2: tiled online-softmax (large graphs)
# -----------------------------------------------------------------------------
def _gat_tiled_kernel(adj_ref, ft_ref, elT_ref, er_ref, out_ref,
                      m_scr, l_scr, acc_scr, *,
                      num_heads, out_feats, negative_slope):
    """One (dst_tile, src_tile) step of the online-softmax GAT aggregation."""
    H, F = num_heads, out_feats
    NEG = -1e30

    j = pl.program_id(1)

    @pl.when(j == 0)
    def _init():
        m_scr[...] = jnp.full_like(m_scr, NEG)
        l_scr[...] = jnp.zeros_like(l_scr)
        acc_scr[...] = jnp.zeros_like(acc_scr)

    mask_f = adj_ref[...].astype(jnp.float32)        # (Ti, Tj) 0/1
    addmask = (1.0 - mask_f) * NEG
    er = er_ref[...]                                 # (Ti, H)

    acc_prev = acc_scr[...]                          # single full-width load
    new_acc_parts = []
    for h in range(H):
        e = er[:, h:h + 1] + elT_ref[h:h + 1, :]     # (Ti, Tj)
        e = jnp.maximum(e, negative_slope * e)       # LeakyReLU
        e = e + addmask

        m_prev = m_scr[:, h:h + 1]                   # (Ti, 1)
        m_new = jnp.maximum(m_prev, jnp.max(e, axis=-1, keepdims=True))
        alpha = jnp.exp(m_prev - m_new)              # <= 1, finite
        p = jnp.exp(e - m_new) * mask_f              # masked -> exact 0

        l_scr[:, h:h + 1] = alpha * l_scr[:, h:h + 1] + jnp.sum(
            p, axis=-1, keepdims=True)
        m_scr[:, h:h + 1] = m_new

        pv = jnp.dot(p.astype(ft_ref.dtype), ft_ref[:, h * F:(h + 1) * F],
                     preferred_element_type=jnp.float32)        # (Ti, F)
        new_acc_parts.append(alpha * acc_prev[:, h * F:(h + 1) * F] + pv)

    # single full-lane-width accumulator store per step
    acc_scr[...] = jnp.concatenate(new_acc_parts, axis=-1)

    @pl.when(j == pl.num_programs(1) - 1)
    def _finalize():
        l = l_scr[...]                                           # (Ti, H)
        safe = jnp.where(l > 0.0, l, 1.0)
        inv = jnp.where(l > 0.0, pl.reciprocal(safe, approx=True), 0.0)
        acc = acc_scr[...]
        parts = [acc[:, h * F:(h + 1) * F] * inv[:, h:h + 1] for h in range(H)]
        out_ref[...] = jnp.concatenate(parts, axis=-1).astype(out_ref.dtype)


# -----------------------------------------------------------------------------
# Host-side helpers / wrapper
# -----------------------------------------------------------------------------
def _cdiv(a, b):
    return -(-a // b)


def _pad_axis(x, axis, target):
    pad = target - x.shape[axis]
    if pad == 0:
        return x
    widths = [(0, 0)] * x.ndim
    widths[axis] = (0, pad)
    return jnp.pad(x, widths)


def prepare_adjacency(adj):
    """Hoist the O(N^2) (!=0)->int8 cast out of the per-call path.

    Call this once per graph and reuse the result across layers/calls.
    The result must be a 0/1 int8 matrix: adj_i8[i, j] == 1 iff edge j -> i.
    """
    if adj.dtype == jnp.int8 or adj.dtype == jnp.bool_:
        return adj.astype(jnp.int8)
    return (adj != 0).astype(jnp.int8)


def _fc_project(feat, weight, compute_dtype):
    """One big lane-dense matmul: (N, Din) @ (Din, H*F) -> f32."""
    return jnp.dot(feat.astype(compute_dtype), weight.astype(compute_dtype),
                   preferred_element_type=jnp.float32)


def gat_conv_forward(feat, adj, weight, attn_l, attn_r, *,
                     num_heads, out_feats, negative_slope=0.2,
                     tile_dst=256, tile_src=512,
                     resident_src_max=2048, force_tiled=False,
                     compute_dtype=jnp.bfloat16,
                     vmem_limit_bytes=48 * 1024 * 1024):
    """GATConv forward.

    feat   : (N, D_in)  f32
    adj    : (N, N)     adjacency, adj[i, j] != 0 iff edge j -> i.  Pass the
                        output of prepare_adjacency() (int8 0/1) to avoid a
                        per-call O(N^2) cast.
    weight : (D_in, H*F)   (== fc.weight.T in the PyTorch module)
    attn_l : (1, H, F), attn_r : (1, H, F)
    returns: (N, H, F)  f32
    """
    N = feat.shape[0]
    H, F = num_heads, out_feats
    HF = H * F

    # (1) fc projection: one big matmul with a lane-dense H*F output.
    ft = _fc_project(feat, weight, compute_dtype)        # (N, HF) f32
    ft3 = ft.reshape(N, H, F)

    # (2) tiny per-node score reductions, computed once up front.
    el = jnp.sum(ft3 * attn_l, axis=-1)                  # (N, H) source scores
    er = jnp.sum(ft3 * attn_r, axis=-1)                  # (N, H) dest scores

    adj_i8 = prepare_adjacency(adj)                      # no-op if already int8

    # (3) tile selection.  Keep >= 2 dst steps when possible so the "parallel"
    #     dst axis can shard across v7x's 2 TensorCores.
    td = tile_dst
    while td > 128 and _cdiv(N, td) < 2:
        td //= 2
    n_dst = _cdiv(N, td) * td

    use_resident = (not force_tiled) and (_cdiv(N, 128) * 128 <= resident_src_max)
    if use_resident:
        n_src = _cdiv(N, 128) * 128
        ts = n_src
    else:
        ts = tile_src
        n_src = _cdiv(N, ts) * ts

    # (4) pad node axes (padded rows/cols carry zero mask -> contribute nothing).
    adj_p = _pad_axis(_pad_axis(adj_i8, 0, n_dst), 1, n_src)     # int8
    ft_p = _pad_axis(ft, 0, n_src).astype(compute_dtype)         # (n_src, HF)
    elT_p = _pad_axis(el, 0, n_src).astype(jnp.float32).T        # (H, n_src)
    er_p = _pad_axis(er, 0, n_dst).astype(jnp.float32)           # (n_dst, H)

    if use_resident:
        kernel = functools.partial(
            _gat_resident_kernel, num_heads=H, out_feats=F,
            negative_slope=negative_slope)
        out = pl.pallas_call(
            kernel,
            out_shape=jax.ShapeDtypeStruct((n_dst, HF), jnp.float32),
            grid_spec=pltpu.PrefetchScalarGridSpec(
                num_scalar_prefetch=0,
                grid=(n_dst // td,),
                in_specs=[
                    # adjacency tile: the only O(N^2) stream
                    pl.BlockSpec((td, n_src), lambda i: (i, 0)),
                    # source features: constant index map -> VMEM-resident
                    pl.BlockSpec((n_src, HF), lambda i: (0, 0)),
                    # source-side scores (src axis on lanes), resident
                    pl.BlockSpec((H, n_src), lambda i: (0, 0)),
                    # dest-side scores for this dst tile
                    pl.BlockSpec((td, H), lambda i: (i, 0)),
                ],
                out_specs=pl.BlockSpec((td, HF), lambda i: (i, 0))),
            compiler_params=pltpu.CompilerParams(
                dimension_semantics=("parallel",),
                vmem_limit_bytes=vmem_limit_bytes),
        )(adj_p, ft_p, elT_p, er_p)
    else:
        kernel = functools.partial(
            _gat_tiled_kernel, num_heads=H, out_feats=F,
            negative_slope=negative_slope)
        out = pl.pallas_call(
            kernel,
            out_shape=jax.ShapeDtypeStruct((n_dst, HF), jnp.float32),
            grid_spec=pltpu.PrefetchScalarGridSpec(
                num_scalar_prefetch=0,
                grid=(n_dst // td, n_src // ts),
                in_specs=[
                    pl.BlockSpec((td, ts), lambda i, j: (i, j)),
                    pl.BlockSpec((ts, HF), lambda i, j: (j, 0)),
                    pl.BlockSpec((H, ts), lambda i, j: (0, j)),
                    pl.BlockSpec((td, H), lambda i, j: (i, 0)),
                ],
                # same output block for every src step -> accumulator resident
                out_specs=pl.BlockSpec((td, HF), lambda i, j: (i, 0)),
                scratch_shapes=[
                    pltpu.VMEM((td, H), jnp.float32),    # running max m
                    pltpu.VMEM((td, H), jnp.float32),    # running denom l
                    pltpu.VMEM((td, HF), jnp.float32),   # f32 accumulator
                ]),
            compiler_params=pltpu.CompilerParams(
                dimension_semantics=("parallel", "arbitrary"),
                vmem_limit_bytes=vmem_limit_bytes),
        )(adj_p, ft_p, elT_p, er_p)

    return out[:N].reshape(N, H, F)

    # TODO(synk): residual / activation / feat_drop / attn_drop paths are
    # identity at the module's default constructor args and are not
    # implemented; the distributed apply_gather / GraphAllgather path has no
    # single-device Pallas equivalent (dense-adjacency single-device
    # formulation used).  bf16-exp (v6e/v7x-only micro-opt) intentionally not
    # applied to keep the kernel generation-neutral (v5e has no bf16 EUP/VPU).


# -----------------------------------------------------------------------------
# Pure-JAX reference (same semantics, f32 softmax/aggregation)
# -----------------------------------------------------------------------------
def _gat_reference(feat, adj, weight, attn_l, attn_r, num_heads, out_feats,
                   negative_slope=0.2, compute_dtype=jnp.bfloat16):
    N = feat.shape[0]
    H, F = num_heads, out_feats
    ft = _fc_project(feat, weight, compute_dtype).reshape(N, H, F)
    el = jnp.sum(ft * attn_l, axis=-1)              # (N, H)
    er = jnp.sum(ft * attn_r, axis=-1)              # (N, H)
    e = er[:, None, :] + el[None, :, :]             # (Ndst, Nsrc, H)
    e = jnp.where(e > 0, e, negative_slope * e)
    mask = (adj != 0)[:, :, None]
    e = jnp.where(mask, e, -jnp.inf)
    e_max = jnp.max(e, axis=1, keepdims=True)
    e_max = jnp.where(jnp.isfinite(e_max), e_max, 0.0)
    p = jnp.exp(e - e_max) * mask
    denom = jnp.sum(p, axis=1, keepdims=True)
    a = jnp.where(denom > 0, p / jnp.where(denom > 0, denom, 1.0), 0.0)
    return jnp.einsum("ijh,jhf->ihf", a, ft)        # (N, H, F)


# -----------------------------------------------------------------------------
# Demo / self-test
# -----------------------------------------------------------------------------
if __name__ == "__main__":
    key = jax.random.PRNGKey(0)
    k_feat, k_w, k_al, k_ar, k_adj = jax.random.split(key, 5)

    N, D_IN, H, F = 200, 48, 4, 32        # H*F = 128 -> lane-dense output
    feat = jax.random.normal(k_feat, (N, D_IN), jnp.float32) * 0.5
    weight = jax.random.normal(k_w, (D_IN, H * F), jnp.float32) * (
        1.0 / math.sqrt(D_IN))
    attn_l = jax.random.normal(k_al, (1, H, F), jnp.float32) * 0.3
    attn_r = jax.random.normal(k_ar, (1, H, F), jnp.float32) * 0.3

    # random sparse-ish directed graph; rows 0 and 3 have zero in-degree so the
    # isolated-node path (exact-zero output) is exercised.
    adj = (jax.random.uniform(k_adj, (N, N)) < 0.08).astype(jnp.float32)
    adj = adj.at[0, :].set(0.0)
    adj = adj.at[3, :].set(0.0)

    # Hoisted O(N^2) preprocessing: done once, reused across forward calls.
    adj_i8 = jax.block_until_ready(prepare_adjacency(adj))

    ref = _gat_reference(feat, adj, weight, attn_l, attn_r, H, F)

    # 1) default path: resident-src kernel (no online softmax).
    fwd_resident = jax.jit(functools.partial(
        gat_conv_forward, num_heads=H, out_feats=F))
    out_resident = jax.block_until_ready(
        fwd_resident(feat, adj_i8, weight, attn_l, attn_r))

    # 2) large-graph path: tiled online-softmax kernel (forced at small tiles
    #    here so the src reduction actually spans multiple grid steps).
    fwd_tiled = jax.jit(functools.partial(
        gat_conv_forward, num_heads=H, out_feats=F,
        force_tiled=True, tile_dst=128, tile_src=128))
    out_tiled = jax.block_until_ready(
        fwd_tiled(feat, adj_i8, weight, attn_l, attn_r))

    for name, out in (("resident", out_resident), ("tiled", out_tiled)):
        if not jnp.allclose(out, ref, atol=5e-2, rtol=5e-2):
            max_err = float(jnp.max(jnp.abs(out - ref)))
            raise AssertionError(
                f"Pallas GATConv ({name}) mismatch: max abs err={max_err}")
        if not (bool(jnp.all(out[0] == 0.0)) and bool(jnp.all(out[3] == 0.0))):
            raise AssertionError(
                f"({name}) zero in-degree nodes must produce exactly 0")

    print("KERNEL_OK")
</pallas_src>

<mosaic_0001>
module attributes {stable_mosaic.version = 11 : i64} {
  func.func @_gat_resident_kernel(%arg0: i32, %arg1: memref<128x256xi8, #tpu.memory_space<vmem>>, %arg2: memref<256x128xbf16, #tpu.memory_space<vmem>>, %arg3: memref<4x256xf32, #tpu.memory_space<vmem>>, %arg4: memref<128x4xf32, #tpu.memory_space<vmem>>, %arg5: memref<128x128xf32, #tpu.memory_space<vmem>>) attributes {dimension_semantics = [#tpu.dimension_semantics<parallel>], iteration_bounds = array<i64: 2>, scalar_prefetch = 0 : i64, scratch_operands = 0 : i64, tpu.core_type = #tpu.core_type<tc>, window_params = [{transform_indices = @transform_0, window_bounds = array<i64: 128, 256>}, {pipeline_mode = #tpu.pipeline_mode<synchronous>, transform_indices = @transform_1, window_bounds = array<i64: 256, 128>}, {pipeline_mode = #tpu.pipeline_mode<synchronous>, transform_indices = @transform_2, window_bounds = array<i64: 4, 256>}, {transform_indices = @transform_3, window_bounds = array<i64: 128, 4>}, {transform_indices = @transform_4, window_bounds = array<i64: 128, 128>}]} {
    %c0 = arith.constant 0 : index
    %c0_0 = arith.constant 0 : index
    %0 = vector.load %arg1[%c0, %c0_0] : memref<128x256xi8, #tpu.memory_space<vmem>>, vector<128x256xi8>
    %1 = arith.sitofp %0 : vector<128x256xi8> to vector<128x256xf32>
    %cst = arith.constant 1.000000e+00 : f32
    %2 = vector.broadcast %cst : f32 to vector<128x256xf32>
    %3 = arith.subf %2, %1 : vector<128x256xf32>
    %cst_1 = arith.constant -1.000000e+30 : f32
    %4 = vector.broadcast %cst_1 : f32 to vector<128x256xf32>
    %5 = arith.mulf %3, %4 : vector<128x256xf32>
    %c0_2 = arith.constant 0 : index
    %c0_3 = arith.constant 0 : index
    %6 = vector.load %arg4[%c0_2, %c0_3] : memref<128x4xf32, #tpu.memory_space<vmem>>, vector<128x4xf32>
    %7 = vector.extract_strided_slice %6 {offsets = [0, 0], sizes = [128, 1], strides = [1, 1]} : vector<128x4xf32> to vector<128x1xf32>
    %c0_4 = arith.constant 0 : index
    %c0_5 = arith.constant 0 : index
    %8 = vector.load %arg3[%c0_4, %c0_5] : memref<4x256xf32, #tpu.memory_space<vmem>>, vector<1x256xf32>
    %9 = vector.broadcast %7 : vector<128x1xf32> to vector<128x256xf32>
    %10 = vector.broadcast %8 : vector<1x256xf32> to vector<128x256xf32>
    %11 = arith.addf %9, %10 : vector<128x256xf32>
    %cst_6 = arith.constant 2.000000e-01 : f32
    %12 = vector.broadcast %cst_6 : f32 to vector<128x256xf32>
    %13 = arith.mulf %12, %11 : vector<128x256xf32>
    %14 = arith.maximumf %11, %13 : vector<128x256xf32>
    %15 = arith.addf %14, %5 : vector<128x256xf32>
    %cst_7 = arith.constant dense<0xFF800000> : vector<128xf32>
    %16 = vector.multi_reduction <maximumf>, %15, %cst_7 [1] : vector<128x256xf32> to vector<128xf32>
    %17 = vector.shape_cast %16 : vector<128xf32> to vector<128x1xf32>
    %18 = vector.broadcast %17 : vector<128x1xf32> to vector<128x256xf32>
    %19 = arith.subf %15, %18 : vector<128x256xf32>
    %20 = math.exp %19 : vector<128x256xf32>
    %21 = arith.mulf %20, %1 : vector<128x256xf32>
    %cst_8 = arith.constant dense<0.000000e+00> : vector<128xf32>
    %22 = vector.multi_reduction <add>, %21, %cst_8 [1] : vector<128x256xf32> to vector<128xf32>
    %23 = vector.shape_cast %22 : vector<128xf32> to vector<128x1xf32>
    %cst_9 = arith.constant 0.000000e+00 : f32
    %24 = vector.broadcast %cst_9 : f32 to vector<128x1xf32>
    %25 = arith.cmpf ogt, %23, %24 : vector<128x1xf32>
    %cst_10 = arith.constant 1.000000e+00 : f32
    %26 = vector.broadcast %cst_10 : f32 to vector<128x1xf32>
    %27 = arith.select %25, %23, %26 : vector<128x1xi1>, vector<128x1xf32>
    %cst_11 = arith.constant 0.000000e+00 : f32
    %28 = vector.broadcast %cst_11 : f32 to vector<128x1xf32>
    %29 = arith.cmpf ogt, %23, %28 : vector<128x1xf32>
    %30 = tpu.reciprocal %27 {approx = true} : vector<128x1xf32> -> vector<128x1xf32>
    %cst_12 = arith.constant 0.000000e+00 : f32
    %31 = vector.broadcast %cst_12 : f32 to vector<128x1xf32>
    %32 = arith.select %29, %30, %31 : vector<128x1xi1>, vector<128x1xf32>
    %33 = arith.truncf %21 : vector<128x256xf32> to vector<128x256xbf16>
    %c0_13 = arith.constant 0 : index
    %c0_14 = arith.constant 0 : index
    %34 = vector.load %arg2[%c0_13, %c0_14] : memref<256x128xbf16, #tpu.memory_space<vmem>>, vector<256x32xbf16>
    %cst_15 = arith.constant dense<0.000000e+00> : vector<128x32xf32>
    %35 = tpu.matmul %33, %34, %cst_15 {dimension_numbers = #tpu.dot_dimension_numbers<[1], [0], [0], [1], [0, 0, 1, 1], [], []>} : vector<128x256xbf16>, vector<256x32xbf16>, vector<128x32xf32> -> vector<128x32xf32>
    %36 = vector.broadcast %32 : vector<128x1xf32> to vector<128x32xf32>
    %37 = arith.mulf %35, %36 : vector<128x32xf32>
    %38 = vector.extract_strided_slice %6 {offsets = [0, 1], sizes = [128, 1], strides = [1, 1]} : vector<128x4xf32> to vector<128x1xf32>
    %c1 = arith.constant 1 : index
    %c0_16 = arith.constant 0 : index
    %39 = vector.load %arg3[%c1, %c0_16] : memref<4x256xf32, #tpu.memory_space<vmem>>, vector<1x256xf32>
    %40 = vector.broadcast %38 : vector<128x1xf32> to vector<128x256xf32>
    %41 = vector.broadcast %39 : vector<1x256xf32> to vector<128x256xf32>
    %42 = arith.addf %40, %41 : vector<128x256xf32>
    %cst_17 = arith.constant 2.000000e-01 : f32
    %43 = vector.broadcast %cst_17 : f32 to vector<128x256xf32>
    %44 = arith.mulf %43, %42 : vector<128x256xf32>
    %45 = arith.maximumf %42, %44 : vector<128x256xf32>
    %46 = arith.addf %45, %5 : vector<128x256xf32>
    %cst_18 = arith.constant dense<0xFF800000> : vector<128xf32>
    %47 = vector.multi_reduction <maximumf>, %46, %cst_18 [1] : vector<128x256xf32> to vector<128xf32>
    %48 = vector.shape_cast %47 : vector<128xf32> to vector<128x1xf32>
    %49 = vector.broadcast %48 : vector<128x1xf32> to vector<128x256xf32>
    %50 = arith.subf %46, %49 : vector<128x256xf32>
    %51 = math.exp %50 : vector<128x256xf32>
    %52 = arith.mulf %51, %1 : vector<128x256xf32>
    %cst_19 = arith.constant dense<0.000000e+00> : vector<128xf32>
    %53 = vector.multi_reduction <add>, %52, %cst_19 [1] : vector<128x256xf32> to vector<128xf32>
    %54 = vector.shape_cast %53 : vector<128xf32> to vector<128x1xf32>
    %cst_20 = arith.constant 0.000000e+00 : f32
    %55 = vector.broadcast %cst_20 : f32 to vector<128x1xf32>
    %56 = arith.cmpf ogt, %54, %55 : vector<128x1xf32>
    %cst_21 = arith.constant 1.000000e+00 : f32
    %57 = vector.broadcast %cst_21 : f32 to vector<128x1xf32>
    %58 = arith.select %56, %54, %57 : vector<128x1xi1>, vector<128x1xf32>
    %cst_22 = arith.constant 0.000000e+00 : f32
    %59 = vector.broadcast %cst_22 : f32 to vector<128x1xf32>
    %60 = arith.cmpf ogt, %54, %59 : vector<128x1xf32>
    %61 = tpu.reciprocal %58 {approx = true} : vector<128x1xf32> -> vector<128x1xf32>
    %cst_23 = arith.constant 0.000000e+00 : f32
    %62 = vector.broadcast %cst_23 : f32 to vector<128x1xf32>
    %63 = arith.select %60, %61, %62 : vector<128x1xi1>, vector<128x1xf32>
    %64 = arith.truncf %52 : vector<128x256xf32> to vector<128x256xbf16>
    %c0_24 = arith.constant 0 : index
    %c32 = arith.constant 32 : index
    %65 = vector.load %arg2[%c0_24, %c32] : memref<256x128xbf16, #tpu.memory_space<vmem>>, vector<256x32xbf16>
    %cst_25 = arith.constant dense<0.000000e+00> : vector<128x32xf32>
    %66 = tpu.matmul %64, %65, %cst_25 {dimension_numbers = #tpu.dot_dimension_numbers<[1], [0], [0], [1], [0, 0, 1, 1], [], []>} : vector<128x256xbf16>, vector<256x32xbf16>, vector<128x32xf32> -> vector<128x32xf32>
    %67 = vector.broadcast %63 : vector<128x1xf32> to vector<128x32xf32>
    %68 = arith.mulf %66, %67 : vector<128x32xf32>
    %69 = vector.extract_strided_slice %6 {offsets = [0, 2], sizes = [128, 1], strides = [1, 1]} : vector<128x4xf32> to vector<128x1xf32>
    %c2 = arith.constant 2 : index
    %c0_26 = arith.constant 0 : index
    %70 = vector.load %arg3[%c2, %c0_26] : memref<4x256xf32, #tpu.memory_space<vmem>>, vector<1x256xf32>
    %71 = vector.broadcast %69 : vector<128x1xf32> to vector<128x256xf32>
    %72 = vector.broadcast %70 : vector<1x256xf32> to vector<128x256xf32>
    %73 = arith.addf %71, %72 : vector<128x256xf32>
    %cst_27 = arith.constant 2.000000e-01 : f32
    %74 = vector.broadcast %cst_27 : f32 to vector<128x256xf32>
    %75 = arith.mulf %74, %73 : vector<128x256xf32>
    %76 = arith.maximumf %73, %75 : vector<128x256xf32>
    %77 = arith.addf %76, %5 : vector<128x256xf32>
    %cst_28 = arith.constant dense<0xFF800000> : vector<128xf32>
    %78 = vector.multi_reduction <maximumf>, %77, %cst_28 [1] : vector<128x256xf32> to vector<128xf32>
    %79 = vector.shape_cast %78 : vector<128xf32> to vector<128x1xf32>
    %80 = vector.broadcast %79 : vector<128x1xf32> to vector<128x256xf32>
    %81 = arith.subf %77, %80 : vector<128x256xf32>
    %82 = math.exp %81 : vector<128x256xf32>
    %83 = arith.mulf %82, %1 : vector<128x256xf32>
    %cst_29 = arith.constant dense<0.000000e+00> : vector<128xf32>
    %84 = vector.multi_reduction <add>, %83, %cst_29 [1] : vector<128x256xf32> to vector<128xf32>
    %85 = vector.shape_cast %84 : vector<128xf32> to vector<128x1xf32>
    %cst_30 = arith.constant 0.000000e+00 : f32
    %86 = vector.broadcast %cst_30 : f32 to vector<128x1xf32>
    %87 = arith.cmpf ogt, %85, %86 : vector<128x1xf32>
    %cst_31 = arith.constant 1.000000e+00 : f32
    %88 = vector.broadcast %cst_31 : f32 to vector<128x1xf32>
    %89 = arith.select %87, %85, %88 : vector<128x1xi1>, vector<128x1xf32>
    %cst_32 = arith.constant 0.000000e+00 : f32
    %90 = vector.broadcast %cst_32 : f32 to vector<128x1xf32>
    %91 = arith.cmpf ogt, %85, %90 : vector<128x1xf32>
    %92 = tpu.reciprocal %89 {approx = true} : vector<128x1xf32> -> vector<128x1xf32>
    %cst_33 = arith.constant 0.000000e+00 : f32
    %93 = vector.broadcast %cst_33 : f32 to vector<128x1xf32>
    %94 = arith.select %91, %92, %93 : vector<128x1xi1>, vector<128x1xf32>
    %95 = arith.truncf %83 : vector<128x256xf32> to vector<128x256xbf16>
    %c0_34 = arith.constant 0 : index
    %c64 = arith.constant 64 : index
    %96 = vector.load %arg2[%c0_34, %c64] : memref<256x128xbf16, #tpu.memory_space<vmem>>, vector<256x32xbf16>
    %cst_35 = arith.constant dense<0.000000e+00> : vector<128x32xf32>
    %97 = tpu.matmul %95, %96, %cst_35 {dimension_numbers = #tpu.dot_dimension_numbers<[1], [0], [0], [1], [0, 0, 1, 1], [], []>} : vector<128x256xbf16>, vector<256x32xbf16>, vector<128x32xf32> -> vector<128x32xf32>
    %98 = vector.broadcast %94 : vector<128x1xf32> to vector<128x32xf32>
    %99 = arith.mulf %97, %98 : vector<128x32xf32>
    %100 = vector.extract_strided_slice %6 {offsets = [0, 3], sizes = [128, 1], strides = [1, 1]} : vector<128x4xf32> to vector<128x1xf32>
    %c3 = arith.constant 3 : index
    %c0_36 = arith.constant 0 : index
    %101 = vector.load %arg3[%c3, %c0_36] : memref<4x256xf32, #tpu.memory_space<vmem>>, vector<1x256xf32>
    %102 = vector.broadcast %100 : vector<128x1xf32> to vector<128x256xf32>
    %103 = vector.broadcast %101 : vector<1x256xf32> to vector<128x256xf32>
    %104 = arith.addf %102, %103 : vector<128x256xf32>
    %cst_37 = arith.constant 2.000000e-01 : f32
    %105 = vector.broadcast %cst_37 : f32 to vector<128x256xf32>
    %106 = arith.mulf %105, %104 : vector<128x256xf32>
    %107 = arith.maximumf %104, %106 : vector<128x256xf32>
    %108 = arith.addf %107, %5 : vector<128x256xf32>
    %cst_38 = arith.constant dense<0xFF800000> : vector<128xf32>
    %109 = vector.multi_reduction <maximumf>, %108, %cst_38 [1] : vector<128x256xf32> to vector<128xf32>
    %110 = vector.shape_cast %109 : vector<128xf32> to vector<128x1xf32>
    %111 = vector.broadcast %110 : vector<128x1xf32> to vector<128x256xf32>
    %112 = arith.subf %108, %111 : vector<128x256xf32>
    %113 = math.exp %112 : vector<128x256xf32>
    %114 = arith.mulf %113, %1 : vector<128x256xf32>
    %cst_39 = arith.constant dense<0.000000e+00> : vector<128xf32>
    %115 = vector.multi_reduction <add>, %114, %cst_39 [1] : vector<128x256xf32> to vector<128xf32>
    %116 = vector.shape_cast %115 : vector<128xf32> to vector<128x1xf32>
    %cst_40 = arith.constant 0.000000e+00 : f32
    %117 = vector.broadcast %cst_40 : f32 to vector<128x1xf32>
    %118 = arith.cmpf ogt, %116, %117 : vector<128x1xf32>
    %cst_41 = arith.constant 1.000000e+00 : f32
    %119 = vector.broadcast %cst_41 : f32 to vector<128x1xf32>
    %120 = arith.select %118, %116, %119 : vector<128x1xi1>, vector<128x1xf32>
    %cst_42 = arith.constant 0.000000e+00 : f32
    %121 = vector.broadcast %cst_42 : f32 to vector<128x1xf32>
    %122 = arith.cmpf ogt, %116, %121 : vector<128x1xf32>
    %123 = tpu.reciprocal %120 {approx = true} : vector<128x1xf32> -> vector<128x1xf32>
    %cst_43 = arith.constant 0.000000e+00 : f32
    %124 = vector.broadcast %cst_43 : f32 to vector<128x1xf32>
    %125 = arith.select %122, %123, %124 : vector<128x1xi1>, vector<128x1xf32>
    %126 = arith.truncf %114 : vector<128x256xf32> to vector<128x256xbf16>
    %c0_44 = arith.constant 0 : index
    %c96 = arith.constant 96 : index
    %127 = vector.load %arg2[%c0_44, %c96] : memref<256x128xbf16, #tpu.memory_space<vmem>>, vector<256x32xbf16>
    %cst_45 = arith.constant dense<0.000000e+00> : vector<128x32xf32>
    %128 = tpu.matmul %126, %127, %cst_45 {dimension_numbers = #tpu.dot_dimension_numbers<[1], [0], [0], [1], [0, 0, 1, 1], [], []>} : vector<128x256xbf16>, vector<256x32xbf16>, vector<128x32xf32> -> vector<128x32xf32>
    %129 = vector.broadcast %125 : vector<128x1xf32> to vector<128x32xf32>
    %130 = arith.mulf %128, %129 : vector<128x32xf32>
    %131 = tpu.concatenate %37, %68, %99, %130 in 1 : vector<128x32xf32>, vector<128x32xf32>, vector<128x32xf32>, vector<128x32xf32> -> vector<128x128xf32>
    %c0_46 = arith.constant 0 : index
    %c0_47 = arith.constant 0 : index
    %132 = vector.load %arg5[%c0_46, %c0_47] : memref<128x128xf32, #tpu.memory_space<vmem>>, vector<128x128xf32>
    tpu.vector_store %arg5[%c0_46, %c0_47], %131 {strides = array<i32>} : memref<128x128xf32, #tpu.memory_space<vmem>>, vector<128x128xf32>,
    return
  }
  func.func @transform_0(%arg0: i32) -> (i32, i32) {
    %c0_i32 = arith.constant 0 : i32
    %c0_i32_0 = arith.constant 0 : i32
    return %arg0, %c0_i32 : i32, i32
  }
  func.func @transform_1(%arg0: i32) -> (i32, i32) {
    %c0_i32 = arith.constant 0 : i32
    %c0_i32_0 = arith.constant 0 : i32
    %c0_i32_1 = arith.constant 0 : i32
    return %c0_i32, %c0_i32_0 : i32, i32
  }
  func.func @transform_2(%arg0: i32) -> (i32, i32) {
    %c0_i32 = arith.constant 0 : i32
    %c0_i32_0 = arith.constant 0 : i32
    %c0_i32_1 = arith.constant 0 : i32
    return %c0_i32, %c0_i32_0 : i32, i32
  }
  func.func @transform_3(%arg0: i32) -> (i32, i32) {
    %c0_i32 = arith.constant 0 : i32
    %c0_i32_0 = arith.constant 0 : i32
    return %arg0, %c0_i32 : i32, i32
  }
  func.func @transform_4(%arg0: i32) -> (i32, i32) {
    %c0_i32 = arith.constant 0 : i32
    %c0_i32_0 = arith.constant 0 : i32
    return %arg0, %c0_i32 : i32, i32
  }
}

</mosaic_0001>

<bundles_post_ra>
// kernel: gat_conv_forward.1
= control target key start
LH: loop header
LB: loop body
LE: loop exit
PB: predicated region body
PF: predicated region fallthrough
CT: control target
= control target key end

     0   :  { %s4280_s15 = smov 0   ;;  %s7214_s0 = inlined_call_operand.vmem [shape: s8[256,256], index: 0, kind: input, shape index: {}]   ;;  %s7215_s1 = inlined_call_operand.vmem [shape: bf16[256,128], index: 1, kind: input, shape index: {}]   ;;  %s7216_s2 = inlined_call_operand.vmem [shape: f32[4,256], index: 2, kind: input, shape index: {}]   ;;  %s7217_s3 = inlined_call_operand.vmem [shape: f32[256,4], index: 3, kind: input, shape index: {}]   ;;  %s7218_s4 = inlined_call_operand.vmem [shape: f32[256,128], index: 4, kind: output, shape index: {}]  }
   0x1 LB: > { %s3481_s16 = sadd.s32 4294967295, %s4246_s15   ;;  %p3485_p0 = scmp.ge.s32.totalorder %s4246_s15, 1  ;;  %s4246_s15 = sphi %s4280_s15, %s14_s15  }
   0x2   : > { %p175_p1 = scmp.lt.s32.totalorder %s4246_s15, 3 }
   0x4   : > { %p176_p2 = pnand %p3485_p0, %p175_p1 }
   0x6   : > { %179 = sbr.rel (%p176_p2) target bundleno = 1549 (0x60d), region = 36 }
   0xd   : > { %s3489_s17 = sshll.u32 %s3481_s16, 4  ;;  %v4248_v0 = vmov 0   ;;  %v4249_v17 = vmov 1   ;;  %s3486_s22 = sshll.u32 %s3481_s16, 2  ;;  %v461_v25 = vlaneseq }
   0xe   : > { %3787 = vset.pattern.permute.xlu1 %v4248_v0  ;;  %3786 = vset.pattern.permute.xlu0 %v4248_v0  ;;  %p215_p3 = scmp.lt.s32.totalorder %s3489_s17, 31  ;;  %p208_p4 = scmp.lt.s32.totalorder %s3486_s22, 7  ;;  %v4364_v54 = vld [vmem:[%s7216_s2] ss:$4 sm:$0x3] }
   0xf   : > { %v462_v36 = vshrl.u32 %v461_v25, 7  ;;  %s4250_s20 = smov 96   ;;  %s4254_s9 = smov 32  }
  0x10   : > { %s8041_s17 = smov (!%p215_p3, %s3489_s17), 31  ;;  %s8043_s22 = smov (!%p208_p4, %s3486_s22), 7 }
  0x11   : > { %s3490_s18 = sshll.u32 %s8041_s17, 3  ;;  %s3514_s23 = sshll.u32 %s8043_s22, 4  ;;  %v4356_v50 = vsub.s32 0, %v462_v36 }
  0x12   : > { %s4298_s21 = scalar_lea.vmem %s7217_s3, %s3490_s18  ;;  %s4327_s26 = scalar_lea.vmem %s7214_s0, %s3514_s23 }
  0x13   : > { %v365_v1 = vld [vmem:[%s4298_s21 + $0x10] sm:$0xff]  ;;  %v363_v2 = vld [vmem:[%s4298_s21] sm:$0xff]  ;;  %v366_v3 = vld [vmem:[%s4298_s21 + $0x18] sm:$0xff]  ;;  %7514 = vst [vmem:[#allocation12_spill] sm:$0xff] %v4356_v50  ;;  %s7061_s11 = scalar_lea.vmem %s7218_s4, %s3490_s18 }
  0x14   : > { %392 = vperm.xlu1 %3787, %v365_v1   ;;  %382 = vperm.xlu0 %3786, %v363_v2   ;;  %v364_v4 = vld [vmem:[%s4298_s21 + $0x8] sm:$0xff]  ;;  %v367_v6 = vld [vmem:[%s4298_s21 + $0x20] sm:$0xff]  ;;  %v370_v7 = vld [vmem:[%s4298_s21 + $0x38] sm:$0xff] }
  0x15   : > { %v368_v5 = vld [vmem:[%s4298_s21 + $0x28] sm:$0xff]  ;;  %v369_v8 = vld [vmem:[%s4298_s21 + $0x30] sm:$0xff]  ;;  %v371_v10 = vld [vmem:[%s4298_s21 + $0x40] sm:$0xff] }
  0x16   : > { %v372_v9 = vld [vmem:[%s4298_s21 + $0x48] sm:$0xff]  ;;  %v374_v11 = vld [vmem:[%s4298_s21 + $0x58] sm:$0xff]  ;;  %v373_v12 = vld [vmem:[%s4298_s21 + $0x50] sm:$0xff] }
  0x17   : > { %v376_v13 = vld [vmem:[%s4298_s21 + $0x68] sm:$0xff]  ;;  %v375_v14 = vld [vmem:[%s4298_s21 + $0x60] sm:$0xff]  ;;  %v4315_v15 = vld [vmem:[%s4298_s21 + $0x78] sm:$0xff] }
  0x18   : > { %397 = vperm.xlu1 %3787, %v366_v3   ;;  %387 = vperm.xlu0 %3786, %v364_v4   ;;  %v4318_v16 = vld [vmem:[%s4298_s21 + $0x70] sm:$0xff]  ;;  %v227_v18 = vld [vmem:[%s4327_s26] sm:$0xff]  ;;  %v228_v19 = vld [vmem:[%s4327_s26 + $0x8] sm:$0xff] }
  0x19   : > { %v235_v20 = vunpack.c.0.s8 %v227_v18  ;;  %v236_v21 = vunpack.c.0.s8 %v228_v19  ;;  %v237_v22 = vunpack.c.1.s8 %v227_v18  ;;  %v229_v23 = vld [vmem:[%s4327_s26 + $0x10] sm:$0xff]  ;;  %v230_v24 = vld [vmem:[%s4327_s26 + $0x18] sm:$0xff]  ;;  %v238_v26 = vunpack.c.1.s8 %v228_v19 }
  0x1a   : > { %v239_v27 = vunpack.c.2.s8 %v227_v18  ;;  %v240_v28 = vunpack.c.2.s8 %v228_v19  ;;  %v243_v31 = vunpack.c.0.s8 %v229_v23  ;;  %v244_v32 = vunpack.c.0.s8 %v230_v24 }
  0x1b   : > { %v4333_v29 = vcvt.s32.f32 %v235_v20  ;;  %v4335_v30 = vcvt.s32.f32 %v236_v21  ;;  %v4337_v33 = vcvt.s32.f32 %v237_v22  ;;  %v241_v34 = vunpack.c.3.s8 %v227_v18 }
  0x1c   : > { %407 = vperm.xlu1 %3787, %v368_v5   ;;  %402 = vperm.xlu0 %3786, %v367_v6   ;;  %v242_v35 = vunpack.c.3.s8 %v228_v19  ;;  %v4339_v37 = vcvt.s32.f32 %v238_v26  ;;  %v4341_v38 = vcvt.s32.f32 %v239_v27  ;;  %v4343_v39 = vcvt.s32.f32 %v240_v28  ;;  %v4414_v27 = vld [vmem:[%s4327_s26 + $0x30] sm:$0xff]  ;;  %v4417_v28 = vld [vmem:[%s4327_s26 + $0x38] sm:$0xff] }
  0x1d   : > { %7504 = vst [vmem:[#allocation2_spill] sm:$0xff] %v4333_v29  ;;  %7505 = vst [vmem:[#allocation3_spill] sm:$0xff] %v4335_v30  ;;  %v299_v40 = vsub.f32 1.0, %v4333_v29  ;;  %v245_v41 = vunpack.c.1.s8 %v229_v23  ;;  %v246_v42 = vunpack.c.1.s8 %v230_v24  ;;  %v300_v43 = vsub.f32 1.0, %v4335_v30 }
  0x1e   : > { %7506 = vst [vmem:[#allocation4_spill] sm:$0xff] %v4337_v33  ;;  %7507 = vst [vmem:[#allocation5_spill] sm:$0xff] %v4339_v37  ;;  %v4347_v44 = vcvt.s32.f32 %v243_v31  ;;  %v4349_v45 = vcvt.s32.f32 %v244_v32  ;;  %v247_v46 = vunpack.c.2.s8 %v229_v23  ;;  %v301_v47 = vsub.f32 1.0, %v4337_v33 }
  0x1f   : > { %7508 = vst [vmem:[#allocation6_spill] sm:$0xff] %v4341_v38  ;;  %7509 = vst [vmem:[#allocation7_spill] sm:$0xff] %v4343_v39  ;;  %v4352_v48 = vcvt.s32.f32 %v241_v34  ;;  %v4354_v49 = vcvt.s32.f32 %v242_v35  ;;  %v302_v51 = vsub.f32 1.0, %v4339_v37  ;;  %v303_v52 = vsub.f32 1.0, %v4341_v38 }
  0x20   : > { %417 = vperm.xlu1 %3787, %v370_v7   ;;  %412 = vperm.xlu0 %3786, %v369_v8   ;;  %7510 = vst [vmem:[#allocation8_spill] sm:$0xff] %v4347_v44  ;;  %7511 = vst [vmem:[#allocation9_spill] sm:$0xff] %v4349_v45  ;;  %v304_v53 = vsub.f32 1.0, %v4343_v39  ;;  %v4366_v55 = vmul.f32 -1e+30, %v299_v40  ;;  %v248_v56 = vunpack.c.2.s8 %v230_v24  ;;  %v4368_v57 = vcvt.s32.f32 %v245_v41 }
  0x21   : > { %7512 = vst [vmem:[#allocation10_spill] sm:$0xff] %v4352_v48  ;;  %7513 = vst [vmem:[#allocation11_spill] sm:$0xff] %v4354_v49  ;;  %v4370_v58 = vcvt.s32.f32 %v246_v42  ;;  %v4372_v59 = vmul.f32 -1e+30, %v300_v43  ;;  %v307_v60 = vsub.f32 1.0, %v4347_v44  ;;  %v308_v61 = vsub.f32 1.0, %v4349_v45 }
  0x22   : > { %7515 = vst [vmem:[#allocation13_spill] sm:$0xff] %v4366_v55  ;;  %7516 = vst [vmem:[#allocation14_spill] sm:$0xff] %v4368_v57  ;;  %v4376_v62 = vcvt.s32.f32 %v247_v46  ;;  %v4378_v63 = vmul.f32 -1e+30, %v301_v47  ;;  %v305_v0 = vsub.f32 1.0, %v4352_v48  ;;  %v259_v47 = vunpack.c.0.s8 %v4414_v27 }
  0x23   : > { %7517 = vst [vmem:[#allocation15_spill] sm:$0xff] %v4370_v58  ;;  %7518 = vst [vmem:[#allocation16_spill] sm:$0xff] %v4372_v59 }
  0x24   : > { %427 = vperm.xlu1 %3787, %v372_v9   ;;  %422 = vperm.xlu0 %3786, %v371_v10   ;;  %7519 = vst [vmem:[#allocation17_spill] sm:$0xff] %v4376_v62  ;;  %7520 = vst [vmem:[#allocation18_spill] sm:$0xff] %v4378_v63  ;;  %v311_v18 = vsub.f32 1.0, %v4376_v62  ;;  %v4405_v19 = vmul.f32 -1e+30, %v305_v0  ;;  %v263_v0 = vunpack.c.2.s8 %v4414_v27 }
  0x26   : > { %7528 = vst [vmem:[#allocation26_spill] sm:$0xff] %v4405_v19 }
  0x28   : > { %437 = vperm.xlu1 %3787, %v374_v11   ;;  %432 = vperm.xlu0 %3786, %v373_v12  }
  0x2c   : > { %447 = vperm.xlu1 %3787, %v376_v13   ;;  %442 = vperm.xlu0 %3786, %v375_v14  }
  0x30   : > { %457 = vperm.xlu1 %3787, %v4315_v15   ;;  %452 = vperm.xlu0 %3786, %v4318_v16  }
  0x34   : > { %3788 = vset.pattern.permute.xlu1 %v4249_v17  ;;  %3789 = vset.pattern.permute.xlu0 %v4249_v17  ;;  %v4402_v17 = vmul.f32 -1e+30, %v308_v61 }
  0x35   : > { %1147 = vperm.xlu1 %3788, %v363_v2   ;;  %1151 = vperm.xlu0 %3789, %v364_v4   ;;  %v249_v2 = vunpack.c.3.s8 %v229_v23  ;;  %v4384_v4 = vmul.f32 -1e+30, %v302_v51  ;;  %v260_v51 = vunpack.c.0.s8 %v4417_v28 }
  0x36   : > { %7527 = vst [vmem:[#allocation25_spill] sm:$0xff] %v4402_v17 }
  0x37   : > { %7522 = vst [vmem:[#allocation20_spill] sm:$0xff] %v4384_v4  ;;  %v4409_v22 = vcvt.s32.f32 %v249_v2  ;;  %v262_v2 = vunpack.c.1.s8 %v4417_v28 }
  0x39   : > { %1155 = vperm.xlu1 %3788, %v365_v1   ;;  %1187 = vperm.xlu0 %3789, %v373_v12   ;;  %v306_v1 = vsub.f32 1.0, %v4354_v49  ;;  %v232_v12 = vld [vmem:[%s4327_s26 + $0x28] sm:$0xff]  ;;  %7530 = vst [vmem:[#allocation28_spill] sm:$0xff] %v4409_v22  ;;  %v313_v46 = vsub.f32 1.0, %v4409_v22 }
  0x3a   : > { %v252_v23 = vunpack.c.0.s8 %v232_v12  ;;  %v254_v26 = vunpack.c.1.s8 %v232_v12  ;;  %v256_v40 = vunpack.c.2.s8 %v232_v12  ;;  %v258_v42 = vunpack.c.3.s8 %v232_v12 }
  0x3b   : > { %v4407_v20 = vmul.f32 -1e+30, %v306_v1  ;;  %v261_v1 = vunpack.c.1.s8 %v4414_v27 }
  0x3d   : > { %1159 = vperm.xlu1 %3788, %v366_v3   ;;  %1195 = vperm.xlu0 %3789, %v375_v14   ;;  %v4382_v3 = vsub.s32 1, %v462_v36  ;;  %v4400_v14 = vmul.f32 -1e+30, %v307_v60  ;;  %7529 = vst [vmem:[#allocation27_spill] sm:$0xff] %v4407_v20  ;;  %v4424_v36 = vmul.f32 -1e+30, %v311_v18  ;;  %v4436_v60 = vcvt.s32.f32 %v254_v26 }
  0x3e   : > { %v4452_v18 = vcvt.s32.f32 %v259_v47  ;;  %v4458_v26 = vmul.f32 -1e+30, %v313_v46  ;;  %v4467_v47 = vcvt.s32.f32 %v262_v2 }
  0x3f   : > { %7521 = vst [vmem:[#allocation19_spill] sm:$0xff] %v4382_v3  ;;  %7526 = vst [vmem:[#allocation24_spill] sm:$0xff] %v4400_v14 }
  0x40   : > { %7534 = vst [vmem:[#allocation32_spill] sm:$0xff] %v4424_v36  ;;  %7538 = vst [vmem:[#allocation36_spill] sm:$0xff] %v4436_v60 }
  0x41   : > { %1163 = vperm.xlu1 %3788, %v367_v6   ;;  %v231_v6 = vld [vmem:[%s4327_s26 + $0x20] sm:$0xff]  ;;  %7544 = vst [vmem:[#allocation42_spill] sm:$0xff] %v4452_v18  ;;  %7546 = vst [vmem:[#allocation44_spill] sm:$0xff] %v4458_v26 }
  0x42   : > { %v251_v21 = vunpack.c.0.s8 %v231_v6  ;;  %v253_v25 = vunpack.c.1.s8 %v231_v6  ;;  %v255_v35 = vunpack.c.2.s8 %v231_v6  ;;  %v257_v41 = vunpack.c.3.s8 %v231_v6  ;;  %7549 = vst [vmem:[#allocation47_spill] sm:$0xff] %v4467_v47 }
  0x44   : > { %v4426_v43 = vcvt.s32.f32 %v251_v21  ;;  %v4438_v61 = vcvt.s32.f32 %v255_v35  ;;  %v4454_v21 = vcvt.s32.f32 %v260_v51  ;;  %v318_v35 = vsub.f32 1.0, %v4436_v60 }
  0x45   : > { %1167 = vperm.xlu1 %3788, %v368_v5   ;;  %v4386_v5 = vmul.f32 -1e+30, %v303_v52  ;;  %v4431_v52 = vcvt.s32.f32 %v252_v23  ;;  %v264_v23 = vunpack.c.2.s8 %v4417_v28 }
  0x46   : > { %7535 = vst [vmem:[#allocation33_spill] sm:$0xff] %v4426_v43  ;;  %7539 = vst [vmem:[#allocation37_spill] sm:$0xff] %v4438_v61  ;;  %v315_v12 = vsub.f32 1.0, %v4426_v43 }
  0x47   : > { %7523 = vst [vmem:[#allocation21_spill] sm:$0xff] %v4386_v5  ;;  %7536 = vst [vmem:[#allocation34_spill] sm:$0xff] %v4431_v52 }
  0x48   : > { %7545 = vst [vmem:[#allocation43_spill] sm:$0xff] %v4454_v21  ;;  %v4474_v22 = vmul.f32 -1e+30, %v315_v12 }
  0x49   : > { %1171 = vperm.xlu1 %3788, %v369_v8   ;;  %v4389_v8 = vmul.f32 -1e+30, %v304_v53 }
  0x4a   : > { %7551 = vst [vmem:[#allocation49_spill] sm:$0xff] %v4474_v22 }
  0x4b   : > { %7524 = vst [vmem:[#allocation22_spill] sm:$0xff] %v4389_v8 }
  0x4d   : > { %1175 = vperm.xlu1 %3788, %v370_v7   ;;  %v250_v7 = vunpack.c.3.s8 %v230_v24 }
  0x4f   : > { %v4411_v24 = vcvt.s32.f32 %v250_v7  ;;  %v4445_v7 = vcvt.s32.f32 %v256_v40  ;;  %v319_v40 = vsub.f32 1.0, %v4438_v61  ;;  %v324_v61 = vsub.f32 1.0, %v4454_v21 }
  0x50   : > { %v326_v21 = vsub.f32 1.0, %v4467_v47 }
  0x51   : > { %1179 = vperm.xlu1 %3788, %v371_v10   ;;  %v309_v10 = vsub.f32 1.0, %v4368_v57  ;;  %7531 = vst [vmem:[#allocation29_spill] sm:$0xff] %v4411_v24  ;;  %v314_v53 = vsub.f32 1.0, %v4411_v24  ;;  %7541 = vst [vmem:[#allocation39_spill] sm:$0xff] %v4445_v7  ;;  %v320_v43 = vsub.f32 1.0, %v4445_v7 }
  0x52   : > { %v4488_v7 = vmul.f32 -1e+30, %v318_v35 }
  0x53   : > { %v4420_v32 = vmul.f32 -1e+30, %v309_v10  ;;  %v4447_v10 = vcvt.s32.f32 %v257_v41  ;;  %v4463_v41 = vcvt.s32.f32 %v263_v0  ;;  %v4469_v51 = vmul.f32 -1e+30, %v314_v53 }
  0x54   : > { %v4478_v0 = vcvt.s32.f32 %v264_v23  ;;  %7555 = vst [vmem:[#allocation53_spill] sm:$0xff] %v4488_v7  ;;  %v4495_v23 = vmul.f32 -1e+30, %v320_v43 }
  0x55   : > { %1183 = vperm.xlu1 %3788, %v372_v9   ;;  %v4391_v9 = vcvt.s32.f32 %v248_v56  ;;  %7532 = vst [vmem:[#allocation30_spill] sm:$0xff] %v4420_v32  ;;  %v4434_v56 = vcvt.s32.f32 %v253_v25  ;;  %7542 = vst [vmem:[#allocation40_spill] sm:$0xff] %v4447_v10  ;;  %v316_v25 = vsub.f32 1.0, %v4431_v52  ;;  %v321_v52 = vsub.f32 1.0, %v4447_v10 }
  0x56   : > { %7547 = vst [vmem:[#allocation45_spill] sm:$0xff] %v4463_v41  ;;  %7550 = vst [vmem:[#allocation48_spill] sm:$0xff] %v4469_v51  ;;  %v4490_v10 = vmul.f32 -1e+30, %v319_v40  ;;  %v327_v12 = vsub.f32 1.0, %v4463_v41  ;;  %v328_v41 = vsub.f32 1.0, %v4478_v0 }
  0x57   : > { %7525 = vst [vmem:[#allocation23_spill] sm:$0xff] %v4391_v9  ;;  %v312_v31 = vsub.f32 1.0, %v4391_v9  ;;  %7537 = vst [vmem:[#allocation35_spill] sm:$0xff] %v4434_v56  ;;  %v4484_v53 = vmul.f32 -1e+30, %v316_v25  ;;  %v265_v25 = vunpack.c.3.s8 %v4414_v27  ;;  %v3808_v27 = vld [vmem:[%s7215_s1 + $0x40] sm:$0xff]  }
  0x58   : > { %7552 = vst [vmem:[#allocation50_spill] sm:$0xff] %v4478_v0  ;;  %7556 = vst [vmem:[#allocation54_spill] sm:$0xff] %v4490_v10  ;;  %v4504_v40 = vmul.f32 -1e+30, %v324_v61  ;;  %v4521_v61 = vmul.f32 -1e+30, %v327_v12  ;;  %3515 = vmatprep.subr.bf16.mxu0 %v3808_v27 }
  0x59   : > { %1191 = vperm.xlu1 %3788, %v374_v11   ;;  %v310_v11 = vsub.f32 1.0, %v4370_v58  ;;  %v4443_v6 = vmul.f32 -1e+30, %v312_v31  ;;  %v317_v31 = vsub.f32 1.0, %v4434_v56  ;;  %v323_v56 = vsub.f32 1.0, %v4452_v18  ;;  %7553 = vst [vmem:[#allocation51_spill] sm:$0xff] %v4484_v53 }
  0x5a   : > { %7557 = vst [vmem:[#allocation55_spill] sm:$0xff] %v4495_v23  ;;  %7561 = vst [vmem:[#allocation59_spill] sm:$0xff] %v4504_v40  ;;  %v4527_v44 = vcvt.s32.f32 %v265_v25  ;;  %v4529_v58 = vmul.f32 -1e+30, %v328_v41 }
  0x5b   : > { %v4422_v34 = vmul.f32 -1e+30, %v310_v11  ;;  %7540 = vst [vmem:[#allocation38_spill] sm:$0xff] %v4443_v6  ;;  %v4449_v11 = vcvt.s32.f32 %v258_v42  ;;  %v4465_v42 = vcvt.s32.f32 %v261_v1  ;;  %v4482_v1 = vrot.slane %v4364_v54, %v4382_v3  ;;  %7562 = vst [vmem:[#allocation60_spill] sm:$0xff] %v4521_v61 }
  0x5c   : > { %v4486_v2 = vmul.f32 -1e+30, %v317_v31  ;;  %v4502_v35 = vmul.f32 -1e+30, %v323_v56  ;;  %v3809_v56 = vld [vmem:[%s7215_s1] sm:$0xff]   ;;  %7565 = vst [vmem:[#allocation63_spill] sm:$0xff] %v4527_v44 }
  0x5d   : > { %1199 = vperm.xlu1 %3788, %v376_v13   ;;  %v4398_v13 = vrot.slane %v4364_v54, %v4356_v50  ;;  %7533 = vst [vmem:[#allocation31_spill] sm:$0xff] %v4422_v34  ;;  %7543 = vst [vmem:[#allocation41_spill] sm:$0xff] %v4449_v11  ;;  %v322_v46 = vsub.f32 1.0, %v4449_v11  ;;  %v325_v18 = vsub.f32 1.0, %v4465_v42  ;;  %v4497_v11 = vmul.f32 -1e+30, %v321_v52  ;;  %3516 = vmatpush3.bf16.msra.mxu0 %v3809_v56 }
  0x5e   : > { %7548 = vst [vmem:[#allocation46_spill] sm:$0xff] %v4465_v42  ;;  %7554 = vst [vmem:[#allocation52_spill] sm:$0xff] %v4486_v2  ;;  %v266_v42 = vunpack.c.3.s8 %v4417_v28  ;;  %v3810_v28 = vld [vmem:[%s7215_s1 + $0x48] sm:$0xff]  }
  0x5f   : > { %7558 = vst [vmem:[#allocation56_spill] sm:$0xff] %v4497_v11  ;;  %v4499_v54 = vmul.f32 -1e+30, %v322_v46  ;;  %7560 = vst [vmem:[#allocation58_spill] sm:$0xff] %v4502_v35  ;;  %v4523_v0 = vmul.f32 -1e+30, %v325_v18  ;;  %3517 = vmatprep.subr.bf16.mxu0 %v3810_v28 }
  0x60   : > { %7566 = vst [vmem:[#allocation64_spill] sm:$0xff] %v4529_v58  ;;  %v4531_v38 = vcvt.s32.f32 %v266_v42  ;;  %v3811_v18 = vld [vmem:[%s7215_s1 + $0x8] sm:$0xff]  }
  0x61   : > { %7559 = vst [vmem:[#allocation57_spill] sm:$0xff] %v4499_v54  ;;  %7563 = vst [vmem:[#allocation61_spill] sm:$0xff] %v4523_v0  ;;  %3518 = vmatpush3.bf16.msra.mxu0 %v3811_v18 }
  0x62   : > { %7567 = vst [vmem:[#allocation65_spill] sm:$0xff] %v4531_v38 }
  0x93   : > { %v393_v31 = vpop.permute.xlu1 %392  ;;  %v383_v60 = vpop.permute.xlu0 %382 }
  0x94   : > { %v475_v47 = vadd.f32 %v4398_v13, %v393_v31  ;;  %v476_v43 = vadd.f32 %v4482_v1, %v393_v31  ;;  %v471_v52 = vadd.f32 %v4398_v13, %v383_v60  ;;  %v472_v46 = vadd.f32 %v4482_v1, %v383_v60 }
  0x95   : > { %v4525_v31 = vmul.f32 -1e+30, %v326_v21 }
  0x96   : > { %v507_v62 = vmul.f32 0.2, %v475_v47  ;;  %v508_v60 = vmul.f32 0.2, %v476_v43  ;;  %v503_v9 = vmul.f32 0.2, %v471_v52 }
  0x97   : > { %7564 = vst [vmem:[#allocation62_spill] sm:$0xff] %v4525_v31  ;;  %v504_v24 = vmul.f32 0.2, %v472_v46  ;;  %v398_v57 = vpop.permute.xlu1 %397  ;;  %v388_v45 = vpop.permute.xlu0 %387 }
  0x98   : > { %v477_v21 = vadd.f32 %v4398_v13, %v398_v57  ;;  %v478_v12 = vadd.f32 %v4482_v1, %v398_v57  ;;  %v473_v25 = vadd.f32 %v4398_v13, %v388_v45  ;;  %v474_v27 = vadd.f32 %v4482_v1, %v388_v45 }
  0x99   : > { %v535_v48 = vmax.f32 %v471_v52, %v503_v9  ;;  %v536_v49 = vmax.f32 %v472_v46, %v504_v24  ;;  %v539_v41 = vmax.f32 %v475_v47, %v507_v62  ;;  %v540_v39 = vmax.f32 %v476_v43, %v508_v60 }
  0x9a   : > { %v509_v42 = vmul.f32 0.2, %v477_v21  ;;  %v505_v37 = vmul.f32 0.2, %v473_v25  ;;  %v506_v33 = vmul.f32 0.2, %v474_v27 }
  0x9b   : > { %v408_v30 = vpop.permute.xlu1 %407  ;;  %v403_v29 = vpop.permute.xlu0 %402  ;;  %v4542_v3 = vadd.f32 %v535_v48, %v4366_v55  ;;  %v4545_v57 = vadd.f32 %v536_v49, %v4372_v59  ;;  %v4548_v45 = vadd.f32 %v539_v41, %v4386_v5  ;;  %v510_v9 = vmul.f32 0.2, %v478_v12 }
  0x9c   : > { %v479_v62 = vadd.f32 %v4398_v13, %v403_v29  ;;  %v480_v24 = vadd.f32 %v4482_v1, %v403_v29  ;;  %v537_v52 = vmax.f32 %v473_v25, %v505_v37  ;;  %v538_v48 = vmax.f32 %v474_v27, %v506_v33 }
  0x9d   : > { %7568 = vst [vmem:[#allocation66_spill] sm:$0xff] %v4542_v3  ;;  %7569 = vst [vmem:[#allocation67_spill] sm:$0xff] %v4545_v57  ;;  %v599_v43 = vmax.f32 %v4542_v3, %v4545_v57  ;;  %v4556_v46 = vadd.f32 %v540_v39, %v4389_v8  ;;  %v481_v49 = vadd.f32 %v4398_v13, %v408_v30 }
  0x9e   : > { %7570 = vst [vmem:[#allocation68_spill] sm:$0xff] %v4548_v45  ;;  %v482_v28 = vadd.f32 %v4482_v1, %v408_v30  ;;  %v511_v60 = vmul.f32 0.2, %v479_v62  ;;  %v541_v18 = vmax.f32 %v477_v21, %v509_v42  ;;  %v512_v41 = vmul.f32 0.2, %v480_v24 }
  0x9f   : > { %7571 = vst [vmem:[#allocation69_spill] sm:$0xff] %v4556_v46  ;;  %600 = vmax.xlane.f32.xlu0 %v599_v43  ;;  %v418_v56 = vpop.permute.xlu1 %417  ;;  %v413_v29 = vpop.permute.xlu0 %412  ;;  %v4561_v47 = vadd.f32 %v537_v52, %v4378_v63  ;;  %v4564_v57 = vadd.f32 %v538_v48, %v4384_v4  ;;  %v605_v33 = vmax.f32 %v4548_v45, %v4556_v46  ;;  %v513_v52 = vmul.f32 0.2, %v481_v49 }
  0xa0   : > { %v4569_v37 = vadd.f32 %v4398_v13, %v418_v56  ;;  %v4572_v30 = vadd.f32 %v4482_v1, %v418_v56  ;;  %v483_v39 = vadd.f32 %v4398_v13, %v413_v29  ;;  %v484_v21 = vadd.f32 %v4482_v1, %v413_v29 }
  0xa1   : > { %7572 = vst [vmem:[#allocation70_spill] sm:$0xff] %v4561_v47  ;;  %7573 = vst [vmem:[#allocation71_spill] sm:$0xff] %v4564_v57  ;;  %v602_v25 = vmax.f32 %v4561_v47, %v4564_v57  ;;  %v543_v27 = vmax.f32 %v479_v62, %v511_v60  ;;  %v544_v42 = vmax.f32 %v480_v24, %v512_v41  ;;  %v514_v48 = vmul.f32 0.2, %v482_v28 }
  0xa2   : > { %v542_v43 = vmax.f32 %v478_v12, %v510_v9  ;;  %v515_v3 = vmul.f32 0.2, %v483_v39  ;;  %v4579_v45 = vadd.f32 %v541_v18, %v4405_v19  ;;  %v516_v46 = vmul.f32 0.2, %v484_v21 }
  0xa3   : > { %603 = vmax.xlane.f32.xlu1 %v602_v25  ;;  %606 = vmax.xlane.f32.xlu0 %v605_v33  ;;  %v428_v56 = vpop.permute.xlu1 %427  ;;  %v423_v8 = vpop.permute.xlu0 %422  ;;  %v4582_v5 = vadd.f32 %v543_v27, %v4400_v14  ;;  %v4585_v29 = vadd.f32 %v544_v42, %v4402_v17  ;;  %v517_v12 = vmul.f32 0.2, %v4569_v37  ;;  %v518_v9 = vmul.f32 0.2, %v4572_v30 }
  0xa4   : > { %7574 = vst [vmem:[#allocation72_spill] sm:$0xff] %v4579_v45  ;;  %v4588_v62 = vadd.f32 %v542_v43, %v4407_v20  ;;  %v487_v24 = vadd.f32 %v4398_v13, %v423_v8  ;;  %v488_v60 = vadd.f32 %v4482_v1, %v423_v8  ;;  %v547_v33 = vmax.f32 %v483_v39, %v515_v3 }
  0xa5   : > { %7575 = vst [vmem:[#allocation73_spill] sm:$0xff] %v4582_v5  ;;  %7576 = vst [vmem:[#allocation74_spill] sm:$0xff] %v4585_v29  ;;  %v611_v18 = vmax.f32 %v4582_v5, %v4585_v29  ;;  %v548_v25 = vmax.f32 %v484_v21, %v516_v46  ;;  %v4599_v27 = vadd.f32 %v4398_v13, %v428_v56 }
  0xa6   : > { %7577 = vst [vmem:[#allocation75_spill] sm:$0xff] %v4588_v62  ;;  %v608_v41 = vmax.f32 %v4579_v45, %v4588_v62  ;;  %v4602_v42 = vadd.f32 %v4482_v1, %v428_v56  ;;  %v519_v43 = vmul.f32 0.2, %v487_v24  ;;  %v545_v57 = vmax.f32 %v481_v49, %v513_v52 }
  0xa7   : > { %v520_v47 = vmul.f32 0.2, %v488_v60  ;;  %612 = vmax.xlane.f32.xlu1 %v611_v18  ;;  %v438_v8 = vpop.permute.xlu1 %437  ;;  %v433_v20 = vpop.permute.xlu0 %432  ;;  %v4605_v5 = vadd.f32 %v547_v33, %v4424_v36  ;;  %v4608_v29 = vadd.f32 %v548_v25, %v4443_v6  ;;  %v546_v3 = vmax.f32 %v482_v28, %v514_v48 }
  0xa8   : > { %609 = vmax.xlane.f32.xlu0 %v608_v41  ;;  %v4611_v46 = vadd.f32 %v4398_v13, %v438_v8  ;;  %v4614_v39 = vadd.f32 %v4482_v1, %v438_v8  ;;  %v491_v49 = vadd.f32 %v4398_v13, %v433_v20  ;;  %v492_v21 = vadd.f32 %v4482_v1, %v433_v20 }
  0xa9   : > { %7578 = vst [vmem:[#allocation76_spill] sm:$0xff] %v4605_v5  ;;  %7579 = vst [vmem:[#allocation77_spill] sm:$0xff] %v4608_v29  ;;  %v617_v52 = vmax.f32 %v4605_v5, %v4608_v29  ;;  %v4621_v56 = vadd.f32 %v545_v57, %v4420_v32  ;;  %v4624_v18 = vadd.f32 %v546_v3, %v4422_v34  ;;  %v521_v48 = vmul.f32 0.2, %v4599_v27 }
  0xaa   : > { %v551_v28 = vmax.f32 %v487_v24, %v519_v43  ;;  %v522_v41 = vmul.f32 0.2, %v4602_v42  ;;  %v523_v33 = vmul.f32 0.2, %v491_v49  ;;  %v552_v25 = vmax.f32 %v488_v60, %v520_v47 }
  0xab   : > { %7580 = vst [vmem:[#allocation78_spill] sm:$0xff] %v4621_v56  ;;  %7581 = vst [vmem:[#allocation79_spill] sm:$0xff] %v4624_v18  ;;  %v524_v8 = vmul.f32 0.2, %v492_v21  ;;  %618 = vmax.xlane.f32.xlu1 %v617_v52  ;;  %v614_v20 = vmax.f32 %v4621_v56, %v4624_v18  ;;  %v448_v62 = vpop.permute.xlu1 %447  ;;  %v443_v5 = vpop.permute.xlu0 %442  ;;  %v549_v3 = vmax.f32 %v4569_v37, %v517_v12  ;;  %v525_v24 = vmul.f32 0.2, %v4611_v46 }
  0xac   : > { %v4631_v57 = vadd.f32 %v551_v28, %v4474_v22  ;;  %v526_v43 = vmul.f32 0.2, %v4614_v39  ;;  %v495_v29 = vadd.f32 %v4398_v13, %v443_v5  ;;  %v496_v47 = vadd.f32 %v4482_v1, %v443_v5 }
  0xad   : > { %615 = vmax.xlane.f32.xlu0 %v614_v20  ;;  %v4639_v60 = vadd.f32 %v552_v25, %v4484_v53  ;;  %v550_v52 = vmax.f32 %v4572_v30, %v518_v9  ;;  %v4643_v18 = vadd.f32 %v549_v3, %v4458_v26  ;;  %v555_v28 = vmax.f32 %v491_v49, %v523_v33 }
  0xae   : > { %7582 = vst [vmem:[#allocation80_spill] sm:$0xff] %v4631_v57  ;;  %v497_v37 = vadd.f32 %v4398_v13, %v448_v62  ;;  %v498_v12 = vadd.f32 %v4482_v1, %v448_v62  ;;  %v527_v56 = vmul.f32 0.2, %v495_v29  ;;  %v556_v45 = vmax.f32 %v492_v21, %v524_v8 }
  0xaf   : > { %7583 = vst [vmem:[#allocation81_spill] sm:$0xff] %v4639_v60  ;;  %v528_v34 = vmul.f32 0.2, %v496_v47  ;;  %v623_v5 = vmax.f32 %v4631_v57, %v4639_v60  ;;  %v4650_v20 = vadd.f32 %v550_v52, %v4469_v51  ;;  %v458_v25 = vpop.permute.xlu1 %457  ;;  %v453_v32 = vpop.permute.xlu0 %452  ;;  %v4653_v30 = vadd.f32 %v555_v28, %v4490_v10 }
  0xb0   : > { %v501_v9 = vadd.f32 %v4398_v13, %v458_v25  ;;  %v502_v49 = vadd.f32 %v4482_v1, %v458_v25  ;;  %v499_v62 = vadd.f32 %v4398_v13, %v453_v32  ;;  %v500_v21 = vadd.f32 %v4482_v1, %v453_v32 }
  0xb1   : > { %7584 = vst [vmem:[#allocation82_spill] sm:$0xff] %v4653_v30  ;;  %624 = vmax.xlane.f32.xlu1 %v623_v5  ;;  %v620_v33 = vmax.f32 %v4643_v18, %v4650_v20  ;;  %v4662_v8 = vadd.f32 %v556_v45, %v4495_v23  ;;  %v553_v3 = vmax.f32 %v4599_v27, %v521_v48  ;;  %v529_v28 = vmul.f32 0.2, %v497_v37  ;;  %v3812_v45 = vld [vmem:[%s7215_s1 + $0x50] sm:$0xff]  }
  0xb2   : > { %v554_v52 = vmax.f32 %v4602_v42, %v522_v41  ;;  %v530_v60 = vmul.f32 0.2, %v498_v12  ;;  %v531_v57 = vmul.f32 0.2, %v499_v62  ;;  %v559_v51 = vmax.f32 %v495_v29, %v527_v56  ;;  %v3813_v27 = vld [vmem:[%s7215_s1 + $0x10] sm:$0xff]   ;;  %3519 = vmatprep.subr.bf16.mxu0 %v3812_v45 }
  0xb3   : > { %7585 = vst [vmem:[#allocation83_spill] sm:$0xff] %v4662_v8  ;;  %621 = vmax.xlane.f32.xlu0 %v620_v33  ;;  %v532_v25 = vmul.f32 0.2, %v500_v21  ;;  %v629_v13 = vmax.f32 %v4653_v30, %v4662_v8  ;;  %v4669_v32 = vadd.f32 %v553_v3, %v4486_v2  ;;  %v560_v29 = vmax.f32 %v496_v47, %v528_v34 }
  0xb4   : > { %v4672_v1 = vadd.f32 %v554_v52, %v4488_v7  ;;  %v4681_v42 = vadd.f32 %v559_v51, %v4502_v35  ;;  %v557_v56 = vmax.f32 %v4611_v46, %v525_v24  ;;  %v558_v48 = vmax.f32 %v4614_v39, %v526_v43  ;;  %3520 = vmatpush3.bf16.msra.mxu0 %v3813_v27 }
  0xb5   : > { %7586 = vst [vmem:[#allocation84_spill] sm:$0xff] %v4669_v32  ;;  %v533_v41 = vmul.f32 0.2, %v501_v9  ;;  %v534_v5 = vmul.f32 0.2, %v502_v49  ;;  %630 = vmax.xlane.f32.xlu1 %v629_v13  ;;  %v563_v3 = vmax.f32 %v499_v62, %v531_v57  ;;  %v4688_v52 = vadd.f32 %v560_v29, %v4504_v40  ;;  %v3814_v57 = vld [vmem:[%s7215_s1 + $0x58] sm:$0xff]  }
  0xb6   : > { %7587 = vst [vmem:[#allocation85_spill] sm:$0xff] %v4681_v42  ;;  %v626_v33 = vmax.f32 %v4669_v32, %v4672_v1  ;;  %v4691_v8 = vadd.f32 %v557_v56, %v4497_v11  ;;  %v4694_v34 = vadd.f32 %v558_v48, %v4499_v54  ;;  %v564_v51 = vmax.f32 %v500_v21, %v532_v25  ;;  %v3816_v56 = vld [vmem:[%s7215_s1 + $0x60] sm:$0xff]  }
  0xb7   : > { %7588 = vst [vmem:[#allocation86_spill] sm:$0xff] %v4688_v52  ;;  %v4697_v46 = vadd.f32 %v563_v3, %v4521_v61  ;;  %v561_v39 = vmax.f32 %v497_v37, %v529_v28  ;;  %v635_v24 = vmax.f32 %v4681_v42, %v4688_v52  ;;  %v562_v47 = vmax.f32 %v498_v12, %v530_v60  ;;  %v3815_v37 = vld [vmem:[%s7215_s1 + $0x18] sm:$0xff]   ;;  %v3817_v48 = vld [vmem:[%s7215_s1 + $0x20] sm:$0xff]  }
  0xb8   : > { %7589 = vst [vmem:[#allocation87_spill] sm:$0xff] %v4691_v8  ;;  %7590 = vst [vmem:[#allocation88_spill] sm:$0xff] %v4694_v34  ;;  %627 = vmax.xlane.f32.xlu0 %v626_v33  ;;  %v4705_v43 = vadd.f32 %v564_v51, %v4529_v58  ;;  %v7593_v62 = vsub.f32 1.0, %v4527_v44  ;;  %v632_v28 = vmax.f32 %v4691_v8, %v4694_v34  ;;  %v7596_v13 = vsub.f32 1.0, %v4531_v38  ;;  %v1148_v51 = vpop.permute.xlu1 %1147 }
  0xb9   : > { %7591 = vst [vmem:[#allocation89_spill] sm:$0xff] %v4697_v46  ;;  %v4717_v25 = vadd.f32 %v561_v39, %v4523_v0  ;;  %v565_v27 = vmax.f32 %v501_v9, %v533_v41  ;;  %3521 = vmatprep.subr.bf16.mxu0 %v3814_v57  ;;  %636 = vmax.xlane.f32.xlu1 %v635_v24  ;;  %v3820_v39 = vld [vmem:[%s7215_s1 + $0x70] sm:$0xff]   ;;  %v3822_v24 = vld [vmem:[%s7215_s1 + $0x78] sm:$0xff]  }
  0xba   : > { %7592 = vst [vmem:[#allocation90_spill] sm:$0xff] %v4705_v43  ;;  %v4709_v21 = vmul.f32 -1e+30, %v7593_v62  ;;  %v4721_v45 = vmul.f32 -1e+30, %v7596_v13  ;;  %v641_v60 = vmax.f32 %v4697_v46, %v4705_v43  ;;  %v4726_v12 = vadd.f32 %v562_v47, %v4525_v31  ;;  %3522 = vmatpush3.bf16.msra.mxu0 %v3815_v37  ;;  %v3821_v57 = vld [vmem:[%s7215_s1 + $0x30] sm:$0xff]  }
  0xbb   : > { %7595 = vst [vmem:[#allocation92_spill] sm:$0xff] %v4717_v25  ;;  %v566_v29 = vmax.f32 %v502_v49, %v534_v5  ;;  %3523 = vmatprep.subr.bf16.mxu0 %v3816_v56  ;;  %v3818_v49 = vld [vmem:[%s7215_s1 + $0x68] sm:$0xff]   ;;  %v3823_v62 = vld [vmem:[%s7215_s1 + $0x38] sm:$0xff]   ;;  %v3509_v13 = vld [vmem:[%s7216_s2 + $0x1] ss:$4 sm:$0x3] }
  0xbc   : > { %7594 = vst [vmem:[#allocation91_spill] sm:$0xff] %v4709_v21  ;;  %7597 = vst [vmem:[#allocation93_spill] sm:$0xff] %v4721_v45  ;;  %633 = vmax.xlane.f32.xlu0 %v632_v28  ;;  %v638_v9 = vmax.f32 %v4717_v25, %v4726_v12  ;;  %v4737_v41 = vadd.f32 %v565_v27, %v4709_v21  ;;  %v3819_v5 = vld [vmem:[%s7215_s1 + $0x28] sm:$0xff]   ;;  %v1156_v47 = vpop.permute.xlu1 %1155 }
  0xbd   : > { %7598 = vst [vmem:[#allocation94_spill] sm:$0xff] %v4726_v12  ;;  %v4740_v33 = vadd.f32 %v566_v29, %v4721_v45  ;;  %642 = vmax.xlane.f32.xlu1 %v641_v60  ;;  %v1152_v60 = vpop.permute.xlu0 %1151  ;;  %v4768_v29 = vrot.slane %v3509_v13, %v4356_v50  ;;  %v7601_v56 = vld [vmem:[#allocation19_spill] sm:$0xff] }
  0xbe   : > { %7599 = vst [vmem:[#allocation95_spill] sm:$0xff] %v4737_v41  ;;  %3524 = vmatpush3.bf16.msra.mxu0 %v3817_v48  ;;  %v4771_v48 = vrot.slane %v3509_v13, %v7601_v56 }
  0xbf   : > { %7600 = vst [vmem:[#allocation96_spill] sm:$0xff] %v4740_v33  ;;  %v644_v3 = vmax.f32 %v4737_v41, %v4740_v33  ;;  %3525 = vmatprep.subr.bf16.mxu0 %v3818_v49  ;;  %v1225_v13 = vadd.f32 %v4768_v29, %v1156_v47 }
  0xc0   : > { %639 = vmax.xlane.f32.xlu0 %v638_v9  ;;  %v1160_v37 = vpop.permute.xlu1 %1159  ;;  %v1223_v9 = vadd.f32 %v4768_v29, %v1152_v60  ;;  %v1224_v49 = vadd.f32 %v4771_v48, %v1152_v60  ;;  %v1226_v56 = vadd.f32 %v4771_v48, %v1156_v47 }
  0xc1   : > { %v1188_v50 = vpop.permute.xlu0 %1187  ;;  %v4784_v43 = vadd.f32 %v4768_v29, %v1160_v37  ;;  %v1257_v33 = vmul.f32 0.2, %v1225_v13  ;;  %v1228_v34 = vadd.f32 %v4771_v48, %v1160_v37 }
  0xc2   : > { %3526 = vmatpush3.bf16.msra.mxu0 %v3819_v5  ;;  %v1255_v5 = vmul.f32 0.2, %v1223_v9  ;;  %v1258_v42 = vmul.f32 0.2, %v1226_v56 }
  0xc3   : > { %3527 = vmatprep.subr.bf16.mxu0 %v3820_v39  ;;  %v1222_v39 = vadd.f32 %v4771_v48, %v1148_v51 }
  0xc4   : > { %645 = vmax.xlane.f32.xlu0 %v644_v3  ;;  %v1164_v28 = vpop.permute.xlu1 %1163  ;;  %v1256_v3 = vmul.f32 0.2, %v1224_v49  ;;  %v1287_v44 = vmax.f32 %v1223_v9, %v1255_v5  ;;  %v1290_v30 = vmax.f32 %v1226_v56, %v1258_v42 }
  0xc5   : > { %v1254_v46 = vmul.f32 0.2, %v1222_v39  ;;  %v1196_v45 = vpop.permute.xlu0 %1195 }
  0xc6   : > { %3528 = vmatpush3.bf16.msra.mxu0 %v3821_v57  ;;  %v1229_v57 = vadd.f32 %v4768_v29, %v1164_v28  ;;  %v1288_v38 = vmax.f32 %v1224_v49, %v1256_v3  ;;  %v4790_v47 = vadd.f32 %v1287_v44, %v4378_v63  ;;  %v1259_v44 = vmul.f32 0.2, %v4784_v43 }
  0xc7   : > { %3529 = vmatprep.subr.bf16.mxu0 %v3822_v24  ;;  %v1230_v24 = vadd.f32 %v4771_v48, %v1164_v28  ;;  %v4787_v28 = vadd.f32 %v4768_v29, %v1188_v50  ;;  %v1286_v25 = vmax.f32 %v1222_v39, %v1254_v46  ;;  %v1242_v63 = vadd.f32 %v4771_v48, %v1188_v50 }
  0xc8   : > { %v1168_v27 = vpop.permute.xlu1 %1167  ;;  %v1261_v41 = vmul.f32 0.2, %v1229_v57  ;;  %7602 = vst [vmem:[#allocation97_spill] sm:$0xff] %v4790_v47  ;;  %v4793_v9 = vadd.f32 %v1288_v38, %v4384_v4  ;;  %v4806_v39 = vadd.f32 %v4768_v29, %v1196_v45 }
  0xc9   : > { %v1273_v38 = vmul.f32 0.2, %v4787_v28  ;;  %v1231_v4 = vadd.f32 %v4768_v29, %v1168_v27  ;;  %v4812_v37 = vadd.f32 %v1286_v25, %v4372_v59  ;;  %v1246_v25 = vadd.f32 %v4771_v48, %v1196_v45 }
  0xca   : > { %3530 = vmatpush3.bf16.msra.mxu0 %v3823_v62  ;;  %7603 = vst [vmem:[#allocation98_spill] sm:$0xff] %v4793_v9  ;;  %v1293_v8 = vmax.f32 %v1229_v57, %v1261_v41  ;;  %v1352_v46 = vmax.f32 %v4790_v47, %v4793_v9  ;;  %v1274_v9 = vmul.f32 0.2, %v1242_v63  ;;  %v1289_v47 = vmax.f32 %v1225_v13, %v1257_v33  ;;  %v7605_v13 = vld [vmem:[#allocation21_spill] sm:$0xff] }
  0xcb   : > { %v1263_v32 = vmul.f32 0.2, %v1231_v4 }
  0xce   : > { %1207 = vperm.xlu1 %3788, %v4315_v15   ;;  %v1172_v15 = vpop.permute.xlu1 %1171 }
  0xcf   : > { %v1233_v58 = vadd.f32 %v4768_v29, %v1172_v15  ;;  %v1234_v61 = vadd.f32 %v4771_v48, %v1172_v15 }
  0xd1   : > { %v1265_v49 = vmul.f32 0.2, %v1233_v58  ;;  %v1266_v5 = vmul.f32 0.2, %v1234_v61 }
  0xd2   : > { %v1176_v62 = vpop.permute.xlu1 %1175 }
  0xd3   : > { %v1297_v57 = vmax.f32 %v1233_v58, %v1265_v49  ;;  %v1298_v50 = vmax.f32 %v1234_v61, %v1266_v5  ;;  %v1277_v58 = vmul.f32 0.2, %v4806_v39  ;;  %v1235_v61 = vadd.f32 %v4768_v29, %v1176_v62 }
  0xd4   : > { %v4835_v5 = vadd.f32 %v1289_v47, %v7605_v13 }
  0xd5   : > { %v4825_v49 = vadd.f32 %v1297_v57, %v4424_v36  ;;  %v1306_v36 = vmax.f32 %v1242_v63, %v1274_v9  ;;  %v1267_v59 = vmul.f32 0.2, %v1235_v61 }
  0xd6   : > { %v1180_v3 = vpop.permute.xlu1 %1179 }
  0xd7   : > { %v1237_v21 = vadd.f32 %v4768_v29, %v1180_v3  ;;  %v1238_v12 = vadd.f32 %v4771_v48, %v1180_v3  ;;  %v1260_v3 = vmul.f32 0.2, %v1228_v34 }
  0xd9   : > { %v1292_v57 = vmax.f32 %v1228_v34, %v1260_v3 }
  0xda   : > { %1203 = vperm.xlu0 %3789, %v4318_v16   ;;  %v1221_v16 = vadd.f32 %v4768_v29, %v1148_v51  ;;  %v1262_v51 = vmul.f32 0.2, %v1230_v24 }
  0xdc   : > { %v1253_v60 = vmul.f32 0.2, %v1221_v16  ;;  %v1294_v52 = vmax.f32 %v1230_v24, %v1262_v51  ;;  %v1269_v24 = vmul.f32 0.2, %v1237_v21  ;;  %v4815_v51 = vadd.f32 %v1293_v8, %v4400_v14 }
  0xdd   : > { %v1236_v8 = vadd.f32 %v4771_v48, %v1176_v62  ;;  %v1291_v62 = vmax.f32 %v4784_v43, %v1259_v44  ;;  %v1295_v14 = vmax.f32 %v1231_v4, %v1263_v32  ;;  %v7607_v32 = vld [vmem:[#allocation27_spill] sm:$0xff]  ;;  %v1309_v44 = vmax.f32 %v4806_v39, %v1277_v58 }
  0xde   : > { %v1285_v15 = vmax.f32 %v1221_v16, %v1253_v60  ;;  %v1232_v16 = vadd.f32 %v4771_v48, %v1168_v27  ;;  %v1270_v60 = vmul.f32 0.2, %v1238_v12  ;;  %v4818_v27 = vadd.f32 %v1294_v52, %v4402_v17 }
  0xdf   : > { %v4828_v52 = vadd.f32 %v1298_v50, %v4443_v6  ;;  %v1301_v56 = vmax.f32 %v1237_v21, %v1269_v24  ;;  %v1278_v50 = vmul.f32 0.2, %v1246_v25  ;;  %v1305_v6 = vmax.f32 %v4787_v28, %v1273_v38  ;;  %v7608_v38 = vld [vmem:[#allocation30_spill] sm:$0xff] }
  0xe0   : > { %v4809_v41 = vadd.f32 %v1285_v15, %v4366_v55  ;;  %7604 = vst [vmem:[#allocation99_spill] sm:$0xff] %v4818_v27  ;;  %v1264_v15 = vmul.f32 0.2, %v1232_v16  ;;  %v1184_v55 = vpop.permute.xlu1 %1183  ;;  %v1361_v42 = vmax.f32 %v4815_v51, %v4818_v27  ;;  %v1302_v45 = vmax.f32 %v1238_v12, %v1270_v60  ;;  %v7609_v60 = vld [vmem:[#allocation31_spill] sm:$0xff] }
  0xe1   : > { %v1268_v27 = vmul.f32 0.2, %v1236_v8  ;;  %v1367_v21 = vmax.f32 %v4825_v49, %v4828_v52  ;;  %v1239_v47 = vadd.f32 %v4768_v29, %v1184_v55  ;;  %v4847_v34 = vadd.f32 %v1301_v56, %v4474_v22  ;;  %v7633_v22 = vld [vmem:[#allocation77_spill] sm:$0xff] }
  0xe2   : > { %v1349_v33 = vmax.f32 %v4809_v41, %v4812_v37  ;;  %v1296_v12 = vmax.f32 %v1232_v16, %v1264_v15  ;;  %v4850_v43 = vadd.f32 %v1302_v45, %v4484_v53  ;;  %v4855_v4 = vadd.f32 %v1291_v62, %v4405_v19  ;;  %v7629_v53 = vld [vmem:[#allocation79_spill] sm:$0xff] }
  0xe3   : > { %v4858_v28 = vadd.f32 %v1292_v57, %v7607_v32  ;;  %v4861_v9 = vadd.f32 %v1305_v6, %v4490_v10  ;;  %v4868_v16 = vadd.f32 %v1295_v14, %v7608_v38  ;;  %v1310_v15 = vmax.f32 %v1246_v25, %v1278_v50 }
  0xe4   : > { %v1192_v24 = vpop.permute.xlu1 %1191  ;;  %v4871_v3 = vadd.f32 %v1296_v12, %v7609_v60  ;;  %v1373_v6 = vmax.f32 %v4847_v34, %v4850_v43  ;;  %v1300_v45 = vmax.f32 %v1236_v8, %v1268_v27  ;;  %v4884_v25 = vadd.f32 %v1309_v44, %v4502_v35  ;;  %v7612_v8 = vld [vmem:[#allocation48_spill] sm:$0xff] }
  0xe5   : > { %v1244_v62 = vadd.f32 %v4771_v48, %v1192_v24  ;;  %v1358_v39 = vmax.f32 %v4855_v4, %v4858_v28  ;;  %v4887_v27 = vadd.f32 %v1310_v15, %v4504_v40  ;;  %v7622_v40 = vld [vmem:[#allocation71_spill] sm:$0xff] }
  0xe6   : > { %7610 = vst [vmem:[#allocation100_spill] sm:$0xff] %v4884_v25  ;;  %v4893_v57 = vadd.f32 %v1300_v45, %v7612_v8 }
  0xe7   : > { %7611 = vst [vmem:[#allocation101_spill] sm:$0xff] %v4887_v27  ;;  %v1385_v44 = vmax.f32 %v4884_v25, %v4887_v27  ;;  %v7653_v27 = vld [vmem:[#allocation87_spill] sm:$0xff] }
  0xe8   : > { %v1200_v14 = vpop.permute.xlu1 %1199 }
  0xf2   : > { %1353 = vmax.xlane.f32.xlu1 %v1352_v46  ;;  %v7606_v46 = vld [vmem:[#allocation22_spill] sm:$0xff] }
  0xf3   : > { %v4838_v17 = vadd.f32 %v1290_v30, %v7606_v46  ;;  %v1240_v30 = vadd.f32 %v4771_v48, %v1184_v55  ;;  %v4864_v55 = vadd.f32 %v1306_v36, %v4495_v23  ;;  %v1243_v36 = vadd.f32 %v4768_v29, %v1192_v24  ;;  %v7627_v23 = vld [vmem:[#allocation74_spill] sm:$0xff] }
  0xf4   : > { %v1276_v24 = vmul.f32 0.2, %v1244_v62 }
  0xf5   : > { %v1355_v63 = vmax.f32 %v4835_v5, %v4838_v17  ;;  %v1272_v56 = vmul.f32 0.2, %v1240_v30  ;;  %v1379_v58 = vmax.f32 %v4861_v9, %v4864_v55  ;;  %v1275_v12 = vmul.f32 0.2, %v1243_v36 }
  0xf6   : > { %1362 = vmax.xlane.f32.xlu1 %v1361_v42  ;;  %v1299_v42 = vmax.f32 %v1235_v61, %v1267_v59  ;;  %v1364_v59 = vmax.f32 %v4868_v16, %v4871_v3  ;;  %v1308_v45 = vmax.f32 %v1244_v62, %v1276_v24 }
  0xf8   : > { %v4890_v61 = vadd.f32 %v1299_v42, %v4458_v26 }
  0xf9   : > { %1350 = vmax.xlane.f32.xlu0 %v1349_v33  ;;  %v1271_v33 = vmul.f32 0.2, %v1239_v47 }
  0xfa   : > { %1368 = vmax.xlane.f32.xlu1 %v1367_v21  ;;  %v1304_v21 = vmax.f32 %v1240_v30, %v1272_v56  ;;  %v1370_v15 = vmax.f32 %v4890_v61, %v4893_v57  ;;  %v1307_v56 = vmax.f32 %v1243_v36, %v1275_v12 }
  0xfb   : > { %v1303_v50 = vmax.f32 %v1239_v47, %v1271_v33 }
  0xfc   : > { %v4905_v47 = vadd.f32 %v1304_v21, %v4488_v7 }
  0xfd   : > { %1356 = vmax.xlane.f32.xlu0 %v1355_v63  ;;  %v1247_v63 = vadd.f32 %v4768_v29, %v1200_v14  ;;  %v4902_v42 = vadd.f32 %v1303_v50, %v4486_v2 }
  0xfe   : > { %1374 = vmax.xlane.f32.xlu1 %v1373_v6  ;;  %v1248_v6 = vadd.f32 %v4771_v48, %v1200_v14  ;;  %7614 = vst [vmem:[#allocation103_spill] sm:$0xff] %v4905_v47  ;;  %v4910_v14 = vadd.f32 %v1307_v56, %v4497_v11 }
  0xff   : > { %7613 = vst [vmem:[#allocation102_spill] sm:$0xff] %v4902_v42  ;;  %v1279_v30 = vmul.f32 0.2, %v1247_v63 }
 0x100   : > { %v1280_v33 = vmul.f32 0.2, %v1248_v6  ;;  %7615 = vst [vmem:[#allocation104_spill] sm:$0xff] %v4910_v14 }
 0x101   : > { %1359 = vmax.xlane.f32.xlu0 %v1358_v39  ;;  %v1376_v39 = vmax.f32 %v4902_v42, %v4905_v47 }
 0x102   : > { %1380 = vmax.xlane.f32.xlu1 %v1379_v58  ;;  %v4913_v58 = vadd.f32 %v1308_v45, %v4499_v54  ;;  %v1312_v50 = vmax.f32 %v1248_v6, %v1280_v33 }
 0x104   : > { %7616 = vst [vmem:[#allocation105_spill] sm:$0xff] %v4913_v58  ;;  %v1382_v21 = vmax.f32 %v4910_v14, %v4913_v58  ;;  %v4921_v62 = vadd.f32 %v1312_v50, %v4525_v31  ;;  %v7651_v58 = vld [vmem:[#allocation29_spill] sm:$0xff] }
 0x105   : > { %1365 = vmax.xlane.f32.xlu0 %v1364_v59  ;;  %v1311_v59 = vmax.f32 %v1247_v63, %v1279_v30  ;;  %v7620_v63 = vld [vmem:[#allocation67_spill] sm:$0xff] }
 0x106   : > { %1386 = vmax.xlane.f32.xlu1 %v1385_v44  ;;  %7618 = vst [vmem:[#allocation107_spill] sm:$0xff] %v4921_v62  ;;  %v7619_v44 = vld [vmem:[#allocation66_spill] sm:$0xff] }
 0x107   : > { %v4918_v36 = vadd.f32 %v1311_v59, %v4523_v0 }
 0x109   : > { %1371 = vmax.xlane.f32.xlu0 %v1370_v15  ;;  %7617 = vst [vmem:[#allocation106_spill] sm:$0xff] %v4918_v36  ;;  %v1388_v12 = vmax.f32 %v4918_v36, %v4921_v62 }
 0x10d   : > { %1377 = vmax.xlane.f32.xlu0 %v1376_v39  ;;  %v7621_v39 = vld [vmem:[#allocation70_spill] sm:$0xff] }
 0x111   : > { %1383 = vmax.xlane.f32.xlu0 %v1382_v21  ;;  %v7623_v21 = vld [vmem:[#allocation69_spill] sm:$0xff] }
 0x115   : > { %1389 = vmax.xlane.f32.xlu0 %v1388_v12 }
 0x12c   : > { %v601_v24 = vpop.xlane.xlu0 %600 }
 0x12d   : > { %v647_v15 = vsub.f32 %v7619_v44, %v601_v24  ;;  %v648_v6 = vsub.f32 %v7620_v63, %v601_v24  ;;  %v7624_v44 = vld [vmem:[#allocation72_spill] sm:$0xff] }
 0x12e   : > { %v7625_v24 = vld [vmem:[#allocation68_spill] sm:$0xff] }
 0x12f   : > { %v679_v30 = vmul.f32 1.442695, %v647_v15  ;;  %v681_v33 = vmul.f32 1.442695, %v648_v6  ;;  %v7626_v6 = vld [vmem:[#allocation75_spill] sm:$0xff] }
 0x130   : > { %v604_v56 = vpop.xlane.xlu1 %603  ;;  %v607_v45 = vpop.xlane.xlu0 %606 }
 0x131   : > { %3824 = vpow2.f32 %v679_v30  ;;  %v649_v59 = vsub.f32 %v7621_v39, %v604_v56  ;;  %v650_v50 = vsub.f32 %v7622_v40, %v604_v56  ;;  %v652_v35 = vsub.f32 %v7623_v21, %v607_v45 }
 0x132   : > { %3826 = vpow2.f32 %v681_v33  ;;  %v651_v15 = vsub.f32 %v7625_v24, %v607_v45 }
 0x133   : > { %v683_v31 = vmul.f32 1.442695, %v649_v59  ;;  %v685_v0 = vmul.f32 1.442695, %v650_v50  ;;  %v689_v63 = vmul.f32 1.442695, %v652_v35 }
 0x134   : > { %v613_v12 = vpop.xlane.xlu1 %612  ;;  %v687_v56 = vmul.f32 1.442695, %v651_v15  ;;  %v7630_v35 = vld [vmem:[#allocation2_spill] sm:$0xff] }
 0x135   : > { %v610_v54 = vpop.xlane.xlu0 %609  ;;  %3828 = vpow2.f32 %v683_v31  ;;  %v656_v39 = vsub.f32 %v7627_v23, %v613_v12  ;;  %v7632_v23 = vld [vmem:[#allocation3_spill] sm:$0xff] }
 0x136   : > { %v653_v11 = vsub.f32 %v7624_v44, %v610_v54  ;;  %3830 = vpow2.f32 %v685_v0  ;;  %v654_v30 = vsub.f32 %v7626_v6, %v610_v54  ;;  %v7628_v44 = vld [vmem:[#allocation78_spill] sm:$0xff]  ;;  %v7631_v54 = vld [vmem:[#allocation73_spill] sm:$0xff] }
 0x137   : > { %3832 = vpow2.f32 %v689_v63  ;;  %v697_v21 = vmul.f32 1.442695, %v656_v39  ;;  %v655_v6 = vsub.f32 %v7631_v54, %v613_v12  ;;  %v7636_v12 = vld [vmem:[#allocation76_spill] sm:$0xff] }
 0x138   : > { %v691_v10 = vmul.f32 1.442695, %v653_v11  ;;  %v693_v40 = vmul.f32 1.442695, %v654_v30  ;;  %v619_v33 = vpop.xlane.xlu1 %618 }
 0x139   : > { %v660_v39 = vsub.f32 %v7633_v22, %v619_v33  ;;  %v659_v54 = vsub.f32 %v7636_v12, %v619_v33 }
 0x13a   : > { %v616_v59 = vpop.xlane.xlu0 %615  ;;  %3834 = vpow2.f32 %v691_v10 }
 0x13b   : > { %v3825_v50 = vpop.eup %3824  ;;  %3836 = vpow2.f32 %v693_v40  ;;  %v657_v0 = vsub.f32 %v7628_v44, %v616_v59  ;;  %v658_v45 = vsub.f32 %v7629_v53, %v616_v59  ;;  %v7635_v53 = vld [vmem:[#allocation4_spill] sm:$0xff]  ;;  %v705_v8 = vmul.f32 1.442695, %v660_v39 }
 0x13c   : > { %v3827_v31 = vpop.eup %3826  ;;  %v743_v24 = vmul.f32 %v3825_v50, %v7630_v35  ;;  %3838 = vpow2.f32 %v687_v56  ;;  %v695_v50 = vmul.f32 1.442695, %v655_v6  ;;  %v7639_v6 = vld [vmem:[#allocation81_spill] sm:$0xff] }
 0x13d   : > { %v744_v11 = vmul.f32 %v3827_v31, %v7632_v23  ;;  %v701_v30 = vmul.f32 1.442695, %v658_v45  ;;  %3840 = vpow2.f32 %v697_v21  ;;  %v699_v7 = vmul.f32 1.442695, %v657_v0  ;;  %v7637_v31 = vld [vmem:[#allocation80_spill] sm:$0xff]  ;;  %v7638_v21 = vld [vmem:[#allocation5_spill] sm:$0xff] }
 0x13e   : > { %v625_v15 = vpop.xlane.xlu1 %624 }
 0x13f   : > { %v3829_v63 = vpop.eup %3828  ;;  %v4940_v10 = vadd.f32 %v744_v11, %v743_v24  ;;  %3842 = vpow2.f32 %v701_v30  ;;  %v663_v45 = vsub.f32 %v7637_v31, %v625_v15  ;;  %v664_v60 = vsub.f32 %v7639_v6, %v625_v15  ;;  %v7641_v15 = vld [vmem:[#allocation11_spill] sm:$0xff] }
 0x140   : > { %v3831_v40 = vpop.eup %3830  ;;  %v622_v44 = vpop.xlane.xlu0 %621  ;;  %v4943_v59 = vmul.f32 %v3829_v63, %v7635_v53  ;;  %3844 = vpow2.f32 %v699_v7  ;;  %v703_v31 = vmul.f32 1.442695, %v659_v54  ;;  %v7640_v7 = vld [vmem:[#allocation7_spill] sm:$0xff] }
 0x141   : > { %7634 = vst [vmem:[#allocation66_spill] sm:$0xff] %v4940_v10  ;;  %v662_v56 = vsub.f32 %v4650_v20, %v622_v44  ;;  %v4951_v22 = vmul.f32 %v3831_v40, %v7638_v21  ;;  %v661_v0 = vsub.f32 %v4643_v18, %v622_v44  ;;  %v3833_v63 = vpop.eup %3832  ;;  %3846 = vpow2.f32 %v695_v50 }
 0x142   : > { %v4948_v2 = vpop.xlane.xlu1 %630  ;;  %v887_v26 = vpack.c.bf16 %v4943_v59, %v743_v24  ;;  %v711_v46 = vmul.f32 1.442695, %v663_v45  ;;  %v4961_v24 = vmul.f32 %v3833_v63, %v7640_v7  ;;  %v713_v50 = vmul.f32 1.442695, %v664_v60  ;;  %v7650_v7 = vld [vmem:[#allocation14_spill] sm:$0xff] }
 0x143   : > { %v709_v30 = vmul.f32 1.442695, %v662_v56  ;;  %v888_v20 = vpack.c.bf16 %v4951_v22, %v744_v11  ;;  %v707_v18 = vmul.f32 1.442695, %v661_v0 }
 0x144   : > { %v3835_v12 = vpop.eup %3834 }
 0x145   : > { %v628_v33 = vpop.xlane.xlu0 %627  ;;  %v3837_v40 = vpop.eup %3836  ;;  %3848 = vpow2.f32 %v709_v30  ;;  %1063 = vmatprep.mubr.bf16.mxu0 %v888_v20  ;;  %v7644_v20 = vld [vmem:[#allocation6_spill] sm:$0xff] }
 0x146   : > { %v666_v38 = vsub.f32 %v4672_v1, %v628_v33  ;;  %3850 = vpow2.f32 %v705_v8  ;;  %v4958_v39 = vpop.xlane.xlu1 %636  ;;  %1064 = vmatmul.mubr.bf16.vlgmr.msra.gmra.mrb[0].mxu0 %v887_v26  ;;  %v4964_v44 = vmul.f32 %v3837_v40, %v7641_v15  ;;  %v3839_v11 = vpop.eup %3838  ;;  %v7642_v8 = vld [vmem:[#allocation10_spill] sm:$0xff]  ;;  %v7643_v26 = vld [vmem:[#allocation84_spill] sm:$0xff]  ;;  %v7645_v40 = vld [vmem:[#allocation15_spill] sm:$0xff] }
 0x147   : > { %v3841_v56 = vpop.eup %3840  ;;  %3852 = vpow2.f32 %v703_v31  ;;  %v4969_v0 = vmul.f32 %v3835_v12, %v7642_v8  ;;  %v665_v63 = vsub.f32 %v7643_v26, %v628_v33  ;;  %v4975_v60 = vmul.f32 %v3839_v11, %v7644_v20  ;;  %v7647_v12 = vld [vmem:[#allocation82_spill] sm:$0xff]  ;;  %v7649_v11 = vld [vmem:[#allocation83_spill] sm:$0xff] }
 0x148   : > { %v717_v1 = vmul.f32 1.442695, %v666_v38  ;;  %v890_v45 = vpack.c.bf16 %v4964_v44, %v4961_v24  ;;  %3854 = vpow2.f32 %v711_v46  ;;  %v7646_v38 = vld [vmem:[#allocation9_spill] sm:$0xff]  ;;  %v667_v32 = vsub.f32 %v7647_v12, %v4948_v2  ;;  %v7648_v46 = vld [vmem:[#allocation88_spill] sm:$0xff] }
 0x149   : > { %v634_v54 = vpop.xlane.xlu0 %633  ;;  %v3843_v30 = vpop.eup %3842  ;;  %3856 = vpow2.f32 %v707_v18  ;;  %v4981_v13 = vmul.f32 %v3841_v56, %v7646_v38  ;;  %v889_v33 = vpack.c.bf16 %v4969_v0, %v4975_v60  ;;  %v668_v26 = vsub.f32 %v7649_v11, %v4948_v2 }
 0x14a   : > { %v4972_v6 = vpop.xlane.xlu1 %642  ;;  %1071 = vmatprep.mubr.bf16.mxu0 %v890_v45  ;;  %v4978_v31 = vmul.f32 %v3843_v30, %v7645_v40  ;;  %3858 = vpow2.f32 %v713_v50  ;;  %v670_v18 = vsub.f32 %v7648_v46, %v634_v54  ;;  %v3845_v45 = vpop.eup %3844  ;;  %v715_v30 = vmul.f32 1.442695, %v665_v63 }
 0x14b   : > { %3860 = vpow2.f32 %v717_v1  ;;  %v3847_v56 = vpop.eup %3846  ;;  %v719_v62 = vmul.f32 1.442695, %v667_v32  ;;  %v4997_v2 = vmul.f32 %v3845_v45, %v7650_v7  ;;  %v721_v11 = vmul.f32 1.442695, %v668_v26  ;;  %v7656_v26 = vld [vmem:[#allocation23_spill] sm:$0xff] }
 0x14c   : > { %v892_v50 = vpack.c.bf16 %v4978_v31, %v4981_v13  ;;  %v725_v36 = vmul.f32 1.442695, %v670_v18  ;;  %3862 = vpow2.f32 %v715_v30  ;;  %v7655_v18 = vld [vmem:[#allocation94_spill] sm:$0xff] }
 0x14d   : > { %v4990_v19 = vpop.xlane.xlu0 %639 }
 0x14e   : > { %v1208_v38 = vpop.permute.xlu1 %1207  ;;  %1072 = vmatmul.mubr.bf16.gmra.mrb[4].mxu0 %v889_v33  ;;  %v7652_v33 = vld [vmem:[#allocation86_spill] sm:$0xff]  ;;  %v674_v45 = vsub.f32 %v7655_v18, %v4990_v19  ;;  %3864 = vpow2.f32 %v725_v36 }
 0x14f   : > { %v3849_v12 = vpop.eup %3848  ;;  %v1251_v1 = vadd.f32 %v4768_v29, %v1208_v38  ;;  %v1252_v46 = vadd.f32 %v4771_v48, %v1208_v38  ;;  %1079 = vmatprep.mubr.bf16.mxu0 %v892_v50  ;;  %v672_v20 = vsub.f32 %v7652_v33, %v4958_v39  ;;  %v669_v38 = vsub.f32 %v7653_v27, %v634_v54  ;;  %v7654_v50 = vld [vmem:[#allocation8_spill] sm:$0xff]  ;;  %v7657_v54 = vld [vmem:[#allocation91_spill] sm:$0xff]  ;;  %v7659_v33 = vld [vmem:[#allocation93_spill] sm:$0xff] }
 0x150   : > { %v3851_v40 = vpop.eup %3850  ;;  %v5000_v14 = vmul.f32 %v3849_v12, %v7651_v58  ;;  %v751_v25 = vmul.f32 %v3847_v56, %v7654_v50  ;;  %3866 = vpow2.f32 %v719_v62  ;;  %v733_v36 = vmul.f32 1.442695, %v674_v45 }
 0x151   : > { %v1283_v15 = vmul.f32 0.2, %v1251_v1  ;;  %v1284_v8 = vmul.f32 0.2, %v1252_v46  ;;  %v3853_v63 = vpop.eup %3852  ;;  %v5008_v7 = vpop.xlane.xlu0 %645  ;;  %v756_v47 = vmul.f32 %v3851_v40, %v7656_v26  ;;  %3868 = vpow2.f32 %v721_v11  ;;  %v7664_v11 = vld [vmem:[#allocation33_spill] sm:$0xff] }
 0x152   : > { %v3855_v32 = vpop.eup %3854  ;;  %v891_v30 = vpack.c.bf16 %v4997_v2, %v751_v25  ;;  %v723_v10 = vmul.f32 1.442695, %v669_v38  ;;  %v729_v40 = vmul.f32 1.442695, %v672_v20  ;;  %v7666_v20 = vld [vmem:[#allocation36_spill] sm:$0xff] }
 0x153   : > { %v1315_v42 = vmax.f32 %v1251_v1, %v1283_v15  ;;  %v1316_v12 = vmax.f32 %v1252_v46, %v1284_v8  ;;  %v3857_v58 = vpop.eup %3856  ;;  %v894_v27 = vpack.c.bf16 %v5000_v14, %v756_v47  ;;  %v7661_v15 = vld [vmem:[#allocation17_spill] sm:$0xff]  ;;  %v7662_v46 = vld [vmem:[#allocation28_spill] sm:$0xff]  ;;  %v759_v38 = vmul.f32 %v3855_v32, %v7664_v11 }
 0x154   : > { %v3859_v35 = vpop.eup %3858  ;;  %v755_v8 = vmul.f32 %v3853_v63, %v7661_v15  ;;  %v757_v26 = vmul.f32 %v3857_v58, %v7662_v46  ;;  %v5035_v58 = vadd.f32 %v4981_v13, %v751_v25  ;;  %3870 = vpow2.f32 %v723_v10 }
 0x155   : > { %v5014_v56 = vadd.f32 %v1315_v42, %v7657_v54  ;;  %v5017_v50 = vadd.f32 %v1316_v12, %v7659_v33  ;;  %v3861_v18 = vpop.eup %3860  ;;  %v7663_v33 = vld [vmem:[#allocation34_spill] sm:$0xff]  ;;  %3872 = vpow2.f32 %v733_v36 }
 0x156   : > { %1080 = vmatmul.mubr.bf16.gmra.mrb[8].mxu0 %v891_v30  ;;  %v760_v54 = vmul.f32 %v3859_v35, %v7663_v33  ;;  %v7665_v30 = vld [vmem:[#allocation92_spill] sm:$0xff]  ;;  %v762_v45 = vmul.f32 %v3861_v18, %v7666_v20  ;;  %v7667_v35 = vld [vmem:[#allocation85_spill] sm:$0xff]  ;;  %v778_v18 = vadd.f32 %v4951_v22, %v4943_v59  ;;  %3874 = vpow2.f32 %v729_v40 }
 0x157   : > { %7658 = vst [vmem:[#allocation67_spill] sm:$0xff] %v5014_v56  ;;  %7660 = vst [vmem:[#allocation70_spill] sm:$0xff] %v5017_v50  ;;  %1087 = vmatprep.mubr.bf16.mxu0 %v894_v27  ;;  %v1394_v62 = vmax.f32 %v5014_v56, %v5017_v50  ;;  %v673_v63 = vsub.f32 %v7665_v30, %v4990_v19  ;;  %v5032_v27 = vadd.f32 %v4961_v24, %v4975_v60  ;;  %v7668_v19 = vld [vmem:[#allocation96_spill] sm:$0xff]  ;;  %v3863_v24 = vpop.eup %3862 }
 0x158   : > { %v671_v32 = vsub.f32 %v7667_v35, %v4958_v39  ;;  %v893_v60 = vpack.c.bf16 %v757_v26, %v755_v8  ;;  %v5045_v25 = vadd.f32 %v760_v54, %v759_v38  ;;  %v896_v50 = vpack.c.bf16 %v762_v45, %v760_v54  ;;  %v3865_v39 = vpop.eup %3864  ;;  %v7670_v35 = vld [vmem:[#allocation95_spill] sm:$0xff]  ;;  %v7671_v56 = vld [vmem:[#allocation60_spill] sm:$0xff] }
 0x159   : > { %v1204_v1 = vpop.permute.xlu0 %1203  ;;  %1395 = vmax.xlane.f32.xlu0 %v1394_v62  ;;  %v678_v62 = vsub.f32 %v7668_v19, %v5008_v7  ;;  %v731_v36 = vmul.f32 1.442695, %v673_v63  ;;  %v677_v19 = vsub.f32 %v7670_v35, %v5008_v7  ;;  %v7672_v22 = vld [vmem:[#allocation64_spill] sm:$0xff]  ;;  %v784_v40 = vadd.f32 %v4964_v44, %v4969_v0 }
 0x15a   : > { %v1249_v42 = vadd.f32 %v4768_v29, %v1204_v1  ;;  %v1250_v12 = vadd.f32 %v4771_v48, %v1204_v1  ;;  %v5037_v1 = vadd.f32 %v756_v47, %v755_v8  ;;  %v7669_v47 = vld [vmem:[#allocation90_spill] sm:$0xff] }
 0x15b   : > { %v676_v10 = vsub.f32 %v7669_v47, %v4972_v6  ;;  %v741_v54 = vmul.f32 1.442695, %v678_v62  ;;  %3876 = vpow2.f32 %v731_v36 }
 0x15c   : > { %v1281_v29 = vmul.f32 0.2, %v1249_v42  ;;  %v1282_v48 = vmul.f32 0.2, %v1250_v12 }
 0x15d   : > { %779 = vadd.xlane.f32.xlu0 %v778_v18  ;;  %v737_v18 = vmul.f32 1.442695, %v676_v10 }
 0x15e   : > { %v1313_v30 = vmax.f32 %v1249_v42, %v1281_v29  ;;  %v1314_v13 = vmax.f32 %v1250_v12, %v1282_v48  ;;  %1088 = vmatmul.mubr.bf16.gmra.mrb[12].mxu0 %v893_v60  ;;  %v3867_v42 = vpop.eup %3866  ;;  %v727_v12 = vmul.f32 1.442695, %v671_v32  ;;  %v7673_v48 = vld [vmem:[#allocation35_spill] sm:$0xff]  ;;  %v7674_v60 = vld [vmem:[#allocation41_spill] sm:$0xff] }
 0x15f   : > { %1095 = vmatprep.mubr.bf16.mxu0 %v896_v50  ;;  %v3869_v29 = vpop.eup %3868  ;;  %v761_v7 = vmul.f32 %v3863_v24, %v7673_v48  ;;  %v790_v50 = vadd.f32 %v4978_v31, %v4997_v2  ;;  %v7675_v32 = vld [vmem:[#allocation39_spill] sm:$0xff]  ;;  %v7676_v24 = vld [vmem:[#allocation89_spill] sm:$0xff]  ;;  %v796_v31 = vadd.f32 %v5000_v14, %v757_v26  ;;  %v7677_v2 = vld [vmem:[#allocation40_spill] sm:$0xff] }
 0x160   : > { %v5052_v59 = vadd.f32 %v1313_v30, %v7671_v56  ;;  %v5055_v8 = vadd.f32 %v1314_v13, %v7672_v22  ;;  %v766_v30 = vmul.f32 %v3865_v39, %v7674_v60  ;;  %v739_v13 = vmul.f32 1.442695, %v677_v19  ;;  %v3871_v0 = vpop.eup %3870  ;;  %v7688_v22 = vld [vmem:[#allocation97_spill] sm:$0xff] }
 0x161   : > { %785 = vadd.xlane.f32.xlu0 %v784_v40  ;;  %3878 = vpow2.f32 %v727_v12  ;;  %v5066_v44 = vmul.f32 %v3869_v29, %v7675_v32  ;;  %v895_v62 = vpack.c.bf16 %v761_v7, %v759_v38  ;;  %v3873_v47 = vpop.eup %3872  ;;  %v675_v10 = vsub.f32 %v7676_v24, %v4972_v6  ;;  %v7678_v12 = vld [vmem:[#allocation47_spill] sm:$0xff]  ;;  %v7679_v40 = vld [vmem:[#allocation37_spill] sm:$0xff] }
 0x162   : > { %v1391_v63 = vmax.f32 %v5052_v59, %v5055_v8  ;;  %3880 = vpow2.f32 %v741_v54  ;;  %v3875_v36 = vpop.eup %3874  ;;  %v765_v35 = vmul.f32 %v3871_v0, %v7677_v2  ;;  %v770_v38 = vmul.f32 %v3873_v47, %v7678_v12  ;;  %v7680_v54 = vld [vmem:[#allocation43_spill] sm:$0xff]  ;;  %v7681_v47 = vld [vmem:[#allocation46_spill] sm:$0xff] }
 0x163   : > { %3882 = vpow2.f32 %v737_v18  ;;  %v898_v39 = vpack.c.bf16 %v766_v30, %v5066_v44  ;;  %v735_v19 = vmul.f32 1.442695, %v675_v10  ;;  %v5075_v29 = vmul.f32 %v3867_v42, %v7679_v40  ;;  %v7683_v10 = vld [vmem:[#allocation42_spill] sm:$0xff] }
 0x164   : > { %1392 = vmax.xlane.f32.xlu1 %v1391_v63  ;;  %3884 = vpow2.f32 %v739_v13  ;;  %v802_v6 = vadd.f32 %v762_v45, %v761_v7  ;;  %v5078_v63 = vmul.f32 %v3875_v36, %v7680_v54  ;;  %v7682_v45 = vld [vmem:[#allocation65_spill] sm:$0xff]  ;;  %v5090_v36 = vld [vmem:[%s7215_s1] sm:$0xff]  }
 0x165   : > { %791 = vadd.xlane.f32.xlu0 %v790_v50  ;;  %v3877_v18 = vpop.eup %3876  ;;  %v897_v13 = vpack.c.bf16 %v765_v35, %v5075_v29  ;;  %3886 = vpow2.f32 %v735_v19  ;;  %7684 = vst [vmem:[#allocation71_spill] sm:$0xff] %v5090_v36  ;;  %v7686_v19 = vld [vmem:[#allocation63_spill] sm:$0xff] }
 0x166   : > { %1096 = vmatmul.mubr.bf16.gmra.mrb[16].mxu0 %v895_v62  ;;  %v900_v14 = vpack.c.bf16 %v770_v38, %v5078_v63  ;;  %v808_v62 = vadd.f32 %v766_v30, %v765_v35  ;;  %v769_v42 = vmul.f32 %v3877_v18, %v7681_v47  ;;  %v7685_v30 = vld [vmem:[#allocation50_spill] sm:$0xff] }
 0x167   : > { %1103 = vmatprep.mubr.bf16.mxu0 %v898_v39 }
 0x169   : > { %797 = vadd.xlane.f32.xlu0 %v796_v31  ;;  %v814_v31 = vadd.f32 %v770_v38, %v769_v42 }
 0x16b   : > { %v3879_v50 = vpop.eup %3878 }
 0x16c   : > { %v3881_v26 = vpop.eup %3880  ;;  %v5085_v39 = vmul.f32 %v3879_v50, %v7683_v10 }
 0x16d   : > { %803 = vadd.xlane.f32.xlu0 %v802_v6  ;;  %v3883_v0 = vpop.eup %3882  ;;  %v774_v7 = vmul.f32 %v3881_v26, %v7682_v45  ;;  %v7687_v26 = vld [vmem:[#allocation45_spill] sm:$0xff] }
 0x16e   : > { %1104 = vmatmul.mubr.bf16.gmra.mrb[20].mxu0 %v897_v13  ;;  %v3885_v24 = vpop.eup %3884  ;;  %v5095_v35 = vmul.f32 %v3883_v0, %v7685_v30  ;;  %v899_v18 = vpack.c.bf16 %v769_v42, %v5085_v39 }
 0x16f   : > { %1111 = vmatprep.mubr.bf16.mxu0 %v900_v14  ;;  %v773_v6 = vmul.f32 %v3885_v24, %v7686_v19  ;;  %v3887_v50 = vpop.eup %3886  ;;  %v7689_v24 = vld [vmem:[#allocation98_spill] sm:$0xff] }
 0x170   : > { %v902_v13 = vpack.c.bf16 %v774_v7, %v5095_v35 }
 0x171   : > { %809 = vadd.xlane.f32.xlu0 %v808_v62  ;;  %v820_v14 = vadd.f32 %v774_v7, %v773_v6  ;;  %v5101_v62 = vmul.f32 %v3887_v50, %v7687_v26 }
 0x173   : > { %v901_v38 = vpack.c.bf16 %v773_v6, %v5101_v62 }
 0x175   : > { %1653 = vrot.lane.b32.xlu1 %v5090_v36, %s4250_s20  ;;  %815 = vadd.xlane.f32.xlu0 %v814_v31 }
 0x176   : > { %1112 = vmatmul.mubr.bf16.gmra.mrb[24].mxu0 %v899_v18 }
 0x177   : > { %1119 = vmatprep.mubr.bf16.mxu0 %v902_v13 }
 0x179   : > { %821 = vadd.xlane.f32.xlu0 %v820_v14  ;;  %v7690_v14 = vld [vmem:[#allocation99_spill] sm:$0xff] }
 0x17e   : > { %1120 = vmatmul.mubr.bf16.gmra.mrb[28].mxu0 %v901_v38 }
 0x17f   : > { %v1354_v0 = vpop.xlane.xlu1 %1353 }
 0x180   : > { %v1399_v56 = vsub.f32 %v7688_v22, %v1354_v0  ;;  %v1400_v36 = vsub.f32 %v7689_v24, %v1354_v0  ;;  %v7395_v24 = vmov 2  }
 0x181   : > { %3790 = vset.pattern.permute.xlu0 %v7395_v24  ;;  %3791 = vset.pattern.permute.xlu1 %v7395_v24 }
 0x182   : > { %v1433_v42 = vmul.f32 1.442695, %v1399_v56  ;;  %v1435_v31 = vmul.f32 1.442695, %v1400_v36 }
 0x183   : > { %v1363_v30 = vpop.xlane.xlu1 %1362 }
 0x184   : > { %3888 = vpow2.f32 %v1433_v42  ;;  %v1405_v7 = vsub.f32 %v4815_v51, %v1363_v30  ;;  %v1406_v6 = vsub.f32 %v7690_v14, %v1363_v30 }
 0x185   : > { %3890 = vpow2.f32 %v1435_v31 }
 0x186   : > { %v1351_v18 = vpop.xlane.xlu0 %1350  ;;  %v1445_v19 = vmul.f32 1.442695, %v1405_v7  ;;  %v1447_v0 = vmul.f32 1.442695, %v1406_v6 }
 0x187   : > { %v1397_v13 = vsub.f32 %v4809_v41, %v1351_v18  ;;  %v1398_v50 = vsub.f32 %v4812_v37, %v1351_v18  ;;  %v1369_v45 = vpop.xlane.xlu1 %1368 }
 0x188   : > { %v1409_v51 = vsub.f32 %v4825_v49, %v1369_v45  ;;  %v1410_v30 = vsub.f32 %v4828_v52, %v1369_v45 }
 0x189   : > { %v1429_v38 = vmul.f32 1.442695, %v1397_v13  ;;  %v1431_v26 = vmul.f32 1.442695, %v1398_v50 }
 0x18a   : > { %v1357_v22 = vpop.xlane.xlu0 %1356  ;;  %v1453_v14 = vmul.f32 1.442695, %v1409_v51  ;;  %v1455_v49 = vmul.f32 1.442695, %v1410_v30 }
 0x18b   : > { %v1401_v56 = vsub.f32 %v4835_v5, %v1357_v22  ;;  %v1402_v36 = vsub.f32 %v4838_v17, %v1357_v22  ;;  %3892 = vpow2.f32 %v1429_v38  ;;  %v1375_v37 = vpop.xlane.xlu1 %1374 }
 0x18c   : > { %3894 = vpow2.f32 %v1431_v26  ;;  %v1413_v52 = vsub.f32 %v4847_v34, %v1375_v37 }
 0x18d   : > { %v1437_v41 = vmul.f32 1.442695, %v1401_v56  ;;  %3896 = vpow2.f32 %v1445_v19  ;;  %v1439_v31 = vmul.f32 1.442695, %v1402_v36 }
 0x18e   : > { %v1360_v42 = vpop.xlane.xlu0 %1359  ;;  %v3889_v18 = vpop.eup %3888  ;;  %3898 = vpow2.f32 %v1447_v0  ;;  %v1461_v34 = vmul.f32 1.442695, %v1413_v52 }
 0x18f   : > { %v1403_v5 = vsub.f32 %v4855_v4, %v1360_v42  ;;  %v1404_v17 = vsub.f32 %v4858_v28, %v1360_v42  ;;  %v3891_v7 = vpop.eup %3890  ;;  %3900 = vpow2.f32 %v1437_v41  ;;  %v5119_v26 = vmul.f32 %v3889_v18, %v7635_v53  ;;  %v1381_v28 = vpop.xlane.xlu1 %1380 }
 0x190   : > { %v1496_v19 = vmul.f32 %v3891_v7, %v7638_v21  ;;  %3902 = vpow2.f32 %v1439_v31  ;;  %v1414_v4 = vsub.f32 %v4850_v43, %v1375_v37  ;;  %v1417_v41 = vsub.f32 %v4861_v9, %v1381_v28  ;;  %v7691_v9 = vld [vmem:[#allocation66_spill] sm:$0xff] }
 0x191   : > { %v1441_v13 = vmul.f32 1.442695, %v1403_v5  ;;  %v1443_v50 = vmul.f32 1.442695, %v1404_v17  ;;  %v1418_v37 = vsub.f32 %v4864_v55, %v1381_v28 }
 0x192   : > { %v1366_v45 = vpop.xlane.xlu0 %1365  ;;  %v1528_v22 = vadd.f32 %v1496_v19, %v5119_v26  ;;  %v1463_v43 = vmul.f32 1.442695, %v1414_v4  ;;  %v1469_v7 = vmul.f32 1.442695, %v1417_v41 }
 0x193   : > { %v1407_v6 = vsub.f32 %v4868_v16, %v1366_v45  ;;  %v1408_v38 = vsub.f32 %v4871_v3, %v1366_v45  ;;  %3904 = vpow2.f32 %v1441_v13  ;;  %v1387_v13 = vpop.xlane.xlu1 %1386  ;;  %v7694_v45 = vld [vmem:[#allocation103_spill] sm:$0xff]  ;;  %v1471_v28 = vmul.f32 1.442695, %v1418_v37 }
 0x194   : > { %3906 = vpow2.f32 %v1443_v50  ;;  %1529 = vadd.xlane.f32.xlu0 %v1528_v22 }
 0x195   : > { %v1449_v56 = vmul.f32 1.442695, %v1407_v6  ;;  %v1451_v36 = vmul.f32 1.442695, %v1408_v38  ;;  %v3893_v0 = vpop.eup %3892  ;;  %3908 = vpow2.f32 %v1453_v14  ;;  %v7695_v38 = vld [vmem:[#allocation100_spill] sm:$0xff] }
 0x196   : > { %v1372_v51 = vpop.xlane.xlu0 %1371  ;;  %v3895_v30 = vpop.eup %3894  ;;  %3910 = vpow2.f32 %v1455_v49  ;;  %v7693_v49 = vld [vmem:[#allocation102_spill] sm:$0xff]  ;;  %v1421_v22 = vsub.f32 %v7695_v38, %v1387_v13 }
 0x197   : > { %v1411_v16 = vsub.f32 %v4890_v61, %v1372_v51  ;;  %v1412_v3 = vsub.f32 %v4893_v57, %v1372_v51  ;;  %3912 = vpow2.f32 %v1449_v56  ;;  %v5132_v42 = vmul.f32 %v3895_v30, %v7632_v23  ;;  %v3897_v31 = vpop.eup %3896  ;;  %v7692_v57 = vld [vmem:[#allocation2_spill] sm:$0xff] }
 0x198   : > { %3914 = vpow2.f32 %v1451_v36  ;;  %v3899_v18 = vpop.eup %3898  ;;  %v5137_v14 = vmul.f32 %v3893_v0, %v7692_v57  ;;  %v7696_v0 = vld [vmem:[#allocation101_spill] sm:$0xff]  ;;  %v7697_v51 = vld [vmem:[#allocation6_spill] sm:$0xff] }
 0x199   : > { %v1457_v5 = vmul.f32 1.442695, %v1411_v16  ;;  %v1459_v17 = vmul.f32 1.442695, %v1412_v3  ;;  %776 = vadd.xlane.f32.xlu1 %v7691_v9  ;;  %3916 = vpow2.f32 %v1461_v34  ;;  %v1638_v61 = vpack.c.bf16 %v1496_v19, %v5132_v42  ;;  %v3901_v55 = vpop.eup %3900  ;;  %v7698_v3 = vld [vmem:[#allocation104_spill] sm:$0xff]  ;;  %v7700_v9 = vld [vmem:[#allocation10_spill] sm:$0xff] }
 0x19a   : > { %v1378_v50 = vpop.xlane.xlu0 %1377  ;;  %3918 = vpow2.f32 %v1463_v43  ;;  %v3903_v6 = vpop.eup %3902  ;;  %v1422_v34 = vsub.f32 %v7696_v0, %v1387_v13  ;;  %v5145_v30 = vmul.f32 %v3901_v55, %v7697_v51  ;;  %v7708_v43 = vld [vmem:[#allocation9_spill] sm:$0xff] }
 0x19b   : > { %v1415_v52 = vsub.f32 %v7693_v49, %v1378_v50  ;;  %v1416_v4 = vsub.f32 %v7694_v45, %v1378_v50  ;;  %3920 = vpow2.f32 %v1457_v5  ;;  %1733 = vmatprep.mubr.bf16.mxu1 %v1638_v61  ;;  %v7699_v5 = vld [vmem:[#allocation105_spill] sm:$0xff]  ;;  %v7702_v50 = vld [vmem:[#allocation7_spill] sm:$0xff]  ;;  %v7703_v49 = vld [vmem:[#allocation8_spill] sm:$0xff]  ;;  %v5179_v24 = vmul.f32 %v3899_v18, %v7708_v43 }
 0x19c   : > { %3922 = vpow2.f32 %v1459_v17  ;;  %v5158_v55 = vmul.f32 %v3903_v6, %v7702_v50 }
 0x19d   : > { %v1465_v56 = vmul.f32 1.442695, %v1415_v52  ;;  %v1467_v36 = vmul.f32 1.442695, %v1416_v4  ;;  %782 = vadd.xlane.f32.xlu1 %v5032_v27  ;;  %v3905_v19 = vpop.eup %3904  ;;  %3924 = vpow2.f32 %v1469_v7  ;;  %v7701_v7 = vld [vmem:[#allocation11_spill] sm:$0xff]  ;;  %v5161_v52 = vmul.f32 %v3897_v31, %v7703_v49 }
 0x19e   : > { %v1384_v41 = vpop.xlane.xlu0 %1383  ;;  %v3907_v16 = vpop.eup %3906  ;;  %v5152_v61 = vmul.f32 %v3905_v19, %v7700_v9  ;;  %v1477_v4 = vmul.f32 1.442695, %v1421_v22  ;;  %v7704_v22 = vld [vmem:[#allocation106_spill] sm:$0xff] }
 0x19f   : > { %3926 = vpow2.f32 %v1465_v56  ;;  %v1419_v37 = vsub.f32 %v7698_v3, %v1384_v41  ;;  %v1420_v17 = vsub.f32 %v7699_v5, %v1384_v41  ;;  %v3909_v27 = vpop.eup %3908  ;;  %v5155_v13 = vmul.f32 %v3907_v16, %v7701_v7  ;;  %v5435_v7 = vld [vmem:[%s4298_s21 + $0x70] sm:$0xff] }
 0x1a0   : > { %3928 = vpow2.f32 %v1467_v36  ;;  %v3911_v45 = vpop.eup %3910  ;;  %v1479_v36 = vmul.f32 1.442695, %v1422_v34 }
 0x1a1   : > { %v1473_v38 = vmul.f32 1.442695, %v1419_v37  ;;  %v1475_v56 = vmul.f32 1.442695, %v1420_v17  ;;  %788 = vadd.xlane.f32.xlu1 %v5035_v58  ;;  %v3913_v0 = vpop.eup %3912  ;;  %3930 = vpow2.f32 %v1471_v28  ;;  %v1534_v41 = vadd.f32 %v5155_v13, %v5152_v61  ;;  %v7705_v37 = vld [vmem:[#allocation107_spill] sm:$0xff]  ;;  %v7706_v58 = vld [vmem:[#allocation14_spill] sm:$0xff] }
 0x1a2   : > { %v1390_v6 = vpop.xlane.xlu0 %1389  ;;  %v3915_v16 = vpop.eup %3914  ;;  %v5173_v17 = vmul.f32 %v3913_v0, %v7706_v58  ;;  %v7707_v28 = vld [vmem:[#allocation15_spill] sm:$0xff]  ;;  %v4228_v58 = vld [vmem:[%s4298_s21 + $0x58] sm:$0xff] }
 0x1a3   : > { %3932 = vpow2.f32 %v1473_v38  ;;  %v1423_v3 = vsub.f32 %v7704_v22, %v1390_v6  ;;  %v1424_v5 = vsub.f32 %v7705_v37, %v1390_v6  ;;  %v3917_v19 = vpop.eup %3916  ;;  %1535 = vadd.xlane.f32.xlu0 %v1534_v41  ;;  %v5176_v34 = vmul.f32 %v3915_v16, %v7707_v28  ;;  %v7709_v22 = vld [vmem:[#allocation29_spill] sm:$0xff]  ;;  %v5419_v28 = vld [vmem:[%s7215_s1 + $0x10] sm:$0xff]  }
 0x1a4   : > { %3934 = vpow2.f32 %v1475_v56  ;;  %v3919_v49 = vpop.eup %3918 }
 0x1a5   : > { %3936 = vpow2.f32 %v1477_v4  ;;  %v1481_v31 = vmul.f32 1.442695, %v1423_v3  ;;  %v1483_v38 = vmul.f32 1.442695, %v1424_v5  ;;  %794 = vadd.xlane.f32.xlu1 %v5037_v1  ;;  %v3921_v0 = vpop.eup %3920  ;;  %v1540_v56 = vadd.f32 %v5176_v34, %v5173_v17 }
 0x1a6   : > { %3938 = vpow2.f32 %v1479_v36  ;;  %v3923_v16 = vpop.eup %3922  ;;  %v5189_v18 = vmul.f32 %v3921_v0, %v7662_v46  ;;  %v5192_v4 = vmul.f32 %v3909_v27, %v7661_v15  ;;  %v7710_v36 = vld [vmem:[#allocation23_spill] sm:$0xff]  ;;  %v4221_v15 = vld [vmem:[%s4298_s21 + $0x20] sm:$0xff] }
 0x1a7   : > { %3940 = vpow2.f32 %v1481_v31  ;;  %v3925_v1 = vpop.eup %3924  ;;  %1541 = vadd.xlane.f32.xlu0 %v1540_v56  ;;  %v5195_v3 = vmul.f32 %v3923_v16, %v7709_v22  ;;  %v5198_v37 = vmul.f32 %v3911_v45, %v7710_v36  ;;  %v805_v56 = vadd.f32 %v5066_v44, %v5075_v29  ;;  %v5372_v22 = vld [vmem:[%s4298_s21 + $0x60] sm:$0xff] }
 0x1a8   : > { %3942 = vpow2.f32 %v1483_v38  ;;  %v5209_v38 = vmul.f32 %v3917_v19, %v7664_v11  ;;  %v5219_v16 = vmul.f32 %v3919_v49, %v7663_v33  ;;  %v5231_v49 = vmul.f32 %v3925_v1, %v7679_v40 }
 0x1a9   : > { %v3927_v5 = vpop.eup %3926  ;;  %800 = vadd.xlane.f32.xlu1 %v5045_v25  ;;  %v1546_v27 = vadd.f32 %v5195_v3, %v5189_v18 }
 0x1aa   : > { %v3929_v0 = vpop.eup %3928  ;;  %v5206_v6 = vmul.f32 %v3927_v5, %v7673_v48 }
 0x1ab   : > { %v5216_v25 = vmul.f32 %v3929_v0, %v7666_v20  ;;  %v3931_v31 = vpop.eup %3930  ;;  %1547 = vadd.xlane.f32.xlu0 %v1546_v27  ;;  %v811_v27 = vadd.f32 %v5078_v63, %v5085_v39 }
 0x1ad   : > { %v3933_v41 = vpop.eup %3932  ;;  %806 = vadd.xlane.f32.xlu1 %v805_v56  ;;  %v1552_v19 = vadd.f32 %v5216_v25, %v5206_v6  ;;  %v5239_v56 = vmul.f32 %v3931_v31, %v7675_v32 }
 0x1ae   : > { %v3935_v44 = vpop.eup %3934  ;;  %v5228_v29 = vmul.f32 %v3933_v41, %v7677_v2 }
 0x1af   : > { %v3937_v0 = vpop.eup %3936  ;;  %v5236_v5 = vmul.f32 %v3935_v44, %v7674_v60  ;;  %1553 = vadd.xlane.f32.xlu0 %v1552_v19  ;;  %v817_v19 = vadd.f32 %v5095_v35, %v5101_v62  ;;  %v1525_v35 = vadd.f32 %v5132_v42, %v5137_v14  ;;  %v1537_v62 = vadd.f32 %v5179_v24, %v5161_v52 }
 0x1b0   : > { %v3939_v33 = vpop.eup %3938  ;;  %v5251_v31 = vmul.f32 %v3937_v0, %v7683_v10  ;;  %v1555_v42 = vadd.f32 %v5239_v56, %v5231_v49 }
 0x1b1   : > { %v3941_v41 = vpop.eup %3940  ;;  %812 = vadd.xlane.f32.xlu1 %v811_v27  ;;  %v1558_v1 = vadd.f32 %v5236_v5, %v5228_v29  ;;  %v5259_v27 = vmul.f32 %v3939_v33, %v7680_v54  ;;  %v1531_v33 = vadd.f32 %v5158_v55, %v5145_v30 }
 0x1b2   : > { %v3943_v63 = vpop.eup %3942  ;;  %v5248_v39 = vmul.f32 %v3941_v41, %v7681_v47 }
 0x1b3   : > { %v5256_v44 = vmul.f32 %v3943_v63, %v7678_v12  ;;  %1559 = vadd.xlane.f32.xlu0 %v1558_v1  ;;  %v1543_v1 = vadd.f32 %v5198_v37, %v5192_v4  ;;  %v1549_v63 = vadd.f32 %v5219_v16, %v5209_v38 }
 0x1b5   : > { %818 = vadd.xlane.f32.xlu1 %v817_v19  ;;  %v1564_v41 = vadd.f32 %v5256_v44, %v5248_v39  ;;  %v1561_v19 = vadd.f32 %v5259_v27, %v5251_v31 }
 0x1b7   : > { %1565 = vadd.xlane.f32.xlu0 %v1564_v41 }
 0x1b9   : > { %1526 = vadd.xlane.f32.xlu1 %v1525_v35  ;;  %v7711_v35 = vld [vmem:[#allocation67_spill] sm:$0xff] }
 0x1bd   : > { %1532 = vadd.xlane.f32.xlu1 %v1531_v33 }
 0x1c1   : > { %1538 = vadd.xlane.f32.xlu1 %v1537_v62  ;;  %v7712_v62 = vld [vmem:[#allocation70_spill] sm:$0xff] }
 0x1c5   : > { %1544 = vadd.xlane.f32.xlu1 %v1543_v1 }
 0x1c9   : > { %1550 = vadd.xlane.f32.xlu1 %v1549_v63 }
 0x1cd   : > { %1556 = vadd.xlane.f32.xlu1 %v1555_v42 }
 0x1d1   : > { %1562 = vadd.xlane.f32.xlu1 %v1561_v19 }
 0x1e6   : > { %v1396_v41 = vpop.xlane.xlu0 %1395 }
 0x1e7   : > { %v1427_v33 = vsub.f32 %v7711_v35, %v1396_v41  ;;  %v1428_v45 = vsub.f32 %v7712_v62, %v1396_v41  ;;  %v7713_v35 = vld [vmem:[#allocation63_spill] sm:$0xff]  ;;  %v7715_v41 = vld [vmem:[#allocation65_spill] sm:$0xff] }
 0x1e9   : > { %v1489_v0 = vmul.f32 1.442695, %v1427_v33  ;;  %v1491_v2 = vmul.f32 1.442695, %v1428_v45 }
 0x1eb   : > { %3944 = vpow2.f32 %v1489_v0  ;;  %v7719_v0 = vld [vmem:[#allocation50_spill] sm:$0xff] }
 0x1ec   : > { %3946 = vpow2.f32 %v1491_v2 }
 0x1f1   : > { %v1393_v1 = vpop.xlane.xlu1 %1392 }
 0x1f2   : > { %v1425_v63 = vsub.f32 %v5052_v59, %v1393_v1  ;;  %v1426_v54 = vsub.f32 %v5055_v8, %v1393_v1 }
 0x1f4   : > { %v1485_v10 = vmul.f32 1.442695, %v1425_v63  ;;  %v1487_v42 = vmul.f32 1.442695, %v1426_v54  ;;  %v7717_v54 = vld [vmem:[#allocation45_spill] sm:$0xff]  ;;  %v4209_v63 = vld [vmem:[%s4298_s21] sm:$0xff] }
 0x1f5   : > { %v3945_v12 = vpop.eup %3944  ;;  %v5368_v36 = vpop.permute.xlu1 %1653 }
 0x1f6   : > { %3948 = vpow2.f32 %v1485_v10  ;;  %v3947_v19 = vpop.eup %3946  ;;  %v5286_v47 = vmul.f32 %v3945_v12, %v7713_v35  ;;  %v5321_v35 = vld [vmem:[%s7215_s1 + $0x50] sm:$0xff]  }
 0x1f7   : > { %3950 = vpow2.f32 %v1487_v42  ;;  %v5289_v45 = vmul.f32 %v3947_v19, %v7715_v41  ;;  %v4210_v42 = vld [vmem:[%s4298_s21 + $0x8] sm:$0xff]  ;;  %v5310_v19 = vld [vmem:[%s7215_s1 + $0x40] sm:$0xff]  }
 0x1f8   : > { %7714 = vst [vmem:[#allocation69_spill] sm:$0xff] %v5286_v47 }
 0x1f9   : > { %7716 = vst [vmem:[#allocation72_spill] sm:$0xff] %v5289_v45  ;;  %v1570_v2 = vadd.f32 %v5289_v45, %v5286_v47 }
 0x1fb   : > { %1571 = vadd.xlane.f32.xlu0 %v1570_v2  ;;  %v7403_v2 = vmov 3  }
 0x200   : > { %v3949_v59 = vpop.eup %3948 }
 0x201   : > { %v3951_v8 = vpop.eup %3950  ;;  %v5294_v10 = vmul.f32 %v3949_v59, %v7717_v54  ;;  %v4212_v59 = vld [vmem:[%s4298_s21 + $0x28] sm:$0xff] }
 0x202   : > { %v5297_v33 = vmul.f32 %v3951_v8, %v7719_v0  ;;  %v5328_v0 = vld [vmem:[%s4298_s21 + $0x30] sm:$0xff] }
 0x203   : > { %7718 = vst [vmem:[#allocation68_spill] sm:$0xff] %v5294_v10 }
 0x204   : > { %7720 = vst [vmem:[#allocation75_spill] sm:$0xff] %v5297_v33  ;;  %v1567_v62 = vadd.f32 %v5297_v33, %v5294_v10 }
 0x206   : > { %1568 = vadd.xlane.f32.xlu1 %v1567_v62 }
 0x211   : > { %1817 = vperm.xlu0 %3790, %v4209_v63  }
 0x215   : > { %1669 = vrot.lane.b32.xlu0 %v5310_v19, %s4250_s20 }
 0x217   : > { %1821 = vperm.xlu1 %3791, %v4210_v42  }
 0x219   : > { %1837 = vperm.xlu0 %3790, %v4212_v59   ;;  %v3531_v8 = vpop.f32.mrb[0].mxu0 }
 0x21a   : > { %v3532_v62 = vpop.f32.mrb[1].mxu0 }
 0x21b   : > { %3792 = vset.pattern.permute.xlu1 %v7403_v2  ;;  %v5316_v12 = vadd.f32 %v3532_v62, %v3531_v8  ;;  %v3534_v1 = vpop.f32.mrb[2].mxu0  ;;  %v7723_v8 = vmov 2  }
 0x21c   : > { %2487 = vperm.xlu1 %3792, %v4209_v63   ;;  %v3535_v41 = vpop.f32.mrb[3].mxu0 }
 0x21d   : > { %7721 = vst [vmem:[#allocation74_spill] sm:$0xff] %v5316_v12  ;;  %1673 = vrot.lane.b32.xlu0 %v5321_v35, %s4250_s20  ;;  %v5325_v2 = vadd.f32 %v3535_v41, %v3534_v1  ;;  %v4215_v12 = vld [vmem:[%s4298_s21 + $0x10] sm:$0xff]  ;;  %v5338_v41 = vld [vmem:[%s7215_s1 + $0x60] sm:$0xff]  }
 0x21e   : > { %7725 = vst [vmem:[#allocation73_spill] sm:$0xff] %v5338_v41 }
 0x21f   : > { %7722 = vst [vmem:[#allocation78_spill] sm:$0xff] %v5325_v2  ;;  %v5346_v2 = vld [vmem:[%s4298_s21 + $0x40] sm:$0xff] }
 0x220   : > { %2491 = vperm.xlu1 %3792, %v4210_v42   ;;  %v4217_v42 = vld [vmem:[%s4298_s21 + $0x18] sm:$0xff] }
 0x221   : > { %1841 = vperm.xlu0 %3790, %v5328_v0   ;;  %v3537_v63 = vpop.f32.mrb[4].mxu0 }
 0x222   : > { %v3538_v62 = vpop.f32.mrb[5].mxu0 }
 0x223   : > { %v5333_v54 = vadd.f32 %v3538_v62, %v3537_v63  ;;  %v3540_v60 = vpop.f32.mrb[6].mxu0 }
 0x224   : > { %3793 = vset.pattern.permute.xlu1 %v7723_v8  ;;  %v3541_v32 = vpop.f32.mrb[7].mxu0 }
 0x225   : > { %1825 = vperm.xlu1 %3793, %v4215_v12   ;;  %7724 = vst [vmem:[#allocation79_spill] sm:$0xff] %v5333_v54  ;;  %1677 = vrot.lane.b32.xlu0 %v5338_v41, %s4250_s20  ;;  %v5342_v1 = vadd.f32 %v3541_v32, %v3540_v60  ;;  %v7727_v54 = vmov 3   ;;  %v5355_v60 = vld [vmem:[%s7215_s1 + $0x70] sm:$0xff]  }
 0x226   : > { %7729 = vst [vmem:[#allocation80_spill] sm:$0xff] %v5355_v60 }
 0x227   : > { %7726 = vst [vmem:[#allocation77_spill] sm:$0xff] %v5342_v1  ;;  %v5362_v1 = vld [vmem:[%s4298_s21 + $0x50] sm:$0xff] }
 0x229   : > { %1829 = vperm.xlu1 %3793, %v4217_v42   ;;  %1849 = vperm.xlu0 %3790, %v5346_v2   ;;  %v3543_v63 = vpop.f32.mrb[8].mxu0 }
 0x22a   : > { %v3544_v62 = vpop.f32.mrb[9].mxu0 }
 0x22b   : > { %v5350_v40 = vadd.f32 %v3544_v62, %v3543_v63  ;;  %v3546_v11 = vpop.f32.mrb[10].mxu0 }
 0x22c   : > { %v3547_v20 = vpop.f32.mrb[11].mxu0 }
 0x22d   : > { %3794 = vset.pattern.permute.xlu1 %v7727_v54  ;;  %7728 = vst [vmem:[#allocation76_spill] sm:$0xff] %v5350_v40  ;;  %1681 = vrot.lane.b32.xlu0 %v5355_v60, %s4250_s20  ;;  %v5359_v32 = vadd.f32 %v3547_v20, %v3546_v11  ;;  %v5377_v20 = vpop.xlane.xlu0 %779 }
 0x22e   : > { %2495 = vperm.xlu1 %3794, %v4215_v12   ;;  %7733 = vst [vmem:[#allocation88_spill] sm:$0xff] %v5377_v20 }
 0x22f   : > { %7730 = vst [vmem:[#allocation81_spill] sm:$0xff] %v5359_v32 }
 0x231   : > { %1857 = vperm.xlu0 %3790, %v5362_v1   ;;  %v3549_v63 = vpop.f32.mrb[12].mxu0 }
 0x232   : > { %2499 = vperm.xlu1 %3794, %v4217_v42   ;;  %v3550_v62 = vpop.f32.mrb[13].mxu0  ;;  %v5379_v42 = vpop.xlane.xlu1 %776 }
 0x233   : > { %v5365_v12 = vadd.f32 %v3550_v62, %v3549_v63  ;;  %v3552_v40 = vpop.f32.mrb[14].mxu0  ;;  %7734 = vst [vmem:[#allocation83_spill] sm:$0xff] %v5379_v42 }
 0x234   : > { %v3553_v48 = vpop.f32.mrb[15].mxu0 }
 0x235   : > { %7731 = vst [vmem:[#allocation84_spill] sm:$0xff] %v5365_v12  ;;  %1865 = vperm.xlu0 %3790, %v5372_v22   ;;  %v5375_v11 = vadd.f32 %v3553_v48, %v3552_v40  ;;  %v5387_v40 = vpop.xlane.xlu0 %785 }
 0x236   : > { %3795 = vset.pattern.permute.xlu1 %v7723_v8  ;;  %7737 = vst [vmem:[#allocation94_spill] sm:$0xff] %v5387_v40 }
 0x237   : > { %1833 = vperm.xlu1 %3795, %v4221_v15   ;;  %7732 = vst [vmem:[#allocation82_spill] sm:$0xff] %v5375_v11  ;;  %v5392_v11 = vld [vmem:[%s7215_s1 + $0x48] sm:$0xff]  }
 0x239   : > { %v3555_v63 = vpop.f32.mrb[16].mxu0  ;;  %3803 = vset.pattern.permute.xlu0 %v7727_v54  ;;  %v5410_v40 = vpop.xlane.xlu0 %791 }
 0x23a   : > { %v3556_v62 = vpop.f32.mrb[17].mxu0  ;;  %2507 = vperm.xlu0 %3803, %v4212_v59   ;;  %v5397_v59 = vpop.xlane.xlu1 %782  ;;  %7740 = vst [vmem:[#allocation96_spill] sm:$0xff] %v5410_v40  ;;  %v4229_v40 = vld [vmem:[%s4298_s21 + $0x68] sm:$0xff] }
 0x23b   : > { %3796 = vset.pattern.permute.xlu1 %v7727_v54  ;;  %v5383_v12 = vadd.f32 %v3556_v62, %v3555_v63  ;;  %v3558_v32 = vpop.f32.mrb[18].mxu0  ;;  %7738 = vst [vmem:[#allocation92_spill] sm:$0xff] %v5397_v59  ;;  %v4226_v62 = vld [vmem:[%s4298_s21 + $0x48] sm:$0xff] }
 0x23c   : > { %2503 = vperm.xlu1 %3796, %v4221_v15   ;;  %v3559_v46 = vpop.f32.mrb[19].mxu0  ;;  %v4224_v15 = vld [vmem:[%s4298_s21 + $0x38] sm:$0xff] }
 0x23d   : > { %7735 = vst [vmem:[#allocation86_spill] sm:$0xff] %v5383_v12  ;;  %v5385_v48 = vadd.f32 %v3559_v46, %v3558_v32  ;;  %v5403_v46 = vld [vmem:[%s7215_s1 + $0x8] sm:$0xff]  }
 0x23e   : > { %2515 = vperm.xlu0 %3803, %v4224_v15   ;;  %v5412_v59 = vpop.xlane.xlu1 %788 }
 0x23f   : > { %7736 = vst [vmem:[#allocation87_spill] sm:$0xff] %v5385_v48  ;;  %7741 = vst [vmem:[#allocation90_spill] sm:$0xff] %v5412_v59 }
 0x240   : > { %1671 = vrot.lane.b32.xlu1 %v5392_v11, %s4250_s20 }
 0x241   : > { %3797 = vset.pattern.permute.xlu1 %v7723_v8  ;;  %v3561_v63 = vpop.f32.mrb[20].mxu0 }
 0x242   : > { %v3562_v32 = vpop.f32.mrb[21].mxu0  ;;  %2523 = vperm.xlu0 %3803, %v4226_v62  }
 0x243   : > { %v5408_v48 = vadd.f32 %v3562_v32, %v3561_v63  ;;  %v3564_v12 = vpop.f32.mrb[22].mxu0  ;;  %v5424_v32 = vpop.xlane.xlu0 %797 }
 0x244   : > { %1655 = vrot.lane.b32.xlu1 %v5403_v46, %s4250_s20  ;;  %v3565_v42 = vpop.f32.mrb[23].mxu0  ;;  %7743 = vst [vmem:[#allocation89_spill] sm:$0xff] %v5424_v32 }
 0x245   : > { %7739 = vst [vmem:[#allocation85_spill] sm:$0xff] %v5408_v48  ;;  %v5414_v20 = vadd.f32 %v3565_v42, %v3564_v12  ;;  %v5427_v12 = vpop.xlane.xlu1 %794 }
 0x246   : > { %2531 = vperm.xlu0 %3803, %v4228_v58   ;;  %7744 = vst [vmem:[#allocation97_spill] sm:$0xff] %v5427_v12 }
 0x247   : > { %7742 = vst [vmem:[#allocation95_spill] sm:$0xff] %v5414_v20 }
 0x248   : > { %1657 = vrot.lane.b32.xlu1 %v5419_v28, %s4250_s20 }
 0x249   : > { %v3567_v63 = vpop.f32.mrb[24].mxu0  ;;  %v5441_v32 = vpop.xlane.xlu1 %800 }
 0x24a   : > { %v3568_v48 = vpop.f32.mrb[25].mxu0  ;;  %2539 = vperm.xlu0 %3803, %v4229_v40   ;;  %7748 = vst [vmem:[#allocation102_spill] sm:$0xff] %v5441_v32 }
 0x24b   : > { %v5429_v42 = vadd.f32 %v3568_v48, %v3567_v63  ;;  %v3570_v20 = vpop.f32.mrb[26].mxu0  ;;  %v5446_v48 = vld [vmem:[%s7215_s1 + $0x58] sm:$0xff]  }
 0x24c   : > { %1845 = vperm.xlu1 %3797, %v4224_v15   ;;  %v3571_v59 = vpop.f32.mrb[27].mxu0  ;;  %v5439_v15 = vpop.xlane.xlu0 %803 }
 0x24d   : > { %7745 = vst [vmem:[#allocation98_spill] sm:$0xff] %v5429_v42  ;;  %v5431_v43 = vadd.f32 %v3571_v59, %v3570_v20  ;;  %7747 = vst [vmem:[#allocation66_spill] sm:$0xff] %v5439_v15  ;;  %v5457_v42 = vpop.xlane.xlu1 %806  ;;  %v5462_v15 = vld [vmem:[%s7215_s1 + $0x18] sm:$0xff]  }
 0x24e   : > { %2543 = vperm.xlu0 %3803, %v5435_v7   ;;  %7752 = vst [vmem:[#allocation104_spill] sm:$0xff] %v5457_v42 }
 0x24f   : > { %7746 = vst [vmem:[#allocation99_spill] sm:$0xff] %v5431_v43 }
 0x250   : > { %3798 = vset.pattern.permute.xlu1 %v7727_v54  ;;  %v5455_v43 = vpop.xlane.xlu0 %809 }
 0x251   : > { %2511 = vperm.xlu1 %3798, %v5328_v0   ;;  %v3573_v9 = vpop.f32.mrb[28].mxu0  ;;  %7751 = vst [vmem:[#allocation101_spill] sm:$0xff] %v5455_v43  ;;  %v5488_v43 = vld [vmem:[%s7215_s1 + $0x68] sm:$0xff]  }
 0x252   : > { %v3574_v12 = vpop.f32.mrb[29].mxu0  ;;  %7759 = vst [vmem:[#allocation109_spill] sm:$0xff] %v5488_v43 }
 0x253   : > { %v5450_v20 = vadd.f32 %v3574_v12, %v3573_v9  ;;  %v3576_v59 = vpop.f32.mrb[30].mxu0  ;;  %v5469_v9 = vld [vmem:[%s7215_s1 + $0x20] sm:$0xff]  }
 0x254   : > { %v3577_v63 = vpop.f32.mrb[31].mxu0  ;;  %7753 = vst [vmem:[#allocation105_spill] sm:$0xff] %v5469_v9  ;;  %v5473_v12 = vpop.xlane.xlu0 %815 }
 0x255   : > { %1675 = vrot.lane.b32.xlu1 %v5446_v48, %s4250_s20  ;;  %7749 = vst [vmem:[#allocation103_spill] sm:$0xff] %v5450_v20  ;;  %v5453_v0 = vadd.f32 %v3577_v63, %v3576_v59  ;;  %7754 = vst [vmem:[#allocation106_spill] sm:$0xff] %v5473_v12  ;;  %v5475_v59 = vpop.xlane.xlu1 %812 }
 0x256   : > { %3799 = vset.pattern.permute.xlu1 %v7723_v8  ;;  %7755 = vst [vmem:[#allocation107_spill] sm:$0xff] %v5475_v59  ;;  %v5511_v59 = vld [vmem:[%s7215_s1 + $0x30] sm:$0xff]  }
 0x257   : > { %7750 = vst [vmem:[#allocation100_spill] sm:$0xff] %v5453_v0  ;;  %7765 = vst [vmem:[#allocation115_spill] sm:$0xff] %v5511_v59 }
 0x258   : > { %v5477_v63 = vpop.xlane.xlu0 %821 }
 0x259   : > { %1659 = vrot.lane.b32.xlu1 %v5462_v15, %s4250_s20  ;;  %7756 = vst [vmem:[#allocation67_spill] sm:$0xff] %v5477_v63  ;;  %v5479_v0 = vpop.xlane.xlu1 %818 }
 0x25a   : > { %7757 = vst [vmem:[#allocation70_spill] sm:$0xff] %v5479_v0 }
 0x25c   : > { %v5483_v20 = vpop.xlane.xlu0 %1529 }
 0x25d   : > { %1661 = vrot.lane.b32.xlu1 %v5469_v9, %s4250_s20  ;;  %7758 = vst [vmem:[#allocation108_spill] sm:$0xff] %v5483_v20  ;;  %v5492_v12 = vpop.xlane.xlu1 %1526  ;;  %v7778_v20 = vld [vmem:[#allocation12_spill] sm:$0xff] }
 0x25e   : > { %7760 = vst [vmem:[#allocation110_spill] sm:$0xff] %v5492_v12 }
 0x261   : > { %1853 = vperm.xlu1 %3799, %v4226_v62   ;;  %v5495_v62 = vpop.xlane.xlu0 %1535  ;;  %v5504_v63 = vpop.xlane.xlu1 %1532 }
 0x262   : > { %7761 = vst [vmem:[#allocation111_spill] sm:$0xff] %v5495_v62  ;;  %7763 = vst [vmem:[#allocation113_spill] sm:$0xff] %v5504_v63  ;;  %v5528_v63 = vld [vmem:[%s7215_s1 + $0x78] sm:$0xff]  }
 0x263   : > { %7770 = vst [vmem:[#allocation120_spill] sm:$0xff] %v5528_v63 }
 0x265   : > { %3800 = vset.pattern.permute.xlu1 %v7727_v54  ;;  %v5506_v0 = vpop.xlane.xlu0 %1541  ;;  %v5515_v42 = vpop.xlane.xlu1 %1538 }
 0x266   : > { %2519 = vperm.xlu1 %3800, %v5346_v2   ;;  %v5500_v2 = vld [vmem:[%s7215_s1 + $0x28] sm:$0xff]   ;;  %7764 = vst [vmem:[#allocation114_spill] sm:$0xff] %v5506_v0  ;;  %7766 = vst [vmem:[#allocation116_spill] sm:$0xff] %v5515_v42 }
 0x267   : > { %7762 = vst [vmem:[#allocation112_spill] sm:$0xff] %v5500_v2 }
 0x269   : > { %v5517_v32 = vpop.xlane.xlu0 %1547  ;;  %v5521_v62 = vpop.xlane.xlu1 %1544 }
 0x26a   : > { %1679 = vrot.lane.b32.xlu1 %v5488_v43, %s4250_s20  ;;  %7767 = vst [vmem:[#allocation117_spill] sm:$0xff] %v5517_v32  ;;  %7768 = vst [vmem:[#allocation118_spill] sm:$0xff] %v5521_v62  ;;  %v7783_v43 = vld [vmem:[#allocation16_spill] sm:$0xff] }
 0x26b   : > { %3801 = vset.pattern.permute.xlu1 %v7723_v8 }
 0x26d   : > { %v5523_v0 = vpop.xlane.xlu0 %1553 }
 0x26e   : > { %1663 = vrot.lane.b32.xlu1 %v5500_v2, %s4250_s20  ;;  %7769 = vst [vmem:[#allocation119_spill] sm:$0xff] %v5523_v0 }
 0x271   : > { %v5542_v0 = vpop.xlane.xlu0 %1559 }
 0x272   : > { %1665 = vrot.lane.b32.xlu1 %v5511_v59, %s4250_s20  ;;  %7773 = vst [vmem:[#allocation123_spill] sm:$0xff] %v5542_v0 }
 0x275   : > { %v5546_v62 = vpop.xlane.xlu0 %1565 }
 0x276   : > { %1861 = vperm.xlu1 %3801, %v4228_v58   ;;  %v5533_v58 = vpop.xlane.xlu1 %1550  ;;  %7775 = vst [vmem:[#allocation125_spill] sm:$0xff] %v5546_v62 }
 0x277   : > { %7771 = vst [vmem:[#allocation121_spill] sm:$0xff] %v5533_v58  ;;  %v3510_v58 = vld [vmem:[%s7216_s2 + $0x2] ss:$4 sm:$0x3] }
 0x278   : > { %v5558_v0 = vrot.slane %v3510_v58, %v7778_v20 }
 0x27a   : > { %3802 = vset.pattern.permute.xlu1 %v7727_v54  ;;  %v5544_v32 = vpop.xlane.xlu1 %1556 }
 0x27b   : > { %2527 = vperm.xlu1 %3802, %v5362_v1   ;;  %v5538_v1 = vld [vmem:[%s7215_s1 + $0x38] sm:$0xff]   ;;  %7774 = vst [vmem:[#allocation124_spill] sm:$0xff] %v5544_v32 }
 0x27c   : > { %7772 = vst [vmem:[#allocation122_spill] sm:$0xff] %v5538_v1 }
 0x27e   : > { %v5555_v12 = vpop.xlane.xlu1 %1562 }
 0x27f   : > { %1683 = vrot.lane.b32.xlu1 %v5528_v63, %s4250_s20  ;;  %7777 = vst [vmem:[#allocation127_spill] sm:$0xff] %v5555_v12  ;;  %v4239_v63 = vld [vmem:[%s4298_s21 + $0x78] sm:$0xff]  ;;  %s4253_s21 = smov 64  }
 0x280   : > { %3804 = vset.pattern.permute.xlu1 %v7723_v8 }
 0x283   : > { %1667 = vrot.lane.b32.xlu1 %v5538_v1, %s4250_s20 }
 0x287   : > { %1869 = vperm.xlu1 %3804, %v4229_v40   ;;  %v7779_v40 = vld [vmem:[#allocation19_spill] sm:$0xff] }
 0x288   : > { %v5553_v42 = vpop.xlane.xlu0 %1571  ;;  %v5561_v32 = vrot.slane %v3510_v58, %v7779_v40 }
 0x289   : > { %7776 = vst [vmem:[#allocation126_spill] sm:$0xff] %v5553_v42  ;;  %v3511_v42 = vld [vmem:[%s7216_s2 + $0x3] ss:$4 sm:$0x3] }
 0x28b   : > { %3805 = vset.pattern.permute.xlu1 %v7727_v54 }
 0x28c   : > { %2535 = vperm.xlu1 %3805, %v5372_v22  }
 0x290   : > { %3806 = vset.pattern.permute.xlu1 %v7723_v8  ;;  %v1818_v62 = vpop.permute.xlu0 %1817 }
 0x291   : > { %1873 = vperm.xlu1 %3806, %v5435_v7   ;;  %v1891_v1 = vadd.f32 %v5558_v0, %v1818_v62  ;;  %v1892_v50 = vadd.f32 %v5561_v32, %v1818_v62  ;;  %v5575_v7 = vrot.slane %v3511_v42, %v7778_v20  ;;  %v5578_v62 = vrot.slane %v3511_v42, %v7779_v40 }
 0x293   : > { %v5565_v22 = vpop.xlane.xlu1 %1568  ;;  %v1923_v12 = vmul.f32 0.2, %v1891_v1  ;;  %v1924_v51 = vmul.f32 0.2, %v1892_v50 }
 0x294   : > { %7780 = vst [vmem:[#allocation12_spill] sm:$0xff] %v5565_v22  ;;  %v1670_v58 = vpop.permute.xlu0 %1669  ;;  %v7781_v22 = vld [vmem:[#allocation13_spill] sm:$0xff] }
 0x295   : > { %1877 = vperm.xlu1 %3806, %v4239_v63   ;;  %v1955_v60 = vmax.f32 %v1891_v1, %v1923_v12  ;;  %v1956_v8 = vmax.f32 %v1892_v50, %v1924_v51  ;;  %3579 = vmatprep.subr.bf16.mxu1 %v1670_v58 }
 0x296   : > { %3580 = vmatpush3.bf16.msra.mxu1 %v5368_v36 }
 0x297   : > { %v1822_v59 = vpop.permute.xlu1 %1821  ;;  %v5582_v2 = vadd.f32 %v1955_v60, %v7781_v22  ;;  %v5585_v41 = vadd.f32 %v1956_v8, %v7783_v43 }
 0x298   : > { %v5629_v23 = vpop.permute.xlu0 %1837 }
 0x299   : > { %3807 = vset.pattern.permute.xlu1 %v7727_v54  ;;  %7782 = vst [vmem:[#allocation19_spill] sm:$0xff] %v5582_v2  ;;  %7784 = vst [vmem:[#allocation13_spill] sm:$0xff] %v5585_v41  ;;  %v2019_v50 = vmax.f32 %v5582_v2, %v5585_v41 }
 0x29a   : > { %2547 = vperm.xlu1 %3807, %v4239_v63  }
 0x29b   : > { %v2488_v51 = vpop.permute.xlu1 %2487  ;;  %2020 = vmax.xlane.f32.xlu0 %v2019_v50 }
 0x29c   : > { %v2561_v36 = vadd.f32 %v5575_v7, %v2488_v51  ;;  %v2562_v20 = vadd.f32 %v5578_v62, %v2488_v51 }
 0x29e   : > { %v2593_v42 = vmul.f32 0.2, %v2561_v36  ;;  %v2594_v12 = vmul.f32 0.2, %v2562_v20 }
 0x29f   : > { %v2492_v1 = vpop.permute.xlu1 %2491 }
 0x2a0   : > { %v2625_v54 = vmax.f32 %v2561_v36, %v2593_v42  ;;  %v2626_v40 = vmax.f32 %v2562_v20, %v2594_v12  ;;  %v2563_v60 = vadd.f32 %v5575_v7, %v2492_v1  ;;  %v2564_v58 = vadd.f32 %v5578_v62, %v2492_v1  ;;  %v7785_v20 = vld [vmem:[#allocation18_spill] sm:$0xff]  ;;  %v7787_v12 = vld [vmem:[#allocation20_spill] sm:$0xff] }
 0x2a2   : > { %v2595_v8 = vmul.f32 0.2, %v2563_v60  ;;  %v2596_v63 = vmul.f32 0.2, %v2564_v58  ;;  %v5594_v21 = vadd.f32 %v2625_v54, %v7781_v22  ;;  %v5597_v2 = vadd.f32 %v2626_v40, %v7783_v43 }
 0x2a3   : > { %v1893_v43 = vadd.f32 %v5558_v0, %v1822_v59  ;;  %v1894_v54 = vadd.f32 %v5561_v32, %v1822_v59 }
 0x2a4   : > { %v2627_v53 = vmax.f32 %v2563_v60, %v2595_v8  ;;  %v2628_v51 = vmax.f32 %v2564_v58, %v2596_v63  ;;  %v5599_v50 = vpop.permute.xlu1 %1825  ;;  %v2689_v36 = vmax.f32 %v5594_v21, %v5597_v2 }
 0x2a5   : > { %v1925_v60 = vmul.f32 0.2, %v1893_v43  ;;  %v1926_v58 = vmul.f32 0.2, %v1894_v54 }
 0x2a6   : > { %2690 = vmax.xlane.f32.xlu0 %v2689_v36  ;;  %v5604_v42 = vadd.f32 %v2627_v53, %v7785_v20  ;;  %v5607_v1 = vadd.f32 %v2628_v51, %v7787_v12 }
 0x2a7   : > { %v1957_v53 = vmax.f32 %v1893_v43, %v1925_v60  ;;  %v1958_v63 = vmax.f32 %v1894_v54, %v1926_v58  ;;  %v7791_v43 = vld [vmem:[#allocation71_spill] sm:$0xff] }
 0x2a8   : > { %7786 = vst [vmem:[#allocation16_spill] sm:$0xff] %v5604_v42  ;;  %7788 = vst [vmem:[#allocation18_spill] sm:$0xff] %v5607_v1  ;;  %v1830_v41 = vpop.permute.xlu1 %1829  ;;  %v2692_v22 = vmax.f32 %v5604_v42, %v5607_v1  ;;  %v7803_v1 = vld [vmem:[#allocation22_spill] sm:$0xff] }
 0x2a9   : > { %v5620_v51 = vadd.f32 %v1957_v53, %v7785_v20  ;;  %v5623_v9 = vadd.f32 %v1958_v63, %v7787_v12  ;;  %v1674_v20 = vpop.permute.xlu0 %1673  ;;  %v1897_v63 = vadd.f32 %v5558_v0, %v1830_v41 }
 0x2aa   : > { %2693 = vmax.xlane.f32.xlu0 %v2692_v22 }
 0x2ab   : > { %7789 = vst [vmem:[#allocation20_spill] sm:$0xff] %v5620_v51  ;;  %7790 = vst [vmem:[#allocation128_spill] sm:$0xff] %v5623_v9  ;;  %v2022_v59 = vmax.f32 %v5620_v51, %v5623_v9 }
 0x2ad   : > { %v5613_v40 = vpop.permute.xlu1 %2495 }
 0x2b1   : > { %v5615_v8 = vpop.permute.xlu1 %2499 }
 0x2b6   : > { %v5617_v36 = vpop.permute.xlu1 %1833 }
 0x2bb   : > { %v5625_v22 = vpop.permute.xlu1 %2503 }
 0x2be   : > { %2023 = vmax.xlane.f32.xlu1 %v2022_v59  ;;  %v1898_v59 = vadd.f32 %v5561_v32, %v1830_v41  ;;  %v7796_v41 = vld [vmem:[#allocation26_spill] sm:$0xff] }
 0x2bf   : > { %v1672_v57 = vpop.permute.xlu1 %1671 }
 0x2c0   : > { %2323 = vrot.lane.b32.xlu0 %v7791_v43, %s4253_s21  ;;  %3581 = vmatprep.subr.bf16.mxu1 %v1672_v57  ;;  %v5643_v57 = vpop.permute.xlu0 %1841 }
 0x2c1   : > { %7794 = vst [vmem:[#allocation130_spill] sm:$0xff] %v5643_v57 }
 0x2c3   : > { %v1656_v54 = vpop.permute.xlu1 %1655 }
 0x2c4   : > { %2341 = vrot.lane.b32.xlu0 %v5392_v11, %s4253_s21  ;;  %3582 = vmatpush3.bf16.msra.mxu1 %v1656_v54  ;;  %v1678_v54 = vpop.permute.xlu0 %1677 }
 0x2c5   : > { %3583 = vmatprep.subr.bf16.mxu1 %v1674_v20  ;;  %v1929_v20 = vmul.f32 0.2, %v1897_v63 }
 0x2c7   : > { %v1658_v12 = vpop.permute.xlu1 %1657 }
 0x2c8   : > { %3011 = vrot.lane.b32.xlu0 %v5392_v11, %s4254_s9  ;;  %3584 = vmatpush3.bf16.msra.mxu1 %v1658_v12  ;;  %v1930_v12 = vmul.f32 0.2, %v1898_v59 }
 0x2cb   : > { %v5637_v60 = vpop.permute.xlu1 %1845 }
 0x2cc   : > { %7792 = vst [vmem:[#allocation71_spill] sm:$0xff] %v5637_v60  ;;  %v7798_v60 = vld [vmem:[#allocation27_spill] sm:$0xff] }
 0x2cf   : > { %2339 = vrot.lane.b32.xlu1 %v5310_v19, %s4253_s21 }
 0x2d0   : > { %v5641_v58 = vpop.permute.xlu1 %2511 }
 0x2d1   : > { %7793 = vst [vmem:[#allocation129_spill] sm:$0xff] %v5641_v58  ;;  %v1962_v58 = vmax.f32 %v1898_v59, %v1930_v12 }
 0x2d3   : > { %3009 = vrot.lane.b32.xlu1 %v5310_v19, %s4254_s9  ;;  %v1961_v19 = vmax.f32 %v1897_v63, %v1929_v20  ;;  %v1896_v63 = vadd.f32 %v5561_v32, %v5599_v50 }
 0x2d4   : > { %v1676_v53 = vpop.permute.xlu1 %1675 }
 0x2d5   : > { %3585 = vmatprep.subr.bf16.mxu1 %v1676_v53  ;;  %v5656_v53 = vadd.f32 %v1961_v19, %v7796_v41  ;;  %v1928_v12 = vmul.f32 0.2, %v1896_v63  ;;  %v2565_v19 = vadd.f32 %v5575_v7, %v5613_v40 }
 0x2d7   : > { %2993 = vrot.lane.b32.xlu1 %v7791_v43, %s4254_s9  ;;  %7797 = vst [vmem:[#allocation26_spill] sm:$0xff] %v5656_v53  ;;  %v5659_v43 = vadd.f32 %v1962_v58, %v7798_v60 }
 0x2d8   : > { %v1660_v11 = vpop.permute.xlu1 %1659 }
 0x2d9   : > { %3586 = vmatpush3.bf16.msra.mxu1 %v1660_v11  ;;  %7799 = vst [vmem:[#allocation27_spill] sm:$0xff] %v5659_v43  ;;  %v2028_v11 = vmax.f32 %v5656_v53, %v5659_v43  ;;  %v1960_v53 = vmax.f32 %v1896_v63, %v1928_v12 }
 0x2da   : > { %3587 = vmatprep.subr.bf16.mxu1 %v1678_v54  ;;  %v5665_v54 = vpop.permute.xlu0 %1849 }
 0x2db   : > { %2325 = vrot.lane.b32.xlu1 %v5403_v46, %s4253_s21  ;;  %7801 = vst [vmem:[#allocation133_spill] sm:$0xff] %v5665_v54  ;;  %v5685_v42 = vadd.f32 %v1960_v53, %v7803_v1 }
 0x2dc   : > { %v1662_v51 = vpop.permute.xlu1 %1661 }
 0x2dd   : > { %3588 = vmatpush3.bf16.msra.mxu1 %v1662_v51  ;;  %v1895_v51 = vadd.f32 %v5558_v0, %v5599_v50  ;;  %v2567_v50 = vadd.f32 %v5575_v7, %v5615_v8 }
 0x2de   : > { %v1682_v20 = vpop.permute.xlu0 %1681 }
 0x2df   : > { %v1927_v58 = vmul.f32 0.2, %v1895_v51 }
 0x2e0   : > { %v5653_v57 = vpop.permute.xlu1 %1853 }
 0x2e1   : > { %7795 = vst [vmem:[#allocation131_spill] sm:$0xff] %v5653_v57  ;;  %v7802_v57 = vld [vmem:[#allocation21_spill] sm:$0xff] }
 0x2e5   : > { %v5661_v9 = vpop.permute.xlu1 %2519 }
 0x2e6   : > { %7800 = vst [vmem:[#allocation132_spill] sm:$0xff] %v5661_v9  ;;  %v2597_v9 = vmul.f32 0.2, %v2565_v19 }
 0x2e7   : > { %2029 = vmax.xlane.f32.xlu0 %v2028_v11  ;;  %v2566_v11 = vadd.f32 %v5578_v62, %v5613_v40 }
 0x2e8   : > { %v2629_v40 = vmax.f32 %v2565_v19, %v2597_v9 }
 0x2e9   : > { %v1680_v10 = vpop.permute.xlu1 %1679  ;;  %v2598_v54 = vmul.f32 0.2, %v2566_v11 }
 0x2ea   : > { %3589 = vmatprep.subr.bf16.mxu1 %v1680_v10  ;;  %v1959_v10 = vmax.f32 %v1895_v51, %v1927_v58  ;;  %v2599_v51 = vmul.f32 0.2, %v2567_v50 }
 0x2ec   : > { %v5682_v47 = vadd.f32 %v1959_v10, %v7802_v57  ;;  %v2631_v33 = vmax.f32 %v2567_v50, %v2599_v51  ;;  %v7804_v10 = vpack.c.bf16 %v5119_v26, %v5137_v14  ;;  %v7807_v26 = vpack.c.bf16 %v5176_v34, %v5179_v24  ;;  %v7813_v50 = vld [vmem:[#allocation30_spill] sm:$0xff] }
 0x2ed   : > { %v1664_v59 = vpop.permute.xlu1 %1663  ;;  %v1902_v24 = vadd.f32 %v5561_v32, %v5629_v23  ;;  %v7818_v51 = vpack.c.bf16 %v5256_v44, %v5259_v27  ;;  %v2570_v44 = vadd.f32 %v5578_v62, %v5625_v22 }
 0x2ee   : > { %3590 = vmatpush3.bf16.msra.mxu1 %v1664_v59  ;;  %v2568_v59 = vadd.f32 %v5578_v62, %v5615_v8  ;;  %v2025_v12 = vmax.f32 %v5682_v47, %v5685_v42  ;;  %v5694_v8 = vadd.f32 %v2629_v40, %v7802_v57  ;;  %v5704_v19 = vadd.f32 %v2631_v33, %v7796_v41 }
 0x2ef   : > { %3591 = vmatprep.subr.bf16.mxu1 %v1682_v20  ;;  %v7806_v41 = vpack.c.bf16 %v5152_v61, %v5145_v30  ;;  %v1901_v30 = vadd.f32 %v5558_v0, %v5629_v23 }
 0x2f0   : > { %v2600_v63 = vmul.f32 0.2, %v2568_v59 }
 0x2f1   : > { %v1666_v43 = vpop.permute.xlu1 %1665  ;;  %v1933_v61 = vmul.f32 0.2, %v1901_v30 }
 0x2f2   : > { %3592 = vmatpush3.bf16.msra.mxu1 %v1666_v43  ;;  %v2630_v43 = vmax.f32 %v2566_v11, %v2598_v54  ;;  %v2632_v45 = vmax.f32 %v2568_v59, %v2600_v63  ;;  %v5709_v11 = vpop.permute.xlu0 %1857 }
 0x2f4   : > { %v5697_v53 = vadd.f32 %v2630_v43, %v7803_v1 }
 0x2f5   : > { %v5679_v20 = vpop.permute.xlu1 %1861 }
 0x2f6   : > { %v2695_v54 = vmax.f32 %v5694_v8, %v5697_v53  ;;  %v5721_v33 = vpop.permute.xlu0 %1865 }
 0x2fa   : > { %v5687_v58 = vpop.permute.xlu1 %2527 }
 0x2fd   : > { %2995 = vrot.lane.b32.xlu0 %v5403_v46, %s4254_s9  ;;  %v5707_v46 = vadd.f32 %v2632_v45, %v7798_v60  ;;  %v7805_v45 = vpack.c.bf16 %v5155_v13, %v5158_v55  ;;  %v2508_v60 = vpop.permute.xlu0 %2507  ;;  %v7808_v13 = vpack.c.bf16 %v5173_v17, %v5161_v52  ;;  %v7809_v55 = vpack.c.bf16 %v5195_v3, %v5198_v37 }
 0x2fe   : > { %v1684_v9 = vpop.permute.xlu1 %1683  ;;  %v1934_v52 = vmul.f32 0.2, %v1902_v24  ;;  %v7810_v17 = vpack.c.bf16 %v5189_v18, %v5192_v4  ;;  %v7811_v3 = vpack.c.bf16 %v5216_v25, %v5219_v16  ;;  %v1965_v37 = vmax.f32 %v1901_v30, %v1933_v61  ;;  %v7814_v4 = vld [vmem:[#allocation31_spill] sm:$0xff] }
 0x2ff   : > { %2026 = vmax.xlane.f32.xlu1 %v2025_v12  ;;  %3593 = vmatprep.subr.bf16.mxu1 %v1684_v9  ;;  %v2698_v1 = vmax.f32 %v5704_v19, %v5707_v46  ;;  %v7816_v25 = vpack.c.bf16 %v5236_v5, %v5239_v56  ;;  %v1899_v5 = vadd.f32 %v5558_v0, %v5617_v36 }
 0x300   : > { %v1966_v23 = vmax.f32 %v1902_v24, %v1934_v52  ;;  %v5767_v18 = vadd.f32 %v1965_v37, %v7813_v50  ;;  %v1900_v56 = vadd.f32 %v5561_v32, %v5617_v36  ;;  %v7819_v36 = vpack.c.bf16 %v5248_v39, %v5251_v31  ;;  %v7825_v37 = vld [vmem:[#allocation24_spill] sm:$0xff] }
 0x301   : > { %2327 = vrot.lane.b32.xlu0 %v5419_v28, %s4253_s21  ;;  %v5733_v14 = vpop.permute.xlu0 %2515  ;;  %v1931_v12 = vmul.f32 0.2, %v1899_v5  ;;  %v2602_v52 = vmul.f32 0.2, %v2570_v44  ;;  %v2572_v39 = vadd.f32 %v5578_v62, %v2508_v60 }
 0x302   : > { %v1668_v57 = vpop.permute.xlu1 %1667  ;;  %v5770_v59 = vadd.f32 %v1966_v23, %v7814_v4 }
 0x303   : > { %2696 = vmax.xlane.f32.xlu1 %v2695_v54  ;;  %3594 = vmatpush3.bf16.msra.mxu1 %v1668_v57  ;;  %v2569_v54 = vadd.f32 %v5575_v7, %v5625_v22  ;;  %v2571_v22 = vadd.f32 %v5575_v7, %v2508_v60 }
 0x304   : > { %7815 = vst [vmem:[#allocation21_spill] sm:$0xff] %v5770_v59  ;;  %v2034_v16 = vmax.f32 %v5767_v18, %v5770_v59  ;;  %v2581_v59 = vadd.f32 %v5575_v7, %v5687_v58 }
 0x305   : > { %3013 = vrot.lane.b32.xlu0 %v5321_v35, %s4254_s9  ;;  %v2601_v61 = vmul.f32 0.2, %v2569_v54 }
 0x306   : > { %1734 = vmatmul.mubr.bf16.vlgmr.msra.gmra.mrb[0].mxu1 %v7804_v10  ;;  %v7820_v10 = vld [vmem:[#allocation72_spill] sm:$0xff] }
 0x307   : > { %2699 = vmax.xlane.f32.xlu1 %v2698_v1  ;;  %1741 = vmatprep.mubr.bf16.mxu1 %v7805_v45  ;;  %v7821_v45 = vld [vmem:[#allocation75_spill] sm:$0xff] }
 0x309   : > { %2345 = vrot.lane.b32.xlu0 %v5446_v48, %s4253_s21 }
 0x30d   : > { %3015 = vrot.lane.b32.xlu0 %v5446_v48, %s4254_s9  ;;  %v5743_v48 = vpop.permute.xlu0 %2523 }
 0x30e   : > { %1742 = vmatmul.mubr.bf16.gmra.mrb[4].mxu1 %v7806_v41  ;;  %v1963_v41 = vmax.f32 %v1899_v5, %v1931_v12  ;;  %v2604_v5 = vmul.f32 0.2, %v2572_v39 }
 0x30f   : > { %1749 = vmatprep.mubr.bf16.mxu1 %v7807_v26  ;;  %v7823_v26 = vld [vmem:[#allocation16_spill] sm:$0xff] }
 0x310   : > { %v5814_v23 = vadd.f32 %v1963_v41, %v7825_v37  ;;  %v7833_v41 = vld [vmem:[#allocation105_spill] sm:$0xff] }
 0x311   : > { %v5754_v34 = vpop.permute.xlu0 %2531 }
 0x316   : > { %1750 = vmatmul.mubr.bf16.gmra.mrb[8].mxu1 %v7808_v13 }
 0x317   : > { %1757 = vmatprep.mubr.bf16.mxu1 %v7809_v55  ;;  %v7824_v55 = vld [vmem:[#allocation18_spill] sm:$0xff] }
 0x318   : > { %2343 = vrot.lane.b32.xlu1 %v5321_v35, %s4253_s21  ;;  %v5761_v35 = vpop.permute.xlu0 %2539 }
 0x31c   : > { %2997 = vrot.lane.b32.xlu1 %v5419_v28, %s4254_s9  ;;  %v7812_v28 = vpack.c.bf16 %v5206_v6, %v5209_v38  ;;  %v5777_v40 = vpop.permute.xlu0 %2543  ;;  %v7817_v6 = vpack.c.bf16 %v5228_v29, %v5231_v49  ;;  %v5782_v38 = vpop.permute.xlu1 %1869  ;;  %v1932_v49 = vmul.f32 0.2, %v1900_v56 }
 0x31e   : > { %1758 = vmatmul.mubr.bf16.gmra.mrb[12].mxu1 %v7810_v17  ;;  %v1964_v24 = vmax.f32 %v1900_v56, %v1932_v49  ;;  %v7827_v56 = vld [vmem:[#allocation69_spill] sm:$0xff] }
 0x31f   : > { %1765 = vmatprep.mubr.bf16.mxu1 %v7811_v3 }
 0x320   : > { %2329 = vrot.lane.b32.xlu1 %v5462_v15, %s4253_s21  ;;  %v5797_v57 = vpop.permute.xlu1 %2535 }
 0x324   : > { %v5811_v3 = vpop.permute.xlu1 %1873 }
 0x326   : > { %1766 = vmatmul.mubr.bf16.gmra.mrb[16].mxu1 %v7812_v28  ;;  %v7826_v28 = vld [vmem:[#allocation25_spill] sm:$0xff] }
 0x327   : > { %1773 = vmatprep.mubr.bf16.mxu1 %v7816_v25  ;;  %v5817_v25 = vadd.f32 %v1964_v24, %v7826_v28 }
 0x328   : > { %v5784_v43 = vpop.xlane.xlu0 %2020  ;;  %v5822_v60 = vpop.permute.xlu1 %1877 }
 0x32c   : > { %2035 = vmax.xlane.f32.xlu0 %v2034_v16  ;;  %v2633_v16 = vmax.f32 %v2569_v54, %v2601_v61  ;;  %v5851_v24 = vpop.permute.xlu1 %2547  ;;  %v7835_v61 = vld [vmem:[#allocation13_spill] sm:$0xff] }
 0x32e   : > { %1774 = vmatmul.mubr.bf16.gmra.mrb[20].mxu1 %v7817_v6  ;;  %v2634_v6 = vmax.f32 %v2570_v44, %v2602_v52  ;;  %v5829_v54 = vadd.f32 %v2633_v16, %v7825_v37  ;;  %v7836_v52 = vld [vmem:[#allocation4_spill] sm:$0xff] }
 0x32f   : > { %1781 = vmatprep.mubr.bf16.mxu1 %v7818_v51  ;;  %v2603_v51 = vmul.f32 0.2, %v2571_v22 }
 0x330   : > { %v5832_v44 = vadd.f32 %v2634_v6, %v7826_v28 }
 0x331   : > { %v2635_v49 = vmax.f32 %v2571_v22, %v2603_v51  ;;  %v2068_v22 = vsub.f32 %v7835_v61, %v5784_v43 }
 0x333   : > { %v2691_v63 = vpop.xlane.xlu0 %2690  ;;  %v2101_v16 = vmul.f32 1.442695, %v2068_v22 }
 0x334   : > { %v2737_v9 = vsub.f32 %v5594_v21, %v2691_v63  ;;  %v2738_v29 = vsub.f32 %v5597_v2, %v2691_v63  ;;  %v7822_v21 = vpack.c.bf16 %v7820_v10, %v7821_v45  ;;  %v7828_v63 = vld [vmem:[#allocation68_spill] sm:$0xff]  ;;  %v7832_v45 = vld [vmem:[#allocation3_spill] sm:$0xff] }
 0x335   : > { %v7829_v12 = vpack.c.bf16 %v7827_v56, %v7828_v63 }
 0x336   : > { %v2769_v27 = vmul.f32 1.442695, %v2737_v9  ;;  %v2771_v1 = vmul.f32 1.442695, %v2738_v29  ;;  %1782 = vmatmul.mubr.bf16.gmra.mrb[24].mxu1 %v7819_v36  ;;  %v2031_v9 = vmax.f32 %v5814_v23, %v5817_v25  ;;  %v7830_v36 = vld [vmem:[#allocation2_spill] sm:$0xff] }
 0x337   : > { %1789 = vmatprep.mubr.bf16.mxu1 %v7822_v21  ;;  %v2694_v2 = vpop.xlane.xlu0 %2693 }
 0x338   : > { %3952 = vpow2.f32 %v2769_v27  ;;  %v2739_v13 = vsub.f32 %v7823_v26, %v2694_v2  ;;  %v2740_v30 = vsub.f32 %v7824_v55, %v2694_v2  ;;  %v2636_v27 = vmax.f32 %v2572_v39, %v2604_v5  ;;  %v7841_v5 = vld [vmem:[#allocation128_spill] sm:$0xff] }
 0x339   : > { %3954 = vpow2.f32 %v2771_v1  ;;  %v5843_v26 = vadd.f32 %v2635_v49, %v7813_v50  ;;  %v7839_v50 = vld [vmem:[#allocation73_spill] sm:$0xff] }
 0x33a   : > { %v2773_v31 = vmul.f32 1.442695, %v2739_v13  ;;  %v2775_v17 = vmul.f32 1.442695, %v2740_v30  ;;  %v5846_v13 = vadd.f32 %v2636_v27, %v7814_v4 }
 0x33b   : > { %v2324_v6 = vpop.permute.xlu0 %2323 }
 0x33c   : > { %3956 = vpow2.f32 %v2773_v31  ;;  %v7838_v31 = vld [vmem:[#allocation5_spill] sm:$0xff]  ;;  %v2704_v37 = vmax.f32 %v5843_v26, %v5846_v13 }
 0x33d   : > { %3958 = vpow2.f32 %v2775_v17 }
 0x33e   : > { %1790 = vmatmul.mubr.bf16.gmra.mrb[28].mxu1 %v7829_v12  ;;  %v7842_v12 = vld [vmem:[#allocation109_spill] sm:$0xff]  ;;  %3960 = vpow2.f32 %v2101_v16 }
 0x342   : > { %v3953_v29 = vpop.eup %3952  ;;  %2999 = vrot.lane.b32.xlu0 %v5462_v15, %s4254_s9  ;;  %v2701_v15 = vmax.f32 %v5829_v54, %v5832_v44 }
 0x343   : > { %v3955_v1 = vpop.eup %3954  ;;  %v5835_v10 = vmul.f32 %v3953_v29, %v7830_v36  ;;  %v2342_v29 = vpop.permute.xlu0 %2341 }
 0x344   : > { %2032 = vmax.xlane.f32.xlu1 %v2031_v9  ;;  %v2834_v21 = vmul.f32 %v3955_v1, %v7832_v45 }
 0x345   : > { %7831 = vst [vmem:[#allocation22_spill] sm:$0xff] %v5835_v10 }
 0x346   : > { %v3957_v2 = vpop.eup %3956  ;;  %2331 = vrot.lane.b32.xlu0 %v7833_v41, %s4253_s21  ;;  %v5849_v55 = vadd.f32 %v2834_v21, %v5835_v10 }
 0x347   : > { %v3959_v30 = vpop.eup %3958  ;;  %v5856_v39 = vmul.f32 %v3957_v2, %v7836_v52  ;;  %v3012_v1 = vpop.permute.xlu0 %3011 }
 0x348   : > { %7834 = vst [vmem:[#allocation30_spill] sm:$0xff] %v5849_v55  ;;  %2702 = vmax.xlane.f32.xlu1 %v2701_v15  ;;  %v2836_v17 = vmul.f32 %v3959_v30, %v7838_v31  ;;  %v7854_v55 = vld [vmem:[#allocation38_spill] sm:$0xff] }
 0x349   : > { %7837 = vst [vmem:[#allocation31_spill] sm:$0xff] %v5856_v39 }
 0x34a   : > { %3017 = vrot.lane.b32.xlu0 %v7839_v50, %s4254_s9  ;;  %v2978_v4 = vpack.c.bf16 %v2836_v17, %v2834_v21  ;;  %v5864_v28 = vadd.f32 %v2836_v17, %v5856_v39  ;;  %v3961_v21 = vpop.eup %3960  ;;  %v7844_v17 = vld [vmem:[#allocation71_spill] sm:$0xff] }
 0x34b   : > { %v5866_v51 = vpop.xlane.xlu1 %2023  ;;  %v5875_v30 = vmul.f32 %v3961_v21, %v7832_v45 }
 0x34c   : > { %7840 = vst [vmem:[#allocation72_spill] sm:$0xff] %v5864_v28  ;;  %v2070_v56 = vsub.f32 %v7841_v5, %v5866_v51  ;;  %3073 = vmatprep.mubr.bf16.mxu1 %v2978_v4  ;;  %2705 = vmax.xlane.f32.xlu1 %v2704_v37  ;;  %v1905_v4 = vadd.f32 %v5558_v0, %v7844_v17  ;;  %v7846_v5 = vld [vmem:[#allocation44_spill] sm:$0xff] }
 0x34d   : > { %v1906_v37 = vadd.f32 %v5561_v32, %v7844_v17 }
 0x34e   : > { %v2105_v63 = vmul.f32 1.442695, %v2070_v56  ;;  %2349 = vrot.lane.b32.xlu0 %v7842_v12, %s4253_s21  ;;  %v1937_v45 = vmul.f32 0.2, %v1905_v4 }
 0x34f   : > { %v2340_v9 = vpop.permute.xlu1 %2339  ;;  %v1938_v16 = vmul.f32 0.2, %v1906_v37 }
 0x350   : > { %3643 = vmatprep.subr.bf16.mxu0 %v2340_v9  ;;  %3962 = vpow2.f32 %v2105_v63  ;;  %v7848_v63 = vld [vmem:[#allocation48_spill] sm:$0xff] }
 0x351   : > { %3644 = vmatpush3.bf16.msra.mxu0 %v2324_v6  ;;  %v1969_v6 = vmax.f32 %v1905_v4, %v1937_v45 }
 0x352   : > { %3019 = vrot.lane.b32.xlu0 %v7842_v12, %s4254_s9  ;;  %3645 = vmatprep.subr.bf16.mxu0 %v2342_v29 }
 0x353   : > { %v3010_v49 = vpop.permute.xlu1 %3009  ;;  %v5893_v56 = vadd.f32 %v1969_v6, %v7846_v5 }
 0x354   : > { %3707 = vmatprep.subr.bf16.mxu1 %v3010_v49 }
 0x355   : > { %7847 = vst [vmem:[#allocation16_spill] sm:$0xff] %v5893_v56 }
 0x357   : > { %v2994_v27 = vpop.permute.xlu1 %2993 }
 0x358   : > { %3708 = vmatpush3.bf16.msra.mxu1 %v2994_v27 }
 0x359   : > { %3709 = vmatprep.subr.bf16.mxu1 %v3012_v1 }
 0x35a   : > { %v3963_v2 = vpop.eup %3962 }
 0x35b   : > { %v2326_v15 = vpop.permute.xlu1 %2325  ;;  %v5878_v61 = vmul.f32 %v3963_v2, %v7838_v31  ;;  %v7845_v31 = vld [vmem:[#allocation112_spill] sm:$0xff] }
 0x35c   : > { %3646 = vmatpush3.bf16.msra.mxu0 %v2326_v15  ;;  %v7851_v15 = vld [vmem:[#allocation129_spill] sm:$0xff] }
 0x35d   : > { %7843 = vst [vmem:[#allocation75_spill] sm:$0xff] %v5878_v61  ;;  %2347 = vrot.lane.b32.xlu1 %v7839_v50, %s4253_s21  ;;  %v2308_v22 = vpack.c.bf16 %v5878_v61, %v5875_v30  ;;  %v1970_v50 = vmax.f32 %v1906_v37, %v1938_v16  ;;  %v2574_v17 = vadd.f32 %v5578_v62, %v7851_v15 }
 0x35f   : > { %2403 = vmatprep.mubr.bf16.mxu0 %v2308_v22  ;;  %v5896_v12 = vadd.f32 %v1970_v50, %v7848_v63  ;;  %v2573_v22 = vadd.f32 %v5575_v7, %v7851_v15  ;;  %v2606_v6 = vmul.f32 0.2, %v2574_v17  ;;  %v2575_v50 = vadd.f32 %v5575_v7, %v5733_v14 }
 0x361   : > { %3001 = vrot.lane.b32.xlu1 %v7833_v41, %s4254_s9  ;;  %7849 = vst [vmem:[#allocation18_spill] sm:$0xff] %v5896_v12  ;;  %v2040_v9 = vmax.f32 %v5893_v56, %v5896_v12  ;;  %v7850_v41 = vld [vmem:[#allocation130_spill] sm:$0xff]  ;;  %v2605_v16 = vmul.f32 0.2, %v2573_v22  ;;  %v2638_v10 = vmax.f32 %v2574_v17, %v2606_v6  ;;  %v7861_v6 = vld [vmem:[#allocation80_spill] sm:$0xff] }
 0x362   : > { %v1903_v49 = vadd.f32 %v5558_v0, %v7850_v41  ;;  %v1904_v27 = vadd.f32 %v5561_v32, %v7850_v41 }
 0x363   : > { %v2637_v15 = vmax.f32 %v2573_v22, %v2605_v16  ;;  %v7858_v22 = vld [vmem:[#allocation115_spill] sm:$0xff] }
 0x364   : > { %v1935_v21 = vmul.f32 0.2, %v1903_v49  ;;  %v1936_v2 = vmul.f32 0.2, %v1904_v27 }
 0x365   : > { %2333 = vrot.lane.b32.xlu1 %v7845_v31, %s4253_s21 }
 0x366   : > { %v1967_v37 = vmax.f32 %v1903_v49, %v1935_v21  ;;  %v1968_v45 = vmax.f32 %v1904_v27, %v1936_v2  ;;  %v2607_v49 = vmul.f32 0.2, %v2575_v50 }
 0x368   : > { %v5918_v39 = vadd.f32 %v1968_v45, %v7854_v55  ;;  %v2639_v2 = vmax.f32 %v2575_v50, %v2607_v49 }
 0x36a   : > { %7855 = vst [vmem:[#allocation25_spill] sm:$0xff] %v5918_v39  ;;  %v5935_v45 = vadd.f32 %v2639_v2, %v7846_v5 }
 0x36c   : > { %7859 = vst [vmem:[#allocation2_spill] sm:$0xff] %v5935_v45 }
 0x371   : > { %2041 = vmax.xlane.f32.xlu0 %v2040_v9  ;;  %v2576_v9 = vadd.f32 %v5578_v62, %v5733_v14 }
 0x373   : > { %v2608_v27 = vmul.f32 0.2, %v2576_v9 }
 0x374   : > { %v5900_v29 = vpop.xlane.xlu0 %2029 }
 0x375   : > { %v2640_v61 = vmax.f32 %v2576_v9, %v2608_v27 }
 0x377   : > { %v5938_v16 = vadd.f32 %v2640_v61, %v7848_v63  ;;  %v7862_v61 = vld [vmem:[#allocation120_spill] sm:$0xff] }
 0x378   : > { %v2996_v1 = vpop.permute.xlu0 %2995 }
 0x379   : > { %3710 = vmatpush3.bf16.msra.mxu1 %v2996_v1  ;;  %v7852_v1 = vld [vmem:[#allocation32_spill] sm:$0xff]  ;;  %7860 = vst [vmem:[#allocation3_spill] sm:$0xff] %v5938_v16 }
 0x37a   : > { %v5915_v28 = vadd.f32 %v1967_v37, %v7852_v1  ;;  %v5925_v14 = vadd.f32 %v2637_v15, %v7852_v1  ;;  %v5928_v37 = vadd.f32 %v2638_v10, %v7854_v55  ;;  %v2710_v10 = vmax.f32 %v5935_v45, %v5938_v16 }
 0x37b   : > { %v1911_v45 = vadd.f32 %v5558_v0, %v5709_v11 }
 0x37c   : > { %v2328_v4 = vpop.permute.xlu0 %2327  ;;  %7853 = vst [vmem:[#allocation24_spill] sm:$0xff] %v5915_v28  ;;  %v2037_v21 = vmax.f32 %v5915_v28, %v5918_v39  ;;  %7856 = vst [vmem:[#allocation69_spill] sm:$0xff] %v5925_v14  ;;  %v2707_v17 = vmax.f32 %v5925_v14, %v5928_v37 }
 0x37d   : > { %7857 = vst [vmem:[#allocation68_spill] sm:$0xff] %v5928_v37  ;;  %v1912_v37 = vadd.f32 %v5561_v32, %v5709_v11 }
 0x37f   : > { %v1944_v52 = vmul.f32 0.2, %v1912_v37 }
 0x380   : > { %v3014_v41 = vpop.permute.xlu0 %3013 }
 0x381   : > { %3711 = vmatprep.subr.bf16.mxu1 %v3014_v41 }
 0x384   : > { %v2346_v49 = vpop.permute.xlu0 %2345 }
 0x387   : > { %3003 = vrot.lane.b32.xlu0 %v7845_v31, %s4254_s9 }
 0x388   : > { %v3016_v2 = vpop.permute.xlu0 %3015 }
 0x389   : > { %2038 = vmax.xlane.f32.xlu1 %v2037_v21 }
 0x38b   : > { %2335 = vrot.lane.b32.xlu0 %v7858_v22, %s4253_s21 }
 0x38c   : > { %v5940_v31 = vpop.xlane.xlu1 %2026 }
 0x38d   : > { %2708 = vmax.xlane.f32.xlu1 %v2707_v17 }
 0x38f   : > { %3021 = vrot.lane.b32.xlu0 %v7861_v6, %s4254_s9 }
 0x390   : > { %v2697_v55 = vpop.xlane.xlu1 %2696 }
 0x391   : > { %v2741_v50 = vsub.f32 %v5694_v8, %v2697_v55  ;;  %v2742_v9 = vsub.f32 %v5697_v53, %v2697_v55  ;;  %2711 = vmax.xlane.f32.xlu1 %v2710_v10  ;;  %v7863_v10 = vld [vmem:[#allocation6_spill] sm:$0xff] }
 0x393   : > { %v2777_v5 = vmul.f32 1.442695, %v2741_v50  ;;  %v2779_v41 = vmul.f32 1.442695, %v2742_v9  ;;  %2353 = vrot.lane.b32.xlu0 %v7862_v61, %s4253_s21  ;;  %v7865_v50 = vld [vmem:[#allocation7_spill] sm:$0xff] }
 0x394   : > { %v2700_v63 = vpop.xlane.xlu1 %2699 }
 0x395   : > { %3964 = vpow2.f32 %v2777_v5  ;;  %v2743_v1 = vsub.f32 %v5704_v19, %v2700_v63  ;;  %v2744_v15 = vsub.f32 %v5707_v46, %v2700_v63 }
 0x396   : > { %3966 = vpow2.f32 %v2779_v41 }
 0x397   : > { %v2781_v27 = vmul.f32 1.442695, %v2743_v1  ;;  %v2783_v21 = vmul.f32 1.442695, %v2744_v15  ;;  %3023 = vrot.lane.b32.xlu0 %v7862_v61, %s4254_s9  ;;  %v7868_v61 = vld [vmem:[#allocation131_spill] sm:$0xff]  ;;  %v7869_v15 = vld [vmem:[#allocation10_spill] sm:$0xff] }
 0x398   : > { %v2344_v8 = vpop.permute.xlu1 %2343  ;;  %v1909_v63 = vadd.f32 %v5558_v0, %v7868_v61  ;;  %v1910_v1 = vadd.f32 %v5561_v32, %v7868_v61  ;;  %v7877_v61 = vld [vmem:[#allocation53_spill] sm:$0xff] }
 0x399   : > { %3968 = vpow2.f32 %v2781_v27  ;;  %3647 = vmatprep.subr.bf16.mxu0 %v2344_v8  ;;  %v7871_v27 = vld [vmem:[#allocation11_spill] sm:$0xff] }
 0x39a   : > { %3970 = vpow2.f32 %v2783_v21  ;;  %3648 = vmatpush3.bf16.msra.mxu0 %v2328_v4  ;;  %v1941_v8 = vmul.f32 0.2, %v1909_v63 }
 0x39b   : > { %3649 = vmatprep.subr.bf16.mxu0 %v2346_v49 }
 0x39c   : > { %v2998_v53 = vpop.permute.xlu1 %2997 }
 0x39d   : > { %3712 = vmatpush3.bf16.msra.mxu1 %v2998_v53  ;;  %v1942_v53 = vmul.f32 0.2, %v1910_v1 }
 0x39e   : > { %3713 = vmatprep.subr.bf16.mxu1 %v3016_v2  ;;  %v7874_v2 = vld [vmem:[#allocation122_spill] sm:$0xff] }
 0x39f   : > { %v3965_v19 = vpop.eup %3964 }
 0x3a0   : > { %v3967_v17 = vpop.eup %3966  ;;  %v2330_v46 = vpop.permute.xlu1 %2329  ;;  %v5955_v55 = vmul.f32 %v3965_v19, %v7863_v10  ;;  %v1973_v19 = vmax.f32 %v1909_v63, %v1941_v8 }
 0x3a1   : > { %3650 = vmatpush3.bf16.msra.mxu0 %v2330_v46  ;;  %v5958_v9 = vmul.f32 %v3967_v17, %v7865_v50  ;;  %v1974_v17 = vmax.f32 %v1910_v1, %v1942_v53  ;;  %v7875_v46 = vld [vmem:[#allocation52_spill] sm:$0xff] }
 0x3a2   : > { %7864 = vst [vmem:[#allocation105_spill] sm:$0xff] %v5955_v55  ;;  %2351 = vrot.lane.b32.xlu1 %v7861_v6, %s4253_s21  ;;  %v7880_v53 = vld [vmem:[#allocation132_spill] sm:$0xff] }
 0x3a3   : > { %7866 = vst [vmem:[#allocation13_spill] sm:$0xff] %v5958_v9  ;;  %v3969_v5 = vpop.eup %3968  ;;  %v5964_v4 = vadd.f32 %v5958_v9, %v5955_v55 }
 0x3a4   : > { %v3971_v41 = vpop.eup %3970  ;;  %v5971_v49 = vmul.f32 %v3969_v5, %v7869_v15  ;;  %v5985_v5 = vadd.f32 %v1973_v19, %v7875_v46  ;;  %v2577_v19 = vadd.f32 %v5575_v7, %v7880_v53  ;;  %v1943_v15 = vmul.f32 0.2, %v1911_v45 }
 0x3a5   : > { %7867 = vst [vmem:[#allocation5_spill] sm:$0xff] %v5964_v4  ;;  %v5974_v21 = vmul.f32 %v3971_v41, %v7871_v27  ;;  %v5988_v41 = vadd.f32 %v1974_v17, %v7877_v61  ;;  %v2578_v17 = vadd.f32 %v5578_v62, %v7880_v53  ;;  %v7881_v53 = vld [vmem:[#allocation49_spill] sm:$0xff] }
 0x3a6   : > { %7870 = vst [vmem:[#allocation73_spill] sm:$0xff] %v5971_v49  ;;  %3005 = vrot.lane.b32.xlu1 %v7858_v22, %s4254_s9  ;;  %7876 = vst [vmem:[#allocation71_spill] sm:$0xff] %v5985_v5 }
 0x3a7   : > { %7872 = vst [vmem:[#allocation128_spill] sm:$0xff] %v5974_v21  ;;  %v5980_v6 = vadd.f32 %v5974_v21, %v5971_v49  ;;  %7878 = vst [vmem:[#allocation112_spill] sm:$0xff] %v5988_v41  ;;  %v2046_v22 = vmax.f32 %v5985_v5, %v5988_v41  ;;  %v2579_v41 = vadd.f32 %v5575_v7, %v5743_v48  ;;  %v2609_v5 = vmul.f32 0.2, %v2577_v19 }
 0x3a8   : > { %v2610_v16 = vmul.f32 0.2, %v2578_v17 }
 0x3a9   : > { %7873 = vst [vmem:[#allocation109_spill] sm:$0xff] %v5980_v6  ;;  %v7879_v6 = vld [vmem:[#allocation133_spill] sm:$0xff]  ;;  %v2641_v39 = vmax.f32 %v2577_v19, %v2609_v5  ;;  %v1975_v5 = vmax.f32 %v1911_v45, %v1943_v15  ;;  %v6042_v19 = vadd.f32 %v5558_v0, %v5721_v33  ;;  %v6058_v45 = vadd.f32 %v5561_v32, %v5721_v33  ;;  %v7888_v33 = vld [vmem:[#allocation56_spill] sm:$0xff] }
 0x3aa   : > { %2337 = vrot.lane.b32.xlu1 %v7874_v2, %s4253_s21  ;;  %v1907_v49 = vadd.f32 %v5558_v0, %v7879_v6  ;;  %v1908_v55 = vadd.f32 %v5561_v32, %v7879_v6  ;;  %v2580_v6 = vadd.f32 %v5578_v62, %v5743_v48  ;;  %v2642_v28 = vmax.f32 %v2578_v17, %v2610_v16 }
 0x3ab   : > { %v2613_v17 = vmul.f32 0.2, %v2581_v59 }
 0x3ac   : > { %v1939_v1 = vmul.f32 0.2, %v1907_v49  ;;  %v1940_v8 = vmul.f32 0.2, %v1908_v55  ;;  %v2612_v27 = vmul.f32 0.2, %v2580_v6 }
 0x3ae   : > { %v1972_v9 = vmax.f32 %v1908_v55, %v1940_v8  ;;  %v2611_v55 = vmul.f32 0.2, %v2579_v41  ;;  %v7882_v8 = vld [vmem:[#allocation51_spill] sm:$0xff]  ;;  %v2644_v56 = vmax.f32 %v2580_v6, %v2612_v27  ;;  %v6038_v27 = vadd.f32 %v5575_v7, %v5754_v34 }
 0x3af   : > { %v6032_v16 = vadd.f32 %v2642_v28, %v7882_v8 }
 0x3b0   : > { %v6020_v48 = vadd.f32 %v1972_v9, %v7882_v8  ;;  %v2643_v11 = vmax.f32 %v2579_v41, %v2611_v55  ;;  %v2582_v9 = vadd.f32 %v5578_v62, %v5687_v58  ;;  %v1976_v41 = vmax.f32 %v1912_v37, %v1944_v52  ;;  %v7886_v55 = vld [vmem:[#allocation55_spill] sm:$0xff] }
 0x3b1   : > { %7884 = vst [vmem:[#allocation48_spill] sm:$0xff] %v6032_v16  ;;  %v6054_v37 = vadd.f32 %v2644_v56, %v7877_v61  ;;  %v6074_v61 = vadd.f32 %v5558_v0, %v5782_v38 }
 0x3b2   : > { %v6051_v52 = vadd.f32 %v2643_v11, %v7875_v46  ;;  %v2614_v15 = vmul.f32 0.2, %v2582_v9  ;;  %v6069_v46 = vadd.f32 %v1976_v41, %v7886_v55  ;;  %v6083_v11 = vmul.f32 0.2, %v6042_v19 }
 0x3b4   : > { %7887 = vst [vmem:[#allocation130_spill] sm:$0xff] %v6069_v46  ;;  %v2716_v41 = vmax.f32 %v6051_v52, %v6054_v37 }
 0x3b6   : > { %2047 = vmax.xlane.f32.xlu0 %v2046_v22  ;;  %v1971_v22 = vmax.f32 %v1907_v49, %v1939_v1  ;;  %v1913_v49 = vadd.f32 %v5558_v0, %v5679_v20  ;;  %v1914_v1 = vadd.f32 %v5561_v32, %v5679_v20  ;;  %v6029_v20 = vadd.f32 %v2641_v39, %v7881_v53 }
 0x3b7   : > { %v6046_v39 = vadd.f32 %v5578_v62, %v5754_v34  ;;  %v6063_v34 = vmul.f32 0.2, %v6038_v27 }
 0x3b8   : > { %v6013_v14 = vadd.f32 %v1971_v22, %v7881_v53  ;;  %v1946_v12 = vmul.f32 0.2, %v1914_v1  ;;  %7883 = vst [vmem:[#allocation44_spill] sm:$0xff] %v6029_v20  ;;  %v2713_v58 = vmax.f32 %v6029_v20, %v6032_v16  ;;  %v2646_v16 = vmax.f32 %v2582_v9, %v2614_v15 }
 0x3b9   : > { %v5992_v4 = vpop.xlane.xlu0 %2035  ;;  %v2616_v56 = vmul.f32 0.2, %v6046_v39 }
 0x3ba   : > { %v2043_v22 = vmax.f32 %v6013_v14, %v6020_v48 }
 0x3bb   : > { %v2648_v9 = vmax.f32 %v6046_v39, %v2616_v56  ;;  %v6120_v39 = vadd.f32 %v5575_v7, %v5797_v57 }
 0x3bd   : > { %v3000_v63 = vpop.permute.xlu0 %2999 }
 0x3be   : > { %3714 = vmatpush3.bf16.msra.mxu1 %v3000_v63 }
 0x3c1   : > { %v6002_v21 = vpop.permute.xlu0 %2331 }
 0x3c5   : > { %v3018_v63 = vpop.permute.xlu0 %3017 }
 0x3c6   : > { %3715 = vmatprep.subr.bf16.mxu1 %v3018_v63  ;;  %v1945_v63 = vmul.f32 0.2, %v1913_v49 }
 0x3c8   : > { %v1977_v28 = vmax.f32 %v1913_v49, %v1945_v63  ;;  %v2645_v63 = vmax.f32 %v2581_v59, %v2613_v17  ;;  %v2647_v59 = vmax.f32 %v6038_v27, %v6063_v34 }
 0x3ca   : > { %v6077_v49 = vadd.f32 %v1977_v28, %v7888_v33  ;;  %v6094_v28 = vadd.f32 %v5561_v32, %v5782_v38  ;;  %v6106_v38 = vmul.f32 0.2, %v6074_v61 }
 0x3cc   : > { %3007 = vrot.lane.b32.xlu0 %v7874_v2, %s4254_s9  ;;  %v1978_v2 = vmax.f32 %v1914_v1, %v1946_v12  ;;  %v7885_v12 = vld [vmem:[#allocation54_spill] sm:$0xff]  ;;  %v7889_v1 = vld [vmem:[#allocation57_spill] sm:$0xff] }
 0x3cd   : > { %v6066_v53 = vadd.f32 %v1975_v5, %v7885_v12 }
 0x3ce   : > { %2044 = vmax.xlane.f32.xlu1 %v2043_v22  ;;  %v6080_v8 = vadd.f32 %v1978_v2, %v7889_v1  ;;  %v7891_v22 = vld [vmem:[#allocation19_spill] sm:$0xff]  ;;  %v2071_v2 = vsub.f32 %v5682_v47, %v5940_v31  ;;  %v2072_v47 = vsub.f32 %v5685_v42, %v5940_v31  ;;  %v6123_v42 = vadd.f32 %v2646_v16, %v7886_v55  ;;  %v2350_v55 = vpop.permute.xlu0 %2349 }
 0x3cf   : > { %v2067_v5 = vsub.f32 %v7891_v22, %v5784_v43  ;;  %v2049_v22 = vmax.f32 %v6066_v53, %v6069_v46  ;;  %v6127_v31 = vadd.f32 %v5578_v62, %v5797_v57 }
 0x3d0   : > { %7890 = vst [vmem:[#allocation129_spill] sm:$0xff] %v6080_v8  ;;  %v2052_v15 = vmax.f32 %v6077_v49, %v6080_v8  ;;  %v2107_v56 = vmul.f32 1.442695, %v2071_v2 }
 0x3d1   : > { %v6060_v6 = vpop.xlane.xlu1 %2032  ;;  %v2099_v27 = vmul.f32 1.442695, %v2067_v5 }
 0x3d2   : > { %2714 = vmax.xlane.f32.xlu1 %v2713_v58  ;;  %v6090_v58 = vmul.f32 0.2, %v6058_v45  ;;  %v2075_v2 = vsub.f32 %v5814_v23, %v6060_v6  ;;  %v2076_v57 = vsub.f32 %v5817_v25, %v6060_v6  ;;  %v6150_v25 = vadd.f32 %v2647_v59, %v7888_v33 }
 0x3d3   : > { %v6153_v6 = vadd.f32 %v2648_v9, %v7889_v1  ;;  %v1979_v1 = vmax.f32 %v6042_v19, %v6083_v11 }
 0x3d5   : > { %v2703_v20 = vpop.xlane.xlu1 %2702 }
 0x3d6   : > { %v2745_v43 = vsub.f32 %v5829_v54, %v2703_v20  ;;  %v2746_v17 = vsub.f32 %v5832_v44, %v2703_v20  ;;  %2717 = vmax.xlane.f32.xlu1 %v2716_v41  ;;  %v6113_v44 = vadd.f32 %v2645_v63, %v7885_v12  ;;  %v6116_v20 = vmul.f32 0.2, %v6094_v28 }
 0x3d8   : > { %v2785_v34 = vmul.f32 1.442695, %v2745_v43  ;;  %v2787_v54 = vmul.f32 1.442695, %v2746_v17  ;;  %v2109_v43 = vmul.f32 1.442695, %v2072_v47  ;;  %v1981_v47 = vmax.f32 %v6074_v61, %v6106_v38 }
 0x3d9   : > { %v3595_v41 = vpop.f32.mrb[0].mxu1  ;;  %v2706_v46 = vpop.xlane.xlu1 %2705  ;;  %v2618_v61 = vmul.f32 0.2, %v6127_v31  ;;  %v2117_v38 = vmul.f32 1.442695, %v2076_v57  ;;  %v2719_v33 = vmax.f32 %v6113_v44, %v6123_v42 }
 0x3da   : > { %3972 = vpow2.f32 %v2785_v34  ;;  %v2747_v12 = vsub.f32 %v5843_v26, %v2706_v46  ;;  %v2748_v63 = vsub.f32 %v5846_v13, %v2706_v46  ;;  %v3596_v5 = vpop.f32.mrb[1].mxu1  ;;  %2050 = vmax.xlane.f32.xlu1 %v2049_v22  ;;  %v6139_v13 = vadd.f32 %v5575_v7, %v5761_v35 }
 0x3db   : > { %3974 = vpow2.f32 %v2787_v54  ;;  %v6133_v17 = vadd.f32 %v3596_v5, %v3595_v41  ;;  %v3598_v16 = vpop.f32.mrb[2].mxu1  ;;  %v6143_v46 = vadd.f32 %v5578_v62, %v5761_v35  ;;  %v1982_v35 = vmax.f32 %v6094_v28, %v6116_v20 }
 0x3dc   : > { %3976 = vpow2.f32 %v2099_v27  ;;  %v2789_v34 = vmul.f32 1.442695, %v2747_v12  ;;  %v2791_v8 = vmul.f32 1.442695, %v2748_v63  ;;  %v3599_v26 = vpop.f32.mrb[3].mxu1  ;;  %v1980_v28 = vmax.f32 %v6058_v45, %v6090_v58  ;;  %v7894_v45 = vld [vmem:[#allocation61_spill] sm:$0xff] }
 0x3dd   : > { %7892 = vst [vmem:[#allocation32_spill] sm:$0xff] %v6133_v17  ;;  %3978 = vpow2.f32 %v2107_v56  ;;  %v6145_v23 = vadd.f32 %v3599_v26, %v3598_v16  ;;  %v2348_v22 = vpop.permute.xlu1 %2347  ;;  %v2617_v27 = vmul.f32 0.2, %v6120_v39  ;;  %v2115_v54 = vmul.f32 1.442695, %v2075_v2  ;;  %v3020_v56 = vpop.permute.xlu0 %3019  ;;  %v7896_v63 = vld [vmem:[#allocation62_spill] sm:$0xff] }
 0x3de   : > { %3980 = vpow2.f32 %v2789_v34  ;;  %2053 = vmax.xlane.f32.xlu1 %v2052_v15  ;;  %3651 = vmatprep.subr.bf16.mxu0 %v2348_v22  ;;  %v6167_v59 = vmul.f32 0.2, %v6139_v13  ;;  %v6172_v15 = vadd.f32 %v5558_v0, %v5811_v3  ;;  %v6176_v20 = vadd.f32 %v5561_v32, %v5811_v3  ;;  %v7898_v34 = vld [vmem:[#allocation58_spill] sm:$0xff]  ;;  %v7899_v22 = vld [vmem:[#allocation59_spill] sm:$0xff] }
 0x3df   : > { %7893 = vst [vmem:[#allocation38_spill] sm:$0xff] %v6145_v23  ;;  %3982 = vpow2.f32 %v2791_v8  ;;  %3652 = vmatpush3.bf16.msra.mxu0 %v6002_v21  ;;  %v2620_v21 = vmul.f32 0.2, %v6143_v46  ;;  %v6179_v11 = vadd.f32 %v1981_v47, %v7894_v45  ;;  %v2649_v58 = vmax.f32 %v6120_v39, %v2617_v27 }
 0x3e0   : > { %3984 = vpow2.f32 %v2109_v43  ;;  %3653 = vmatprep.subr.bf16.mxu0 %v2350_v55  ;;  %v6185_v5 = vadd.f32 %v1982_v35, %v7896_v63  ;;  %v2650_v3 = vmax.f32 %v6127_v31, %v2618_v61  ;;  %v2722_v16 = vmax.f32 %v6150_v25, %v6153_v6  ;;  %v7900_v35 = vld [vmem:[#allocation8_spill] sm:$0xff] }
 0x3e1   : > { %v3601_v8 = vpop.f32.mrb[4].mxu1  ;;  %v3002_v9 = vpop.permute.xlu1 %3001  ;;  %3986 = vpow2.f32 %v2115_v54  ;;  %v6193_v26 = vadd.f32 %v1979_v1, %v7898_v34  ;;  %v6196_v47 = vadd.f32 %v1980_v28, %v7899_v22  ;;  %v6203_v31 = vadd.f32 %v5575_v7, %v5777_v40 }
 0x3e2   : > { %v3602_v19 = vpop.f32.mrb[5].mxu1  ;;  %2720 = vmax.xlane.f32.xlu1 %v2719_v33  ;;  %3716 = vmatpush3.bf16.msra.mxu1 %v3002_v9  ;;  %3988 = vpow2.f32 %v2117_v38  ;;  %v1951_v61 = vmul.f32 0.2, %v6172_v15  ;;  %v1952_v38 = vmul.f32 0.2, %v6176_v20  ;;  %v7901_v33 = vld [vmem:[#allocation9_spill] sm:$0xff]  ;;  %v2651_v28 = vmax.f32 %v6139_v13, %v6167_v59 }
 0x3e3   : > { %v6182_v41 = vadd.f32 %v3602_v19, %v3601_v8  ;;  %v3604_v12 = vpop.f32.mrb[6].mxu1  ;;  %3717 = vmatprep.subr.bf16.mxu1 %v3020_v56  ;;  %v2652_v9 = vmax.f32 %v6143_v46, %v2620_v21  ;;  %v2058_v56 = vmax.f32 %v6179_v11, %v6185_v5  ;;  %v6216_v19 = vadd.f32 %v2649_v58, %v7898_v34 }
 0x3e4   : > { %v3973_v43 = vpop.eup %3972  ;;  %v3605_v2 = vpop.f32.mrb[7].mxu1  ;;  %v6235_v59 = vadd.f32 %v5578_v62, %v5777_v40  ;;  %v1984_v34 = vmax.f32 %v6176_v20, %v1952_v38  ;;  %v6258_v17 = vadd.f32 %v2651_v28, %v7894_v45 }
 0x3e5   : > { %7895 = vst [vmem:[#allocation115_spill] sm:$0xff] %v6182_v41  ;;  %v3975_v55 = vpop.eup %3974  ;;  %v6190_v57 = vadd.f32 %v3605_v2, %v3604_v12  ;;  %v2334_v39 = vpop.permute.xlu1 %2333  ;;  %v6199_v27 = vmul.f32 %v3973_v43, %v7900_v35  ;;  %v6220_v43 = vadd.f32 %v5558_v0, %v5822_v60  ;;  %v6224_v2 = vadd.f32 %v5561_v32, %v5822_v60  ;;  %v7903_v32 = vld [vmem:[#allocation14_spill] sm:$0xff]  ;;  %v7905_v41 = vld [vmem:[#allocation20_spill] sm:$0xff] }
 0x3e6   : > { %v3977_v54 = vpop.eup %3976  ;;  %2723 = vmax.xlane.f32.xlu1 %v2722_v16  ;;  %3654 = vmatpush3.bf16.msra.mxu0 %v2334_v39  ;;  %v6208_v1 = vmul.f32 %v3975_v55, %v7901_v33  ;;  %v6227_v16 = vadd.f32 %v2650_v3, %v7899_v22  ;;  %v2055_v0 = vmax.f32 %v6193_v26, %v6196_v47  ;;  %v6246_v55 = vmul.f32 0.2, %v6203_v31  ;;  %v7904_v22 = vld [vmem:[#allocation15_spill] sm:$0xff] }
 0x3e7   : > { %7897 = vst [vmem:[#allocation80_spill] sm:$0xff] %v6190_v57  ;;  %v3979_v8 = vpop.eup %3978  ;;  %v6240_v58 = vmul.f32 %v3977_v54, %v7830_v36  ;;  %v1983_v39 = vmax.f32 %v6172_v15, %v1951_v61  ;;  %v2069_v36 = vsub.f32 %v7905_v41, %v5866_v51  ;;  %v6261_v23 = vadd.f32 %v2652_v9, %v7896_v63 }
 0x3e8   : > { %v3981_v12 = vpop.eup %3980  ;;  %v6231_v13 = vadd.f32 %v6208_v1, %v6199_v27  ;;  %v1953_v15 = vmul.f32 0.2, %v6220_v43  ;;  %v1954_v20 = vmul.f32 0.2, %v6224_v2  ;;  %v2725_v38 = vmax.f32 %v6216_v19, %v6227_v16 }
 0x3e9   : > { %v3983_v46 = vpop.eup %3982  ;;  %v3607_v21 = vpop.f32.mrb[8].mxu1  ;;  %v6243_v60 = vmul.f32 %v3981_v12, %v7903_v32  ;;  %v2195_v45 = vadd.f32 %v5875_v30, %v6240_v58  ;;  %v6276_v63 = vmul.f32 %v3979_v8, %v7863_v10  ;;  %v2103_v30 = vmul.f32 1.442695, %v2069_v36  ;;  %v7912_v10 = vld [vmem:[#allocation27_spill] sm:$0xff] }
 0x3ea   : > { %7902 = vst [vmem:[#allocation120_spill] sm:$0xff] %v6231_v13  ;;  %v3985_v3 = vpop.eup %3984  ;;  %v3608_v40 = vpop.f32.mrb[9].mxu1  ;;  %2059 = vmax.xlane.f32.xlu1 %v2058_v56  ;;  %v6251_v57 = vmul.f32 %v3983_v46, %v7904_v22  ;;  %v2622_v46 = vmul.f32 0.2, %v6235_v59  ;;  %v2074_v8 = vsub.f32 %v7912_v10, %v5900_v29 }
 0x3eb   : > { %v6255_v54 = vadd.f32 %v3608_v40, %v3607_v21  ;;  %v3610_v12 = vpop.f32.mrb[10].mxu1  ;;  %2056 = vmax.xlane.f32.xlu0 %v2055_v0  ;;  %v3987_v41 = vpop.eup %3986  ;;  %v6279_v28 = vmul.f32 %v3985_v3, %v7865_v50  ;;  %v7909_v21 = vld [vmem:[#allocation26_spill] sm:$0xff]  ;;  %v7910_v40 = vld [vmem:[#allocation60_spill] sm:$0xff]  ;;  %v2728_v50 = vmax.f32 %v6258_v17, %v6261_v23  ;;  %v1985_v3 = vmax.f32 %v6220_v43, %v1953_v15 }
 0x3ec   : > { %v3611_v61 = vpop.f32.mrb[11].mxu1  ;;  %v6269_v51 = vadd.f32 %v6251_v57, %v6243_v60  ;;  %v3989_v9 = vpop.eup %3988  ;;  %v2073_v0 = vsub.f32 %v7909_v21, %v5900_v29  ;;  %3990 = vpow2.f32 %v2103_v30 }
 0x3ed   : > { %7906 = vst [vmem:[#allocation6_spill] sm:$0xff] %v6255_v54  ;;  %v6271_v56 = vadd.f32 %v3611_v61, %v3610_v12  ;;  %v6285_v54 = vadd.f32 %v1983_v39, %v7910_v40  ;;  %v7911_v12 = vld [vmem:[#allocation64_spill] sm:$0xff]  ;;  %v2592_v39 = vadd.f32 %v5578_v62, %v5851_v24  ;;  %v2201_v29 = vadd.f32 %v6279_v28, %v6276_v63 }
 0x3ee   : > { %7907 = vst [vmem:[#allocation7_spill] sm:$0xff] %v6269_v51  ;;  %2726 = vmax.xlane.f32.xlu1 %v2725_v38  ;;  %v6288_v61 = vadd.f32 %v1984_v34, %v7911_v12  ;;  %v2591_v38 = vadd.f32 %v5575_v7, %v5851_v24  ;;  %v2653_v34 = vmax.f32 %v6203_v31, %v6246_v55  ;;  %v2111_v15 = vmul.f32 1.442695, %v2073_v0  ;;  %v7913_v55 = vld [vmem:[#allocation21_spill] sm:$0xff]  ;;  %v7937_v51 = vld [vmem:[#allocation68_spill] sm:$0xff] }
 0x3ef   : > { %7908 = vst [vmem:[#allocation131_spill] sm:$0xff] %v6271_v56  ;;  %2196 = vadd.xlane.f32.xlu0 %v2195_v45  ;;  %v1986_v56 = vmax.f32 %v6224_v2, %v1954_v20  ;;  %v6305_v45 = vmul.f32 %v3987_v41, %v7900_v35  ;;  %v6308_v43 = vmul.f32 %v3989_v9, %v7901_v33  ;;  %v2113_v31 = vmul.f32 1.442695, %v2074_v8 }
 0x3f0   : > { %v2654_v2 = vmax.f32 %v6235_v59, %v2622_v46  ;;  %v2077_v7 = vsub.f32 %v5767_v18, %v5992_v4  ;;  %v2061_v24 = vmax.f32 %v6285_v54, %v6288_v61  ;;  %v2078_v35 = vsub.f32 %v7913_v55, %v5992_v4  ;;  %v7915_v46 = vld [vmem:[#allocation91_spill] sm:$0xff]  ;;  %v7916_v18 = vld [vmem:[#allocation93_spill] sm:$0xff] }
 0x3f1   : > { %v3613_v36 = vpop.f32.mrb[12].mxu1  ;;  %v2623_v41 = vmul.f32 0.2, %v2591_v38  ;;  %v2624_v59 = vmul.f32 0.2, %v2592_v39  ;;  %v6320_v21 = vadd.f32 %v1985_v3, %v7915_v46  ;;  %v6323_v0 = vadd.f32 %v1986_v56, %v7916_v18 }
 0x3f2   : > { %v3614_v62 = vpop.f32.mrb[13].mxu1  ;;  %2729 = vmax.xlane.f32.xlu1 %v2728_v50  ;;  %v2207_v30 = vadd.f32 %v6308_v43, %v6305_v45  ;;  %3992 = vpow2.f32 %v2111_v15  ;;  %v2119_v4 = vmul.f32 1.442695, %v2077_v7  ;;  %v2121_v8 = vmul.f32 1.442695, %v2078_v35 }
 0x3f3   : > { %v6317_v20 = vadd.f32 %v3614_v62, %v3613_v36  ;;  %v3616_v33 = vpop.f32.mrb[14].mxu1  ;;  %2202 = vadd.xlane.f32.xlu0 %v2201_v29  ;;  %3994 = vpow2.f32 %v2113_v31  ;;  %v6330_v50 = vadd.f32 %v2653_v34, %v7910_v40  ;;  %v2655_v36 = vmax.f32 %v2591_v38, %v2623_v41  ;;  %v7920_v31 = vld [vmem:[#allocation16_spill] sm:$0xff] }
 0x3f4   : > { %v3617_v9 = vpop.f32.mrb[15].mxu1  ;;  %v2656_v3 = vmax.f32 %v2592_v39, %v2624_v59  ;;  %v2064_v56 = vmax.f32 %v6320_v21, %v6323_v0  ;;  %v6335_v29 = vadd.f32 %v2654_v2, %v7911_v12  ;;  %3996 = vpow2.f32 %v2119_v4 }
 0x3f5   : > { %7914 = vst [vmem:[#allocation122_spill] sm:$0xff] %v6317_v20  ;;  %v6325_v10 = vadd.f32 %v3617_v9, %v3616_v33  ;;  %3998 = vpow2.f32 %v2121_v8  ;;  %v6342_v38 = vadd.f32 %v2655_v36, %v7915_v46  ;;  %v7921_v33 = vld [vmem:[#allocation18_spill] sm:$0xff] }
 0x3f6   : > { %2062 = vmax.xlane.f32.xlu1 %v2061_v24  ;;  %v2731_v40 = vmax.f32 %v6330_v50, %v6335_v29  ;;  %v6345_v39 = vadd.f32 %v2656_v3, %v7916_v18  ;;  %v3991_v12 = vpop.eup %3990 }
 0x3f7   : > { %7917 = vst [vmem:[#allocation52_spill] sm:$0xff] %v6325_v10  ;;  %2208 = vadd.xlane.f32.xlu0 %v2207_v30  ;;  %v7922_v30 = vld [vmem:[#allocation4_spill] sm:$0xff] }
 0x3f8   : > { %v2734_v9 = vmax.f32 %v6342_v38, %v6345_v39  ;;  %v6354_v4 = vmul.f32 %v3991_v12, %v7922_v30  ;;  %v7925_v12 = vld [vmem:[#allocation10_spill] sm:$0xff] }
 0x3f9   : > { %v3619_v62 = vpop.f32.mrb[16].mxu1 }
 0x3fa   : > { %v3620_v55 = vpop.f32.mrb[17].mxu1  ;;  %2065 = vmax.xlane.f32.xlu1 %v2064_v56 }
 0x3fb   : > { %v6337_v15 = vadd.f32 %v3620_v55, %v3619_v62  ;;  %v3622_v7 = vpop.f32.mrb[18].mxu1 }
 0x3fc   : > { %v3623_v24 = vpop.f32.mrb[19].mxu1  ;;  %v3993_v59 = vpop.eup %3992 }
 0x3fd   : > { %7918 = vst [vmem:[#allocation53_spill] sm:$0xff] %v6337_v15  ;;  %v6347_v34 = vadd.f32 %v3623_v24, %v3622_v7  ;;  %v3995_v46 = vpop.eup %3994  ;;  %v7936_v15 = vld [vmem:[#allocation69_spill] sm:$0xff] }
 0x3fe   : > { %2732 = vmax.xlane.f32.xlu1 %v2731_v40  ;;  %v2042_v2 = vpop.xlane.xlu0 %2041  ;;  %v3997_v7 = vpop.eup %3996  ;;  %v7924_v40 = vld [vmem:[#allocation75_spill] sm:$0xff] }
 0x3ff   : > { %7919 = vst [vmem:[#allocation133_spill] sm:$0xff] %v6347_v34  ;;  %v2081_v35 = vsub.f32 %v7920_v31, %v2042_v2  ;;  %v2082_v41 = vsub.f32 %v7921_v33, %v2042_v2  ;;  %v2198_v2 = vadd.f32 %v7924_v40, %v6354_v4  ;;  %v6361_v31 = vmul.f32 %v3993_v59, %v7925_v12 }
 0x401   : > { %v2127_v8 = vmul.f32 1.442695, %v2081_v35  ;;  %v2129_v18 = vmul.f32 1.442695, %v2082_v41  ;;  %v3625_v36 = vpop.f32.mrb[20].mxu1  ;;  %v7926_v35 = vld [vmem:[#allocation11_spill] sm:$0xff]  ;;  %v3999_v41 = vpop.eup %3998 }
 0x402   : > { %v3626_v3 = vpop.f32.mrb[21].mxu1  ;;  %2735 = vmax.xlane.f32.xlu1 %v2734_v9  ;;  %v3004_v56 = vpop.permute.xlu0 %3003  ;;  %v6364_v33 = vmul.f32 %v3995_v46, %v7926_v35  ;;  %v7931_v35 = vld [vmem:[#allocation29_spill] sm:$0xff] }
 0x403   : > { %4000 = vpow2.f32 %v2127_v8  ;;  %v6356_v62 = vadd.f32 %v3626_v3, %v3625_v36  ;;  %v3628_v55 = vpop.f32.mrb[22].mxu1  ;;  %3718 = vmatpush3.bf16.msra.mxu1 %v3004_v56  ;;  %v6374_v36 = vmul.f32 %v3999_v41, %v7904_v22 }
 0x404   : > { %4002 = vpow2.f32 %v2129_v18  ;;  %v3629_v24 = vpop.f32.mrb[23].mxu1  ;;  %v2204_v8 = vadd.f32 %v6364_v33, %v6361_v31  ;;  %v6371_v18 = vmul.f32 %v3997_v7, %v7903_v32  ;;  %v7930_v7 = vld [vmem:[#allocation28_spill] sm:$0xff] }
 0x405   : > { %7923 = vst [vmem:[#allocation132_spill] sm:$0xff] %v6356_v62  ;;  %v6366_v9 = vadd.f32 %v3629_v24, %v3628_v55 }
 0x406   : > { %2199 = vadd.xlane.f32.xlu1 %v2198_v2  ;;  %v2336_v30 = vpop.permute.xlu0 %2335  ;;  %v2210_v24 = vadd.f32 %v6374_v36, %v6371_v18 }
 0x407   : > { %7927 = vst [vmem:[#allocation49_spill] sm:$0xff] %v6366_v9 }
 0x409   : > { %v3631_v3 = vpop.f32.mrb[24].mxu1 }
 0x40a   : > { %v3632_v59 = vpop.f32.mrb[25].mxu1  ;;  %2205 = vadd.xlane.f32.xlu1 %v2204_v8  ;;  %v3022_v56 = vpop.permute.xlu0 %3021 }
 0x40b   : > { %v6376_v46 = vadd.f32 %v3632_v59, %v3631_v3  ;;  %v3634_v40 = vpop.f32.mrb[26].mxu1  ;;  %3719 = vmatprep.subr.bf16.mxu1 %v3022_v56 }
 0x40c   : > { %v3635_v55 = vpop.f32.mrb[27].mxu1 }
 0x40d   : > { %7928 = vst [vmem:[#allocation51_spill] sm:$0xff] %v6376_v46  ;;  %v4001_v2 = vpop.eup %4000  ;;  %v6380_v12 = vadd.f32 %v3635_v55, %v3634_v40 }
 0x40e   : > { %v4003_v32 = vpop.eup %4002  ;;  %2211 = vadd.xlane.f32.xlu1 %v2210_v24  ;;  %v6383_v22 = vmul.f32 %v4001_v2, %v7930_v7  ;;  %v7934_v24 = vld [vmem:[#allocation24_spill] sm:$0xff]  ;;  %v7935_v2 = vld [vmem:[#allocation25_spill] sm:$0xff] }
 0x40f   : > { %7929 = vst [vmem:[#allocation54_spill] sm:$0xff] %v6380_v12  ;;  %v6386_v41 = vmul.f32 %v4003_v32, %v7931_v35 }
 0x411   : > { %v3637_v8 = vpop.f32.mrb[28].mxu1  ;;  %v2216_v3 = vadd.f32 %v6386_v41, %v6383_v22 }
 0x412   : > { %v3638_v59 = vpop.f32.mrb[29].mxu1 }
 0x413   : > { %v6390_v56 = vadd.f32 %v3638_v59, %v3637_v8  ;;  %2217 = vadd.xlane.f32.xlu1 %v2216_v3  ;;  %v3640_v9 = vpop.f32.mrb[30].mxu1 }
 0x414   : > { %v3641_v46 = vpop.f32.mrb[31].mxu1 }
 0x415   : > { %7932 = vst [vmem:[#allocation55_spill] sm:$0xff] %v6390_v56  ;;  %v6392_v40 = vadd.f32 %v3641_v46, %v3640_v9  ;;  %v7938_v9 = vld [vmem:[#allocation2_spill] sm:$0xff] }
 0x416   : > { %v2039_v55 = vpop.xlane.xlu1 %2038 }
 0x417   : > { %7933 = vst [vmem:[#allocation56_spill] sm:$0xff] %v6392_v40  ;;  %v2079_v12 = vsub.f32 %v7934_v24, %v2039_v55  ;;  %v2080_v34 = vsub.f32 %v7935_v2, %v2039_v55  ;;  %v7939_v40 = vld [vmem:[#allocation3_spill] sm:$0xff]  ;;  %v2354_v24 = vpop.permute.xlu0 %2353 }
 0x418   : > { %v7941_v2 = vld [vmem:[#allocation23_spill] sm:$0xff] }
 0x419   : > { %v2123_v62 = vmul.f32 1.442695, %v2079_v12  ;;  %v2125_v32 = vmul.f32 1.442695, %v2080_v34 }
 0x41a   : > { %v2709_v10 = vpop.xlane.xlu1 %2708 }
 0x41b   : > { %4004 = vpow2.f32 %v2123_v62  ;;  %v2749_v20 = vsub.f32 %v7936_v15, %v2709_v10  ;;  %v2750_v13 = vsub.f32 %v7937_v51, %v2709_v10  ;;  %v3024_v62 = vpop.permute.xlu0 %3023 }
 0x41c   : > { %4006 = vpow2.f32 %v2125_v32 }
 0x41d   : > { %v2793_v8 = vmul.f32 1.442695, %v2749_v20  ;;  %v2795_v3 = vmul.f32 1.442695, %v2750_v13  ;;  %v7940_v13 = vld [vmem:[#allocation17_spill] sm:$0xff] }
 0x41e   : > { %v2712_v59 = vpop.xlane.xlu1 %2711 }
 0x41f   : > { %4008 = vpow2.f32 %v2793_v8  ;;  %v2751_v46 = vsub.f32 %v7938_v9, %v2712_v59  ;;  %v2752_v56 = vsub.f32 %v7939_v40, %v2712_v59  ;;  %v2307_v9 = vpack.c.bf16 %v6354_v4, %v6240_v58 }
 0x420   : > { %4010 = vpow2.f32 %v2795_v3  ;;  %v2312_v58 = vpack.c.bf16 %v6374_v36, %v6308_v43  ;;  %v7944_v36 = vld [vmem:[#allocation22_spill] sm:$0xff] }
 0x421   : > { %v2797_v55 = vmul.f32 1.442695, %v2751_v46  ;;  %v2799_v12 = vmul.f32 1.442695, %v2752_v56 }
 0x422   : > { %v2352_v34 = vpop.permute.xlu1 %2351 }
 0x423   : > { %4012 = vpow2.f32 %v2797_v55  ;;  %3655 = vmatprep.subr.bf16.mxu0 %v2352_v34 }
 0x424   : > { %4014 = vpow2.f32 %v2799_v12  ;;  %3656 = vmatpush3.bf16.msra.mxu0 %v2336_v30 }
 0x425   : > { %v4005_v15 = vpop.eup %4004  ;;  %3657 = vmatprep.subr.bf16.mxu0 %v2354_v24  ;;  %v2310_v24 = vpack.c.bf16 %v6364_v33, %v6279_v28  ;;  %v2311_v28 = vpack.c.bf16 %v6371_v18, %v6305_v45  ;;  %v7945_v45 = vld [vmem:[#allocation31_spill] sm:$0xff] }
 0x426   : > { %v4007_v51 = vpop.eup %4006  ;;  %v3006_v20 = vpop.permute.xlu1 %3005  ;;  %v2175_v10 = vmul.f32 %v4005_v15, %v7940_v13  ;;  %v2977_v18 = vpack.c.bf16 %v7945_v45, %v7944_v36 }
 0x427   : > { %3720 = vmatpush3.bf16.msra.mxu1 %v3006_v20  ;;  %v2176_v32 = vmul.f32 %v4007_v51, %v7941_v2  ;;  %v2309_v20 = vpack.c.bf16 %v6361_v31, %v6276_v63 }
 0x428   : > { %3721 = vmatprep.subr.bf16.mxu1 %v3024_v62 }
 0x429   : > { %v4009_v40 = vpop.eup %4008  ;;  %v2213_v8 = vadd.f32 %v2176_v32, %v2175_v10  ;;  %v2314_v4 = vpack.c.bf16 %v6386_v41, %v2176_v32  ;;  %v7946_v41 = vld [vmem:[#allocation13_spill] sm:$0xff]  ;;  %v7947_v32 = vld [vmem:[#allocation128_spill] sm:$0xff] }
 0x42a   : > { %v4011_v3 = vpop.eup %4010  ;;  %v2338_v56 = vpop.permute.xlu1 %2337  ;;  %v6403_v59 = vmul.f32 %v4009_v40, %v7940_v13  ;;  %v7943_v13 = vld [vmem:[#allocation112_spill] sm:$0xff]  ;;  %v2980_v40 = vpack.c.bf16 %v7947_v32, %v7946_v41  ;;  %v7954_v41 = vld [vmem:[#allocation130_spill] sm:$0xff] }
 0x42b   : > { %2214 = vadd.xlane.f32.xlu0 %v2213_v8  ;;  %3658 = vmatpush3.bf16.msra.mxu0 %v2338_v56  ;;  %v2846_v30 = vmul.f32 %v4011_v3, %v7941_v2  ;;  %v2313_v2 = vpack.c.bf16 %v6383_v22, %v2175_v10  ;;  %v7948_v8 = vld [vmem:[#allocation105_spill] sm:$0xff]  ;;  %v2982_v22 = vpack.c.bf16 %v6251_v57, %v6208_v1 }
 0x42c   : > { %v7949_v3 = vld [vmem:[#allocation73_spill] sm:$0xff] }
 0x42d   : > { %v4013_v46 = vpop.eup %4012  ;;  %v6411_v55 = vadd.f32 %v2846_v30, %v6403_v59  ;;  %v2979_v56 = vpack.c.bf16 %v7949_v3, %v7948_v8 }
 0x42e   : > { %v4015_v12 = vpop.eup %4014  ;;  %2404 = vmatmul.mubr.bf16.vlgmr.msra.gmra.mrb[32].mxu0 %v2307_v9  ;;  %v2847_v34 = vmul.f32 %v4013_v46, %v7930_v7  ;;  %v7942_v7 = vld [vmem:[#allocation71_spill] sm:$0xff] }
 0x42f   : > { %2411 = vmatprep.mubr.bf16.mxu0 %v2310_v24  ;;  %v2848_v15 = vmul.f32 %v4015_v12, %v7931_v35  ;;  %v7950_v46 = vld [vmem:[#allocation35_spill] sm:$0xff]  ;;  %v7951_v12 = vld [vmem:[#allocation36_spill] sm:$0xff] }
 0x431   : > { %v6415_v51 = vadd.f32 %v2848_v15, %v2847_v34 }
 0x436   : > { %2412 = vmatmul.mubr.bf16.gmra.mrb[36].mxu0 %v2309_v20 }
 0x437   : > { %2419 = vmatprep.mubr.bf16.mxu0 %v2312_v58 }
 0x43e   : > { %2420 = vmatmul.mubr.bf16.gmra.mrb[40].mxu0 %v2311_v28  ;;  %v2981_v28 = vpack.c.bf16 %v6243_v60, %v6199_v27 }
 0x43f   : > { %2427 = vmatprep.mubr.bf16.mxu0 %v2314_v4  ;;  %v2984_v4 = vpack.c.bf16 %v2848_v15, %v2846_v30 }
 0x443   : > { %v2048_v33 = vpop.xlane.xlu0 %2047 }
 0x444   : > { %v2085_v35 = vsub.f32 %v7942_v7, %v2048_v33  ;;  %v2086_v62 = vsub.f32 %v7943_v13, %v2048_v33 }
 0x446   : > { %v2135_v63 = vmul.f32 1.442695, %v2085_v35  ;;  %v2137_v31 = vmul.f32 1.442695, %v2086_v62  ;;  %2428 = vmatmul.mubr.bf16.gmra.mrb[44].mxu0 %v2313_v2  ;;  %v7952_v62 = vld [vmem:[#allocation44_spill] sm:$0xff] }
 0x447   : > { %v3008_v43 = vpop.permute.xlu0 %3007 }
 0x448   : > { %4016 = vpow2.f32 %v2135_v63  ;;  %3722 = vmatpush3.bf16.msra.mxu1 %v3008_v43  ;;  %v7953_v63 = vld [vmem:[#allocation48_spill] sm:$0xff]  ;;  %v2983_v43 = vpack.c.bf16 %v2847_v34, %v6403_v59 }
 0x449   : > { %4018 = vpow2.f32 %v2137_v31 }
 0x44b   : > { %3074 = vmatmul.mubr.bf16.vlgmr.msra.gmra.mrb[32].mxu1 %v2977_v18 }
 0x44c   : > { %3081 = vmatprep.mubr.bf16.mxu1 %v2980_v40 }
 0x452   : > { %v4017_v9 = vpop.eup %4016 }
 0x453   : > { %v4019_v10 = vpop.eup %4018  ;;  %3082 = vmatmul.mubr.bf16.gmra.mrb[36].mxu1 %v2979_v56  ;;  %v2181_v24 = vmul.f32 %v4017_v9, %v7950_v46  ;;  %v7955_v56 = vld [vmem:[#allocation33_spill] sm:$0xff] }
 0x454   : > { %3089 = vmatprep.mubr.bf16.mxu1 %v2982_v22  ;;  %v2182_v20 = vmul.f32 %v4019_v10, %v7951_v12  ;;  %v7956_v9 = vld [vmem:[#allocation129_spill] sm:$0xff]  ;;  %v7957_v10 = vld [vmem:[#allocation34_spill] sm:$0xff] }
 0x456   : > { %v2222_v58 = vadd.f32 %v2182_v20, %v2181_v24 }
 0x458   : > { %2223 = vadd.xlane.f32.xlu1 %v2222_v58 }
 0x45b   : > { %v2045_v33 = vpop.xlane.xlu1 %2044  ;;  %3090 = vmatmul.mubr.bf16.gmra.mrb[40].mxu1 %v2981_v28 }
 0x45c   : > { %v2083_v7 = vsub.f32 %v6013_v14, %v2045_v33  ;;  %v2084_v35 = vsub.f32 %v6020_v48, %v2045_v33  ;;  %3097 = vmatprep.mubr.bf16.mxu1 %v2984_v4 }
 0x45e   : > { %v2131_v57 = vmul.f32 1.442695, %v2083_v7  ;;  %v2133_v1 = vmul.f32 1.442695, %v2084_v35 }
 0x45f   : > { %v2715_v13 = vpop.xlane.xlu1 %2714 }
 0x460   : > { %4020 = vpow2.f32 %v2131_v57  ;;  %v2753_v2 = vsub.f32 %v7952_v62, %v2715_v13  ;;  %v2754_v31 = vsub.f32 %v7953_v63, %v2715_v13 }
 0x461   : > { %4022 = vpow2.f32 %v2133_v1 }
 0x462   : > { %v2801_v27 = vmul.f32 1.442695, %v2753_v2  ;;  %v2803_v60 = vmul.f32 1.442695, %v2754_v31 }
 0x463   : > { %v2718_v30 = vpop.xlane.xlu1 %2717  ;;  %3098 = vmatmul.mubr.bf16.gmra.mrb[44].mxu1 %v2983_v43 }
 0x464   : > { %v2755_v14 = vsub.f32 %v6051_v52, %v2718_v30  ;;  %v2756_v48 = vsub.f32 %v6054_v37, %v2718_v30  ;;  %4024 = vpow2.f32 %v2801_v27 }
 0x465   : > { %4026 = vpow2.f32 %v2803_v60 }
 0x466   : > { %v2805_v15 = vmul.f32 1.442695, %v2755_v14  ;;  %v2807_v36 = vmul.f32 1.442695, %v2756_v48 }
 0x467   : > { %v2051_v45 = vpop.xlane.xlu1 %2050 }
 0x468   : > { %4028 = vpow2.f32 %v2805_v15  ;;  %v2087_v18 = vsub.f32 %v6066_v53, %v2051_v45  ;;  %v2088_v32 = vsub.f32 %v7954_v41, %v2051_v45 }
 0x469   : > { %4030 = vpow2.f32 %v2807_v36 }
 0x46a   : > { %v4021_v59 = vpop.eup %4020  ;;  %v2139_v34 = vmul.f32 1.442695, %v2087_v18  ;;  %v2141_v40 = vmul.f32 1.442695, %v2088_v32  ;;  %v7959_v32 = vld [vmem:[#allocation39_spill] sm:$0xff] }
 0x46b   : > { %v4023_v8 = vpop.eup %4022  ;;  %v2054_v3 = vpop.xlane.xlu1 %2053  ;;  %v2179_v52 = vmul.f32 %v4021_v59, %v7955_v56 }
 0x46c   : > { %4032 = vpow2.f32 %v2139_v34  ;;  %v2089_v37 = vsub.f32 %v6077_v49, %v2054_v3  ;;  %v2090_v22 = vsub.f32 %v7956_v9, %v2054_v3  ;;  %v2180_v58 = vmul.f32 %v4023_v8, %v7957_v10 }
 0x46d   : > { %4034 = vpow2.f32 %v2141_v40  ;;  %v2315_v28 = vpack.c.bf16 %v2181_v24, %v2179_v52 }
 0x46e   : > { %v2143_v53 = vmul.f32 1.442695, %v2089_v37  ;;  %v2145_v4 = vmul.f32 1.442695, %v2090_v22  ;;  %v2219_v33 = vadd.f32 %v2180_v58, %v2179_v52  ;;  %v2316_v7 = vpack.c.bf16 %v2182_v20, %v2180_v58  ;;  %v4025_v57 = vpop.eup %4024 }
 0x46f   : > { %v2721_v35 = vpop.xlane.xlu1 %2720  ;;  %v4027_v49 = vpop.eup %4026  ;;  %v6455_v43 = vmul.f32 %v4025_v57, %v7955_v56 }
 0x470   : > { %4036 = vpow2.f32 %v2143_v53  ;;  %v2757_v1 = vsub.f32 %v6113_v44, %v2721_v35  ;;  %v2758_v13 = vsub.f32 %v6123_v42, %v2721_v35  ;;  %2220 = vadd.xlane.f32.xlu0 %v2219_v33  ;;  %2435 = vmatprep.mubr.bf16.mxu0 %v2316_v7  ;;  %v6463_v27 = vmul.f32 %v4027_v49, %v7957_v10  ;;  %v7960_v10 = vld [vmem:[#allocation40_spill] sm:$0xff]  ;;  %v7961_v53 = vld [vmem:[#allocation41_spill] sm:$0xff] }
 0x471   : > { %4038 = vpow2.f32 %v2145_v4  ;;  %2436 = vmatmul.mubr.bf16.gmra.mrb[48].mxu0 %v2315_v28 }
 0x472   : > { %v4029_v62 = vpop.eup %4028  ;;  %v2809_v2 = vmul.f32 1.442695, %v2757_v1  ;;  %v2811_v63 = vmul.f32 1.442695, %v2758_v13 }
 0x473   : > { %v4031_v24 = vpop.eup %4030  ;;  %v2724_v31 = vpop.xlane.xlu1 %2723  ;;  %v6458_v20 = vmul.f32 %v4029_v62, %v7950_v46 }
 0x474   : > { %v2759_v44 = vsub.f32 %v6150_v25, %v2724_v31  ;;  %v2760_v42 = vsub.f32 %v6153_v6, %v2724_v31  ;;  %v6466_v60 = vmul.f32 %v4031_v24, %v7951_v12  ;;  %4040 = vpow2.f32 %v2809_v2  ;;  %v7958_v6 = vld [vmem:[#allocation37_spill] sm:$0xff] }
 0x475   : > { %v2985_v30 = vpack.c.bf16 %v6458_v20, %v6455_v43  ;;  %4042 = vpow2.f32 %v2811_v63 }
 0x476   : > { %v4033_v14 = vpop.eup %4032  ;;  %v2813_v48 = vmul.f32 1.442695, %v2759_v44  ;;  %v2815_v15 = vmul.f32 1.442695, %v2760_v42  ;;  %v2986_v46 = vpack.c.bf16 %v6466_v60, %v6463_v27 }
 0x477   : > { %v4035_v25 = vpop.eup %4034  ;;  %v2060_v36 = vpop.xlane.xlu1 %2059  ;;  %v2183_v45 = vmul.f32 %v4033_v14, %v7958_v6 }
 0x478   : > { %4044 = vpow2.f32 %v2813_v48  ;;  %v2093_v18 = vsub.f32 %v6179_v11, %v2060_v36  ;;  %v2094_v12 = vsub.f32 %v6185_v5, %v2060_v36  ;;  %3105 = vmatprep.mubr.bf16.mxu1 %v2986_v46  ;;  %v2057_v41 = vpop.xlane.xlu0 %2056  ;;  %v2184_v59 = vmul.f32 %v4035_v25, %v7959_v32 }
 0x479   : > { %4046 = vpow2.f32 %v2815_v15  ;;  %3106 = vmatmul.mubr.bf16.gmra.mrb[48].mxu1 %v2985_v30  ;;  %v2091_v34 = vsub.f32 %v6193_v26, %v2057_v41  ;;  %v2092_v40 = vsub.f32 %v6196_v47, %v2057_v41  ;;  %v7963_v41 = vld [vmem:[#allocation47_spill] sm:$0xff] }
 0x47a   : > { %v4037_v8 = vpop.eup %4036  ;;  %v2151_v3 = vmul.f32 1.442695, %v2093_v18  ;;  %v2153_v56 = vmul.f32 1.442695, %v2094_v12  ;;  %v2225_v52 = vadd.f32 %v2184_v59, %v2183_v45 }
 0x47b   : > { %v4039_v37 = vpop.eup %4038  ;;  %v2147_v9 = vmul.f32 1.442695, %v2091_v34  ;;  %v2149_v22 = vmul.f32 1.442695, %v2092_v40  ;;  %v2727_v11 = vpop.xlane.xlu1 %2726  ;;  %v2185_v5 = vmul.f32 %v4037_v8, %v7960_v10  ;;  %v7964_v34 = vld [vmem:[#allocation42_spill] sm:$0xff] }
 0x47c   : > { %4048 = vpow2.f32 %v2151_v3  ;;  %v2761_v58 = vsub.f32 %v6216_v19, %v2727_v11  ;;  %v2762_v28 = vsub.f32 %v6227_v16, %v2727_v11  ;;  %2226 = vadd.xlane.f32.xlu0 %v2225_v52  ;;  %v2186_v26 = vmul.f32 %v4039_v37, %v7961_v53  ;;  %v7965_v52 = vld [vmem:[#allocation43_spill] sm:$0xff] }
 0x47d   : > { %4050 = vpow2.f32 %v2153_v56  ;;  %v2317_v4 = vpack.c.bf16 %v2185_v5, %v2183_v45  ;;  %v7962_v45 = vld [vmem:[#allocation46_spill] sm:$0xff] }
 0x47e   : > { %4052 = vpow2.f32 %v2147_v9  ;;  %v2817_v47 = vmul.f32 1.442695, %v2761_v58  ;;  %v4041_v33 = vpop.eup %4040  ;;  %v2819_v7 = vmul.f32 1.442695, %v2762_v28  ;;  %v2318_v57 = vpack.c.bf16 %v2186_v26, %v2184_v59 }
 0x47f   : > { %4054 = vpow2.f32 %v2149_v22  ;;  %v2730_v35 = vpop.xlane.xlu1 %2729  ;;  %v2228_v1 = vadd.f32 %v2186_v26, %v2185_v5  ;;  %v4043_v13 = vpop.eup %4042  ;;  %v6488_v44 = vmul.f32 %v4041_v33, %v7958_v6 }
 0x480   : > { %v2763_v49 = vsub.f32 %v6258_v17, %v2730_v35  ;;  %v2764_v19 = vsub.f32 %v6261_v23, %v2730_v35  ;;  %2443 = vmatprep.mubr.bf16.mxu0 %v2318_v57  ;;  %4056 = vpow2.f32 %v2817_v47  ;;  %v6485_v31 = vmul.f32 %v4043_v13, %v7959_v32 }
 0x481   : > { %2229 = vadd.xlane.f32.xlu1 %v2228_v1  ;;  %2444 = vmatmul.mubr.bf16.gmra.mrb[52].mxu0 %v2317_v4  ;;  %4058 = vpow2.f32 %v2819_v7 }
 0x482   : > { %v4045_v16 = vpop.eup %4044  ;;  %v2821_v62 = vmul.f32 1.442695, %v2763_v49  ;;  %v2823_v2 = vmul.f32 1.442695, %v2764_v19 }
 0x483   : > { %v4047_v63 = vpop.eup %4046  ;;  %v2063_v24 = vpop.xlane.xlu1 %2062  ;;  %v6491_v17 = vmul.f32 %v4045_v16, %v7960_v10 }
 0x484   : > { %4060 = vpow2.f32 %v2821_v62  ;;  %v2095_v23 = vsub.f32 %v6285_v54, %v2063_v24  ;;  %v2096_v42 = vsub.f32 %v6288_v61, %v2063_v24  ;;  %v6496_v30 = vmul.f32 %v4047_v63, %v7961_v53  ;;  %v7967_v24 = vld [vmem:[#allocation50_spill] sm:$0xff] }
 0x485   : > { %4062 = vpow2.f32 %v2823_v2  ;;  %v2987_v14 = vpack.c.bf16 %v6491_v17, %v6488_v44  ;;  %v7966_v2 = vld [vmem:[#allocation45_spill] sm:$0xff] }
 0x486   : > { %v4049_v48 = vpop.eup %4048  ;;  %v2155_v15 = vmul.f32 1.442695, %v2095_v23  ;;  %v2157_v46 = vmul.f32 1.442695, %v2096_v42  ;;  %v2988_v25 = vpack.c.bf16 %v6496_v30, %v6485_v31 }
 0x487   : > { %v4051_v36 = vpop.eup %4050  ;;  %v2066_v6 = vpop.xlane.xlu1 %2065  ;;  %v2189_v18 = vmul.f32 %v4049_v48, %v7962_v45 }
 0x488   : > { %v4053_v54 = vpop.eup %4052  ;;  %4064 = vpow2.f32 %v2155_v15  ;;  %v2097_v61 = vsub.f32 %v6320_v21, %v2066_v6  ;;  %v2098_v12 = vsub.f32 %v6323_v0, %v2066_v6  ;;  %3113 = vmatprep.mubr.bf16.mxu1 %v2988_v25  ;;  %v2190_v32 = vmul.f32 %v4051_v36, %v7963_v41  ;;  %v7969_v15 = vld [vmem:[#allocation65_spill] sm:$0xff] }
 0x489   : > { %v4055_v59 = vpop.eup %4054  ;;  %4066 = vpow2.f32 %v2157_v46  ;;  %3114 = vmatmul.mubr.bf16.gmra.mrb[52].mxu1 %v2987_v14  ;;  %v2187_v40 = vmul.f32 %v4053_v54, %v7964_v34  ;;  %v7968_v14 = vld [vmem:[#allocation63_spill] sm:$0xff]  ;;  %v7970_v54 = vld [vmem:[#allocation30_spill] sm:$0xff] }
 0x48a   : > { %v2159_v8 = vmul.f32 1.442695, %v2097_v61  ;;  %v2161_v3 = vmul.f32 1.442695, %v2098_v12  ;;  %v2234_v56 = vadd.f32 %v2190_v32, %v2189_v18  ;;  %v2188_v37 = vmul.f32 %v4055_v59, %v7965_v52  ;;  %v4057_v11 = vpop.eup %4056  ;;  %v7971_v59 = vld [vmem:[#allocation72_spill] sm:$0xff] }
 0x48b   : > { %v2733_v9 = vpop.xlane.xlu1 %2732  ;;  %v2319_v22 = vpack.c.bf16 %v2189_v18, %v2187_v40  ;;  %v4059_v5 = vpop.eup %4058  ;;  %v2857_v33 = vmul.f32 %v4057_v11, %v7964_v34  ;;  %v2892_v11 = vadd.f32 %v6466_v60, %v6458_v20  ;;  %v7978_v60 = vld [vmem:[#allocation113_spill] sm:$0xff] }
 0x48c   : > { %4068 = vpow2.f32 %v2159_v8  ;;  %v2765_v21 = vsub.f32 %v6330_v50, %v2733_v9  ;;  %v2766_v0 = vsub.f32 %v6335_v29, %v2733_v9  ;;  %2235 = vadd.xlane.f32.xlu1 %v2234_v56  ;;  %v2320_v10 = vpack.c.bf16 %v2190_v32, %v2188_v37  ;;  %v7972_v8 = vld [vmem:[#allocation5_spill] sm:$0xff]  ;;  %v7975_v9 = vld [vmem:[#allocation7_spill] sm:$0xff] }
 0x48d   : > { %4070 = vpow2.f32 %v2161_v3  ;;  %v2231_v58 = vadd.f32 %v2188_v37, %v2187_v40  ;;  %v2858_v35 = vmul.f32 %v4059_v5, %v7965_v52  ;;  %v7973_v52 = vld [vmem:[#allocation109_spill] sm:$0xff]  ;;  %v7974_v37 = vld [vmem:[#allocation120_spill] sm:$0xff]  ;;  %vm1575_vm2 = vcmp.gt.f32.partialorder %v7978_v60, 0.0 }
 0x48e   : > { %v4061_v28 = vpop.eup %4060  ;;  %v2825_v53 = vmul.f32 1.442695, %v2765_v21  ;;  %2451 = vmatprep.mubr.bf16.mxu0 %v2320_v10  ;;  %v2827_v47 = vmul.f32 1.442695, %v2766_v0  ;;  %v2895_v21 = vadd.f32 %v6485_v31, %v6488_v44  ;;  %v2898_v0 = vadd.f32 %v6496_v30, %v6491_v17  ;;  %v7976_v5 = vld [vmem:[#allocation108_spill] sm:$0xff]  ;;  %v7980_v30 = vld [vmem:[#allocation111_spill] sm:$0xff] }
 0x48f   : > { %v4063_v26 = vpop.eup %4062  ;;  %2232 = vadd.xlane.f32.xlu0 %v2231_v58  ;;  %2452 = vmatmul.mubr.bf16.gmra.mrb[56].mxu0 %v2319_v22  ;;  %v2736_v4 = vpop.xlane.xlu1 %2735  ;;  %v2859_v7 = vmul.f32 %v4061_v28, %v7962_v45  ;;  %v2889_v22 = vadd.f32 %v6463_v27, %v6455_v43  ;;  %v2901_v10 = vadd.f32 %v2858_v35, %v2857_v33  ;;  %vm1574_vm0 = vcmp.gt.f32.partialorder %v7976_v5, 0.0  ;;  %v7979_v44 = vld [vmem:[#allocation116_spill] sm:$0xff]  ;;  %v7981_v28 = vld [vmem:[#allocation118_spill] sm:$0xff] }
 0x490   : > { %v2767_v50 = vsub.f32 %v6342_v38, %v2736_v4  ;;  %v2768_v29 = vsub.f32 %v6345_v39, %v2736_v4  ;;  %v2860_v57 = vmul.f32 %v4063_v26, %v7963_v41  ;;  %4072 = vpow2.f32 %v2825_v53  ;;  %v7982_v26 = vld [vmem:[#allocation114_spill] sm:$0xff]  ;;  %v7983_v4 = vld [vmem:[#allocation121_spill] sm:$0xff] }
 0x491   : > { %v2989_v1 = vpack.c.bf16 %v2859_v7, %v2857_v33  ;;  %4074 = vpow2.f32 %v2827_v47  ;;  %v1590_v20 = vsel %vm1574_vm0, %v7976_v5, 1.0  ;;  %vm1577_vm3 = vcmp.gt.f32.partialorder %v7979_v44, 0.0 }
 0x492   : > { %v4065_v13 = vpop.eup %4064  ;;  %v2829_v49 = vmul.f32 1.442695, %v2767_v50  ;;  %v2831_v19 = vmul.f32 1.442695, %v2768_v29  ;;  %v2990_v16 = vpack.c.bf16 %v2860_v57, %v2858_v35  ;;  %v1591_v17 = vsel %vm1575_vm2, %v7978_v60, 1.0  ;;  %v7984_v50 = vld [vmem:[#allocation117_spill] sm:$0xff] }
 0x493   : > { %v4067_v62 = vpop.eup %4066  ;;  %v2191_v63 = vmul.f32 %v4065_v13, %v7966_v2  ;;  %vm1576_vm4 = vcmp.gt.f32.partialorder %v7980_v30, 0.0  ;;  %v1593_v58 = vsel %vm1577_vm3, %v7979_v44, 1.0  ;;  %vm1579_vm5 = vcmp.gt.f32.partialorder %v7981_v28, 0.0 }
 0x494   : > { %4076 = vpow2.f32 %v2829_v49  ;;  %3121 = vmatprep.mubr.bf16.mxu1 %v2990_v16  ;;  %v2192_v38 = vmul.f32 %v4067_v62, %v7967_v24  ;;  %v1592_v53 = vsel %vm1576_vm4, %v7980_v30, 1.0  ;;  %vm1578_vm6 = vcmp.gt.f32.partialorder %v7982_v26, 0.0  ;;  %v7987_v16 = vld [vmem:[#allocation38_spill] sm:$0xff] }
 0x495   : > { %4078 = vpow2.f32 %v2831_v19  ;;  %3122 = vmatmul.mubr.bf16.gmra.mrb[56].mxu1 %v2989_v1  ;;  %v1595_v47 = vsel %vm1579_vm5, %v7981_v28, 1.0  ;;  %vm1581_vm7 = vcmp.gt.f32.partialorder %v7983_v4, 0.0  ;;  %v1594_v33 = vsel %vm1578_vm6, %v7982_v26, 1.0  ;;  %v7986_v19 = vld [vmem:[#allocation119_spill] sm:$0xff] }
 0x496   : > { %v4069_v39 = vpop.eup %4068  ;;  %v2237_v23 = vadd.f32 %v2192_v38, %v2191_v63  ;;  %4080 = vrcp.f32 %v1590_v20  ;;  %vm1580_vm8 = vcmp.gt.f32.partialorder %v7984_v50, 0.0  ;;  %v1597_v29 = vsel %vm1581_vm7, %v7983_v4, 1.0 }
 0x497   : > { %v4071_v42 = vpop.eup %4070  ;;  %v2193_v48 = vmul.f32 %v4069_v39, %v7968_v14  ;;  %v1596_v1 = vsel %vm1580_vm8, %v7984_v50, 1.0  ;;  %vm1582_vm10 = vcmp.gt.f32.partialorder %v7986_v19, 0.0  ;;  %v7989_v39 = vld [vmem:[#allocation32_spill] sm:$0xff]  ;;  %v8003_v50 = vld [vmem:[#allocation51_spill] sm:$0xff] }
 0x498   : > { %2238 = vadd.xlane.f32.xlu0 %v2237_v23  ;;  %v2194_v46 = vmul.f32 %v4071_v42, %v7969_v15  ;;  %v1598_v42 = vsel %vm1582_vm10, %v7986_v19, 1.0  ;;  %v8005_v19 = vld [vmem:[#allocation55_spill] sm:$0xff] }
 0x499   : > { %v2321_v25 = vpack.c.bf16 %v2193_v48, %v2191_v63 }
 0x49a   : > { %v2240_v36 = vadd.f32 %v2194_v46, %v2193_v48  ;;  %v2322_v6 = vpack.c.bf16 %v2194_v46, %v2192_v38  ;;  %v4073_v45 = vpop.eup %4072  ;;  %v7988_v38 = vld [vmem:[#allocation127_spill] sm:$0xff] }
 0x49b   : > { %v4075_v18 = vpop.eup %4074  ;;  %v2861_v41 = vmul.f32 %v4073_v45, %v7966_v2  ;;  %vm1585_vm11 = vcmp.gt.f32.partialorder %v7988_v38, 0.0  ;;  %v7991_v46 = vld [vmem:[#allocation115_spill] sm:$0xff] }
 0x49c   : > { %2241 = vadd.xlane.f32.xlu1 %v2240_v36  ;;  %2459 = vmatprep.mubr.bf16.mxu0 %v2322_v6  ;;  %v2862_v34 = vmul.f32 %v4075_v18, %v7967_v24  ;;  %v1601_v36 = vsel %vm1585_vm11, %v7988_v38, 1.0  ;;  %v7992_v18 = vld [vmem:[#allocation12_spill] sm:$0xff] }
 0x49d   : > { %2866 = vadd.xlane.f32.xlu0 %v7970_v54  ;;  %2460 = vmatmul.mubr.bf16.gmra.mrb[60].mxu0 %v2321_v25  ;;  %vm1587_vm13 = vcmp.gt.f32.partialorder %v7992_v18, 0.0  ;;  %v7993_v54 = vld [vmem:[#allocation6_spill] sm:$0xff] }
 0x49e   : > { %v4077_v61 = vpop.eup %4076  ;;  %v2907_v43 = vadd.f32 %v2862_v34, %v2861_v41 }
 0x49f   : > { %v4079_v12 = vpop.eup %4078  ;;  %v2863_v32 = vmul.f32 %v4077_v61, %v7968_v14 }
 0x4a0   : > { %2869 = vadd.xlane.f32.xlu1 %v7971_v59  ;;  %v2864_v40 = vmul.f32 %v4079_v12, %v7969_v15  ;;  %v7990_v15 = vld [vmem:[#allocation123_spill] sm:$0xff]  ;;  %v7994_v59 = vld [vmem:[#allocation125_spill] sm:$0xff] }
 0x4a1   : > { %2872 = vadd.xlane.f32.xlu0 %v7972_v8  ;;  %v2991_v3 = vpack.c.bf16 %v2863_v32, %v2861_v41  ;;  %vm1584_vm12 = vcmp.gt.f32.partialorder %v7990_v15, 0.0  ;;  %vm1586_vm14 = vcmp.gt.f32.partialorder %v7994_v59, 0.0  ;;  %v1603_v8 = vsel %vm1587_vm13, %v7992_v18, 1.0 }
 0x4a2   : > { %v2992_v56 = vpack.c.bf16 %v2864_v40, %v2862_v34  ;;  %v2910_v27 = vadd.f32 %v2864_v40, %v2863_v32  ;;  %v1600_v12 = vsel %vm1584_vm12, %v7990_v15, 1.0  ;;  %v7995_v34 = vld [vmem:[#allocation80_spill] sm:$0xff] }
 0x4a4   : > { %2875 = vadd.xlane.f32.xlu1 %v7973_v52  ;;  %3129 = vmatprep.mubr.bf16.mxu1 %v2992_v56  ;;  %v7996_v52 = vld [vmem:[#allocation122_spill] sm:$0xff] }
 0x4a5   : > { %2878 = vadd.xlane.f32.xlu0 %v7974_v37  ;;  %3130 = vmatmul.mubr.bf16.gmra.mrb[60].mxu1 %v2991_v3 }
 0x4a8   : > { %2881 = vadd.xlane.f32.xlu1 %v7975_v9  ;;  %v1602_v9 = vsel %vm1586_vm14, %v7994_v59, 1.0 }
 0x4a9   : > { %2884 = vadd.xlane.f32.xlu0 %v6411_v55  ;;  %v2904_v55 = vadd.f32 %v2860_v57, %v2859_v7  ;;  %v4081_v7 = vpop.eup %4080  ;;  %v7985_v57 = vld [vmem:[#allocation124_spill] sm:$0xff] }
 0x4aa   : > { %vm1583_vm9 = vcmp.gt.f32.partialorder %v7985_v57, 0.0  ;;  %v1622_v13 = vsel %vm1574_vm0, %v4081_v7, 0.0 }
 0x4ab   : > { %v1799_v62 = vmul.f32 %v7987_v16, %v1622_v13  ;;  %v1599_v2 = vsel %vm1583_vm9, %v7985_v57, 1.0 }
 0x4ac   : > { %2887 = vadd.xlane.f32.xlu1 %v6415_v51  ;;  %v7977_v51 = vld [vmem:[#allocation110_spill] sm:$0xff] }
 0x4ad   : > { %2890 = vadd.xlane.f32.xlu0 %v2889_v22  ;;  %vm1573_vm1 = vcmp.gt.f32.partialorder %v7977_v51, 0.0 }
 0x4ae   : > { %v1589_v31 = vsel %vm1573_vm1, %v7977_v51, 1.0 }
 0x4af   : > { %4082 = vrcp.f32 %v1589_v31  ;;  %v8000_v31 = vld [vmem:[#allocation52_spill] sm:$0xff] }
 0x4b0   : > { %2893 = vadd.xlane.f32.xlu1 %v2892_v11  ;;  %4084 = vrcp.f32 %v1591_v17 }
 0x4b1   : > { %2896 = vadd.xlane.f32.xlu0 %v2895_v21  ;;  %4086 = vrcp.f32 %v1593_v58  ;;  %v7997_v21 = vld [vmem:[#allocation126_spill] sm:$0xff]  ;;  %v8001_v58 = vld [vmem:[#allocation132_spill] sm:$0xff] }
 0x4b2   : > { %4088 = vrcp.f32 %v1592_v53  ;;  %vm1588_vm15 = vcmp.gt.f32.partialorder %v7997_v21, 0.0 }
 0x4b3   : > { %4090 = vrcp.f32 %v1595_v47  ;;  %v1604_v20 = vsel %vm1588_vm15, %v7997_v21, 1.0  ;;  %v8002_v47 = vld [vmem:[#allocation133_spill] sm:$0xff] }
 0x4b4   : > { %2899 = vadd.xlane.f32.xlu1 %v2898_v0  ;;  %4092 = vrcp.f32 %v1594_v33  ;;  %v7998_v0 = vld [vmem:[#allocation131_spill] sm:$0xff] }
 0x4b5   : > { %2902 = vadd.xlane.f32.xlu0 %v2901_v10  ;;  %4094 = vrcp.f32 %v1597_v29 }
 0x4b6   : > { %4096 = vrcp.f32 %v1596_v1  ;;  %v8004_v1 = vld [vmem:[#allocation49_spill] sm:$0xff] }
 0x4b7   : > { %4098 = vrcp.f32 %v1599_v2 }
 0x4b8   : > { %2905 = vadd.xlane.f32.xlu1 %v2904_v55  ;;  %4100 = vrcp.f32 %v1598_v42  ;;  %v2197_v42 = vpop.xlane.xlu0 %2196 }
 0x4b9   : > { %2908 = vadd.xlane.f32.xlu0 %v2907_v43  ;;  %v4083_v35 = vpop.eup %4082  ;;  %4102 = vrcp.f32 %v1601_v36  ;;  %v7999_v43 = vld [vmem:[#allocation53_spill] sm:$0xff]  ;;  %vm2243_vm0 = vcmp.gt.f32.partialorder %v2197_v42, 0.0 }
 0x4ba   : > { %v4085_v49 = vpop.eup %4084  ;;  %v1621_v63 = vsel %vm1573_vm1, %v4083_v35, 0.0  ;;  %4104 = vrcp.f32 %v1600_v12 }
 0x4bb   : > { %v4087_v24 = vpop.eup %4086  ;;  %v1798_v23 = vmul.f32 %v7989_v39, %v1621_v63  ;;  %v1623_v14 = vsel %vm1575_vm2, %v4085_v49, 0.0  ;;  %4106 = vrcp.f32 %v1603_v8  ;;  %v8006_v63 = vld [vmem:[#allocation54_spill] sm:$0xff]  ;;  %v8007_v39 = vld [vmem:[#allocation56_spill] sm:$0xff] }
 0x4bc   : > { %2911 = vadd.xlane.f32.xlu1 %v2910_v27  ;;  %v4089_v48 = vpop.eup %4088  ;;  %v1800_v25 = vmul.f32 %v7991_v46, %v1623_v14  ;;  %v1625_v6 = vsel %vm1577_vm3, %v4087_v24, 0.0  ;;  %4108 = vrcp.f32 %v1602_v9  ;;  %v2200_v14 = vpop.xlane.xlu1 %2199 }
 0x4bd   : > { %v4091_v45 = vpop.eup %4090  ;;  %v1802_v61 = vmul.f32 %v7993_v54, %v1625_v6  ;;  %v1624_v41 = vsel %vm1576_vm4, %v4089_v48, 0.0  ;;  %4110 = vrcp.f32 %v1604_v20  ;;  %vm2244_vm1 = vcmp.gt.f32.partialorder %v2200_v14, 0.0  ;;  %v2203_v15 = vpop.xlane.xlu0 %2202 }
 0x4be   : > { %v4093_v32 = vpop.eup %4092  ;;  %v1801_v40 = vmul.f32 %v7995_v34, %v1624_v41  ;;  %v1627_v3 = vsel %vm1579_vm5, %v4091_v45, 0.0  ;;  %v2259_v48 = vsel %vm2243_vm0, %v2197_v42, 1.0  ;;  %v2260_v46 = vsel %vm2244_vm1, %v2200_v14, 1.0 }
 0x4bf   : > { %v4095_v56 = vpop.eup %4094  ;;  %v1804_v37 = vmul.f32 %v7996_v52, %v1627_v3  ;;  %v1626_v22 = vsel %vm1578_vm6, %v4093_v32, 0.0  ;;  %4112 = vrcp.f32 %v2259_v48  ;;  %vm2245_vm2 = vcmp.gt.f32.partialorder %v2203_v15, 0.0 }
 0x4c0   : > { %v4097_v11 = vpop.eup %4096  ;;  %v1803_v10 = vmul.f32 %v7998_v0, %v1626_v22  ;;  %v1629_v55 = vsel %vm1581_vm7, %v4095_v56, 0.0  ;;  %4114 = vrcp.f32 %v2260_v46  ;;  %v2261_v36 = vsel %vm2245_vm2, %v2203_v15, 1.0 }
 0x4c1   : > { %v4099_v5 = vpop.eup %4098  ;;  %v1806_v51 = vmul.f32 %v7999_v43, %v1629_v55  ;;  %v1628_v27 = vsel %vm1580_vm8, %v4097_v11, 0.0  ;;  %v2209_v6 = vpop.xlane.xlu0 %2208  ;;  %4116 = vrcp.f32 %v2261_v36 }
 0x4c2   : > { %v4101_v60 = vpop.eup %4100  ;;  %v1805_v44 = vmul.f32 %v8000_v31, %v1628_v27  ;;  %v1631_v17 = vsel %vm1583_vm9, %v4099_v5, 0.0  ;;  %vm2247_vm4 = vcmp.gt.f32.partialorder %v2209_v6, 0.0 }
 0x4c3   : > { %v4103_v30 = vpop.eup %4102  ;;  %v1808_v28 = vmul.f32 %v8001_v58, %v1631_v17  ;;  %v1630_v53 = vsel %vm1582_vm10, %v4101_v60, 0.0 }
 0x4c4   : > { %v4105_v26 = vpop.eup %4104  ;;  %v1807_v4 = vmul.f32 %v8002_v47, %v1630_v53  ;;  %v1633_v33 = vsel %vm1585_vm11, %v4103_v30, 0.0 }
 0x4c5   : > { %v4107_v7 = vpop.eup %4106  ;;  %v1810_v29 = vmul.f32 %v8003_v50, %v1633_v33  ;;  %v1632_v35 = vsel %vm1584_vm12, %v4105_v26, 0.0  ;;  %v2215_v9 = vpop.xlane.xlu0 %2214 }
 0x4c6   : > { %v4109_v57 = vpop.eup %4108  ;;  %v1809_v13 = vmul.f32 %v8004_v1, %v1632_v35  ;;  %v1635_v49 = vsel %vm1587_vm13, %v4107_v7, 0.0  ;;  %vm2249_vm6 = vcmp.gt.f32.partialorder %v2215_v9, 0.0 }
 0x4c7   : > { %v1812_v16 = vmul.f32 %v8005_v19, %v1635_v49  ;;  %v4111_v2 = vpop.eup %4110  ;;  %v2265_v20 = vsel %vm2249_vm6, %v2215_v9, 1.0 }
 0x4c8   : > { %v1636_v38 = vsel %vm1588_vm15, %v4111_v2, 0.0 }
 0x4c9   : > { %v4113_v54 = vpop.eup %4112 }
 0x4ca   : > { %v4115_v41 = vpop.eup %4114  ;;  %v2291_v34 = vsel %vm2243_vm0, %v4113_v54, 0.0 }
 0x4cb   : > { %v2292_v52 = vsel %vm2244_vm1, %v4115_v41, 0.0  ;;  %v4117_v21 = vpop.eup %4116 }
 0x4cd   : > { %3172 = vrot.lane.b32.xlu1 %v1799_v62, %s4254_s9  ;;  %v1634_v62 = vsel %vm1586_vm14, %v4109_v57, 0.0  ;;  %vm3346_vm14 = vcmask 261120  }
 0x4ce   : > { %v1811_v24 = vmul.f32 %v8006_v63, %v1634_v62 }
 0x4cf   : > { %3170 = vrot.lane.b32.xlu0 %v1798_v23, %s4254_s9  ;;  %v1813_v23 = vmul.f32 %v8007_v39, %v1636_v38 }
 0x4d1   : > { %3174 = vrot.lane.b32.xlu1 %v1800_v25, %s4254_s9  ;;  %v2206_v25 = vpop.xlane.xlu1 %2205 }
 0x4d2   : > { %vm2246_vm3 = vcmp.gt.f32.partialorder %v2206_v25, 0.0 }
 0x4d3   : > { %3178 = vrot.lane.b32.xlu0 %v1802_v61, %s4254_s9  ;;  %v2262_v45 = vsel %vm2246_vm3, %v2206_v25, 1.0 }
 0x4d4   : > { %4118 = vrcp.f32 %v2262_v45 }
 0x4d5   : > { %3176 = vrot.lane.b32.xlu1 %v1801_v40, %s4254_s9  ;;  %v2212_v18 = vpop.xlane.xlu1 %2211  ;;  %v2263_v40 = vsel %vm2247_vm4, %v2209_v6, 1.0 }
 0x4d6   : > { %vm2248_vm5 = vcmp.gt.f32.partialorder %v2212_v18, 0.0  ;;  %4120 = vrcp.f32 %v2263_v40 }
 0x4d7   : > { %3182 = vrot.lane.b32.xlu0 %v1804_v37, %s4254_s9  ;;  %v2264_v37 = vsel %vm2248_vm5, %v2212_v18, 1.0 }
 0x4d8   : > { %4122 = vrcp.f32 %v2264_v37 }
 0x4d9   : > { %3180 = vrot.lane.b32.xlu1 %v1803_v10, %s4254_s9  ;;  %v2218_v11 = vpop.xlane.xlu1 %2217  ;;  %4124 = vrcp.f32 %v2265_v20 }
 0x4da   : > { %vm2250_vm7 = vcmp.gt.f32.partialorder %v2218_v11, 0.0 }
 0x4db   : > { %3186 = vrot.lane.b32.xlu0 %v1806_v51, %s4254_s9  ;;  %v2293_v51 = vsel %vm2245_vm2, %v4117_v21, 0.0  ;;  %v2266_v17 = vsel %vm2250_vm7, %v2218_v11, 1.0 }
 0x4dc   : > { %4126 = vrcp.f32 %v2266_v17 }
 0x4dd   : > { %3184 = vrot.lane.b32.xlu1 %v1805_v44, %s4254_s9 }
 0x4de   : > { %v4119_v55 = vpop.eup %4118 }
 0x4df   : > { %3190 = vrot.lane.b32.xlu0 %v1808_v28, %s4254_s9  ;;  %v2294_v44 = vsel %vm2246_vm3, %v4119_v55, 0.0  ;;  %v8008_v55 = vld [vmem:[#allocation88_spill] sm:$0xff] }
 0x4e0   : > { %v4121_v58 = vpop.eup %4120  ;;  %vm824_vm10 = vcmp.gt.f32.partialorder %v8008_v55, 0.0 }
 0x4e1   : > { %3188 = vrot.lane.b32.xlu1 %v1807_v4, %s4254_s9  ;;  %v2295_v33 = vsel %vm2247_vm4, %v4121_v58, 0.0 }
 0x4e2   : > { %v4123_v26 = vpop.eup %4122 }
 0x4e3   : > { %3194 = vrot.lane.b32.xlu0 %v1810_v29, %s4254_s9  ;;  %v2296_v35 = vsel %vm2248_vm5, %v4123_v26, 0.0  ;;  %v4125_v1 = vpop.eup %4124 }
 0x4e4   : > { %v2297_v2 = vsel %vm2249_vm6, %v4125_v1, 0.0 }
 0x4e5   : > { %3192 = vrot.lane.b32.xlu1 %v1809_v13, %s4254_s9 }
 0x4e6   : > { %v4127_v19 = vpop.eup %4126 }
 0x4e7   : > { %3198 = vrot.lane.b32.xlu0 %v1812_v16, %s4254_s9 }
 0x4e9   : > { %3196 = vrot.lane.b32.xlu1 %v1811_v24, %s4254_s9  ;;  %v6689_v24 = vpop.xlane.xlu1 %2223 }
 0x4ea   : > { %vm2252_vm9 = vcmp.gt.f32.partialorder %v6689_v24, 0.0 }
 0x4ed   : > { %3200 = vrot.lane.b32.xlu1 %v1813_v23, %s4254_s9  ;;  %v2298_v23 = vsel %vm2250_vm7, %v4127_v19, 0.0 }
 0x501   : > { %v3659_v61 = vpop.f32.mrb[32].mxu0 }
 0x502   : > { %v3660_v12 = vpop.f32.mrb[33].mxu0 }
 0x503   : > { %v3661_v32 = vadd.f32 %v3660_v12, %v3659_v61  ;;  %v3662_v59 = vpop.f32.mrb[34].mxu0 }
 0x504   : > { %v3663_v8 = vpop.f32.mrb[35].mxu0 }
 0x505   : > { %v2468_v3 = vmul.f32 %v3661_v32, %v2291_v34  ;;  %v3664_v56 = vadd.f32 %v3663_v8, %v3662_v59 }
 0x507   : > { %v2469_v22 = vmul.f32 %v3664_v56, %v2292_v52  ;;  %3234 = vrot.lane.b32.xlu0 %v2468_v3, %s4253_s21  ;;  %v2221_v3 = vpop.xlane.xlu0 %2220 }
 0x508   : > { %vm2251_vm8 = vcmp.gt.f32.partialorder %v2221_v3, 0.0 }
 0x509   : > { %v3665_v0 = vpop.f32.mrb[36].mxu0  ;;  %3236 = vrot.lane.b32.xlu1 %v2469_v22, %s4253_s21 }
 0x50a   : > { %v3666_v10 = vpop.f32.mrb[37].mxu0 }
 0x50b   : > { %v3667_v5 = vadd.f32 %v3666_v10, %v3665_v0  ;;  %v3668_v43 = vpop.f32.mrb[38].mxu0  ;;  %v2267_v0 = vsel %vm2251_vm8, %v2221_v3, 1.0 }
 0x50c   : > { %v3669_v27 = vpop.f32.mrb[39].mxu0  ;;  %4128 = vrcp.f32 %v2267_v0 }
 0x50d   : > { %v2470_v60 = vmul.f32 %v3667_v5, %v2293_v51  ;;  %v3670_v31 = vadd.f32 %v3669_v27, %v3668_v43  ;;  %v8009_v27 = vld [vmem:[#allocation92_spill] sm:$0xff] }
 0x50e   : > { %v6695_v25 = vpop.xlane.xlu1 %2229  ;;  %vm825_vm11 = vcmp.gt.f32.partialorder %v8009_v27, 0.0 }
 0x50f   : > { %v2471_v30 = vmul.f32 %v3670_v31, %v2294_v44  ;;  %3238 = vrot.lane.b32.xlu0 %v2470_v60, %s4253_s21  ;;  %v2268_v60 = vsel %vm2252_vm9, %v6689_v24, 1.0  ;;  %v840_v44 = vsel %vm824_vm10, %v8008_v55, 1.0  ;;  %v841_v17 = vsel %vm825_vm11, %v8009_v27, 1.0 }
 0x510   : > { %4130 = vrcp.f32 %v2268_v60  ;;  %vm2254_vm13 = vcmp.gt.f32.partialorder %v6695_v25, 0.0 }
 0x511   : > { %v3671_v28 = vpop.f32.mrb[40].mxu0  ;;  %3240 = vrot.lane.b32.xlu1 %v2471_v30, %s4253_s21  ;;  %4132 = vrcp.f32 %v840_v44 }
 0x512   : > { %v3672_v53 = vpop.f32.mrb[41].mxu0  ;;  %4134 = vrcp.f32 %v841_v17 }
 0x513   : > { %v3673_v47 = vadd.f32 %v3672_v53, %v3671_v28  ;;  %v3674_v4 = vpop.f32.mrb[42].mxu0  ;;  %v2227_v28 = vpop.xlane.xlu0 %2226 }
 0x514   : > { %v3675_v7 = vpop.f32.mrb[43].mxu0  ;;  %vm2253_vm12 = vcmp.gt.f32.partialorder %v2227_v28, 0.0 }
 0x515   : > { %v2472_v50 = vmul.f32 %v3673_v47, %v2295_v33  ;;  %v3676_v29 = vadd.f32 %v3675_v7, %v3674_v4  ;;  %v2269_v1 = vsel %vm2253_vm12, %v2227_v28, 1.0 }
 0x516   : > { %v4129_v53 = vpop.eup %4128  ;;  %4136 = vrcp.f32 %v2269_v1 }
 0x517   : > { %v2473_v57 = vmul.f32 %v3676_v29, %v2296_v35  ;;  %3242 = vrot.lane.b32.xlu0 %v2472_v50, %s4253_s21  ;;  %v2299_v29 = vsel %vm2251_vm8, %v4129_v53, 0.0 }
 0x519   : > { %v3677_v13 = vpop.f32.mrb[44].mxu0  ;;  %3244 = vrot.lane.b32.xlu1 %v2473_v57, %s4253_s21  ;;  %v6700_v45 = vpop.xlane.xlu1 %2235 }
 0x51a   : > { %v3678_v49 = vpop.f32.mrb[45].mxu0  ;;  %v4131_v50 = vpop.eup %4130  ;;  %vm2256_vm0 = vcmp.gt.f32.partialorder %v6700_v45, 0.0 }
 0x51b   : > { %v3679_v16 = vadd.f32 %v3678_v49, %v3677_v13  ;;  %v3680_v62 = vpop.f32.mrb[46].mxu0  ;;  %v4133_v57 = vpop.eup %4132  ;;  %v2272_v27 = vsel %vm2256_vm0, %v6700_v45, 1.0 }
 0x51c   : > { %v3681_v63 = vpop.f32.mrb[47].mxu0  ;;  %v6746_v13 = vpop.xlane.xlu0 %2232 }
 0x51d   : > { %v2474_v38 = vmul.f32 %v3679_v16, %v2297_v2  ;;  %v3682_v39 = vadd.f32 %v3681_v63, %v3680_v62  ;;  %v4135_v62 = vpop.eup %4134  ;;  %v2300_v2 = vsel %vm2252_vm9, %v4131_v50, 0.0  ;;  %v2270_v63 = vsel %vm2254_vm13, %v6695_v25, 1.0 }
 0x51e   : > { %v3723_v42 = vpop.f32.mrb[32].mxu1  ;;  %v873_v24 = vsel %vm825_vm11, %v4135_v62, 0.0  ;;  %4138 = vrcp.f32 %v2270_v63  ;;  %vm2255_vm15 = vcmp.gt.f32.partialorder %v6746_v13, 0.0 }
 0x51f   : > { %v2475_v14 = vmul.f32 %v3682_v39, %v2298_v23  ;;  %v3724_v48 = vpop.f32.mrb[33].mxu1  ;;  %3246 = vrot.lane.b32.xlu0 %v2474_v38, %s4253_s21  ;;  %v872_v38 = vsel %vm824_vm10, %v4133_v57, 0.0  ;;  %v8010_v23 = vld [vmem:[#allocation78_spill] sm:$0xff] }
 0x520   : > { %v6693_v15 = vadd.f32 %v3724_v48, %v3723_v42  ;;  %v3726_v46 = vpop.f32.mrb[34].mxu1  ;;  %v1129_v42 = vmul.f32 %v8010_v23, %v872_v38  ;;  %v4137_v0 = vpop.eup %4136 }
 0x521   : > { %3248 = vrot.lane.b32.xlu1 %v2475_v14, %s4253_s21  ;;  %v3727_v36 = vpop.f32.mrb[35].mxu1  ;;  %v2301_v17 = vsel %vm2253_vm12, %v4137_v0, 0.0 }
 0x522   : > { %v6698_v6 = vadd.f32 %v3727_v36, %v3726_v46 }
 0x525   : > { %v6759_v14 = vpop.xlane.xlu0 %2238 }
 0x526   : > { %v3729_v18 = vpop.f32.mrb[36].mxu1  ;;  %vm2257_vm1 = vcmp.gt.f32.partialorder %v6759_v14, 0.0 }
 0x527   : > { %v3730_v54 = vpop.f32.mrb[37].mxu1 }
 0x528   : > { %v6702_v61 = vadd.f32 %v3730_v54, %v3729_v18  ;;  %v3732_v12 = vpop.f32.mrb[38].mxu1 }
 0x529   : > { %v6704_v41 = vpop.xlane.xlu1 %2241  ;;  %v3733_v32 = vpop.f32.mrb[39].mxu1 }
 0x52a   : > { %v6706_v59 = vadd.f32 %v3733_v32, %v3732_v12  ;;  %vm2258_vm2 = vcmp.gt.f32.partialorder %v6704_v41, 0.0 }
 0x52d   : > { %v6708_v34 = vpop.xlane.xlu1 %2869 }
 0x52e   : > { %v3735_v40 = vpop.f32.mrb[40].mxu1  ;;  %vm2914_vm4 = vcmp.gt.f32.partialorder %v6708_v34, 0.0 }
 0x52f   : > { %v3736_v8 = vpop.f32.mrb[41].mxu1 }
 0x530   : > { %v6710_v56 = vadd.f32 %v3736_v8, %v3735_v40  ;;  %v3738_v52 = vpop.f32.mrb[42].mxu1  ;;  %v8011_v40 = vld [vmem:[#allocation79_spill] sm:$0xff] }
 0x531   : > { %v6712_v37 = vpop.xlane.xlu1 %2875  ;;  %v3739_v9 = vpop.f32.mrb[43].mxu1  ;;  %v1130_v8 = vmul.f32 %v8011_v40, %v873_v24 }
 0x532   : > { %v6714_v22 = vadd.f32 %v3739_v9, %v3738_v52  ;;  %vm2916_vm6 = vcmp.gt.f32.partialorder %v6712_v37, 0.0 }
 0x535   : > { %v6716_v11 = vpop.xlane.xlu1 %2881 }
 0x536   : > { %v3741_v21 = vpop.f32.mrb[44].mxu1  ;;  %vm2918_vm8 = vcmp.gt.f32.partialorder %v6716_v11, 0.0 }
 0x537   : > { %v3742_v10 = vpop.f32.mrb[45].mxu1 }
 0x538   : > { %v6721_v5 = vadd.f32 %v3742_v10, %v3741_v21  ;;  %v3744_v43 = vpop.f32.mrb[46].mxu1  ;;  %v6776_v21 = vpop.xlane.xlu0 %2866  ;;  %v2271_v10 = vsel %vm2255_vm15, %v6746_v13, 1.0  ;;  %v2930_v13 = vsel %vm2914_vm4, %v6708_v34, 1.0 }
 0x539   : > { %v6723_v51 = vpop.xlane.xlu1 %2887  ;;  %v3745_v20 = vpop.f32.mrb[47].mxu1  ;;  %4140 = vrcp.f32 %v2271_v10  ;;  %vm2913_vm3 = vcmp.gt.f32.partialorder %v6776_v21, 0.0 }
 0x53a   : > { %v6729_v31 = vadd.f32 %v3745_v20, %v3744_v43  ;;  %v4139_v20 = vpop.eup %4138  ;;  %4142 = vrcp.f32 %v2272_v27  ;;  %v2929_v24 = vsel %vm2913_vm3, %v6776_v21, 1.0  ;;  %vm2920_vm10 = vcmp.gt.f32.partialorder %v6723_v51, 0.0 }
 0x53d   : > { %v6737_v30 = vpop.xlane.xlu1 %2893 }
 0x53e   : > { %vm2922_vm12 = vcmp.gt.f32.partialorder %v6737_v30, 0.0 }
 0x53f   : > { %v2938_v34 = vsel %vm2922_vm12, %v6737_v30, 1.0 }
 0x541   : > { %v6739_v58 = vpop.xlane.xlu1 %2899 }
 0x543   : > { %v4141_v25 = vpop.eup %4140 }
 0x544   : > { %v3683_v26 = vpop.f32.mrb[48].mxu0  ;;  %v4143_v38 = vpop.eup %4142 }
 0x545   : > { %v3684_v47 = vpop.f32.mrb[49].mxu0  ;;  %v6741_v4 = vpop.xlane.xlu1 %2905  ;;  %v2304_v40 = vsel %vm2256_vm0, %v4143_v38, 0.0 }
 0x546   : > { %v3685_v33 = vadd.f32 %v3684_v47, %v3683_v26  ;;  %v3686_v7 = vpop.f32.mrb[50].mxu0  ;;  %v6786_v26 = vpop.xlane.xlu0 %2872 }
 0x547   : > { %v3687_v35 = vpop.f32.mrb[51].mxu0  ;;  %vm2915_vm5 = vcmp.gt.f32.partialorder %v6786_v26, 0.0 }
 0x548   : > { %v2476_v49 = vmul.f32 %v3685_v33, %v2299_v29  ;;  %v3688_v19 = vadd.f32 %v3687_v35, %v3686_v7  ;;  %v2302_v7 = vsel %vm2254_vm13, %v4139_v20, 0.0  ;;  %v2931_v0 = vsel %vm2915_vm5, %v6786_v26, 1.0 }
 0x549   : > { %v6748_v16 = vpop.xlane.xlu1 %2911 }
 0x54a   : > { %3250 = vrot.lane.b32.xlu0 %v2476_v49, %s4253_s21  ;;  %v2477_v39 = vmul.f32 %v3688_v19, %v2300_v2  ;;  %v6794_v1 = vpop.xlane.xlu0 %2878  ;;  %v2273_v2 = vsel %vm2257_vm1, %v6759_v14, 1.0 }
 0x54b   : > { %4144 = vrcp.f32 %v2273_v2  ;;  %vm2917_vm7 = vcmp.gt.f32.partialorder %v6794_v1, 0.0 }
 0x54c   : > { %v3747_v48 = vpop.f32.mrb[48].mxu1  ;;  %3252 = vrot.lane.b32.xlu1 %v2477_v39, %s4253_s21  ;;  %v2274_v39 = vsel %vm2258_vm2, %v6704_v41, 1.0 }
 0x54d   : > { %v3173_v46 = vpop.permute.xlu1 %3172  ;;  %v3748_v36 = vpop.f32.mrb[49].mxu1  ;;  %4146 = vrcp.f32 %v2274_v39 }
 0x54e   : > { %v6765_v18 = vsel %vm3346_vm14, %v1129_v42, %v3173_v46  ;;  %v6767_v54 = vadd.f32 %v3748_v36, %v3747_v48  ;;  %v3750_v12 = vpop.f32.mrb[50].mxu1  ;;  %v2303_v48 = vsel %vm2255_vm15, %v4141_v25, 0.0  ;;  %v6813_v46 = vpop.xlane.xlu0 %2884  ;;  %4148 = vrcp.f32 %v2929_v24 }
 0x54f   : > { %v3751_v32 = vpop.f32.mrb[51].mxu1  ;;  %4150 = vrcp.f32 %v2930_v13  ;;  %vm2919_vm9 = vcmp.gt.f32.partialorder %v6813_v46, 0.0  ;;  %vm2924_vm15 = vcmp.gt.f32.partialorder %v6739_v58, 0.0 }
 0x550   : > { %v6770_v3 = vadd.f32 %v3751_v32, %v3750_v12  ;;  %4152 = vrcp.f32 %v2931_v0 }
 0x551   : > { %v3175_v52 = vpop.permute.xlu1 %3174 }
 0x552   : > { %v6774_v9 = vsel %vm3346_vm14, %v1130_v8, %v3175_v52  ;;  %v6833_v20 = vpop.xlane.xlu0 %2890 }
 0x553   : > { %vm2921_vm11 = vcmp.gt.f32.partialorder %v6833_v20, 0.0 }
 0x554   : > { %v3689_v55 = vpop.f32.mrb[52].mxu0 }
 0x555   : > { %v3690_v43 = vpop.f32.mrb[53].mxu0 }
 0x556   : > { %v3691_v60 = vadd.f32 %v3690_v43, %v3689_v55  ;;  %v3692_v44 = vpop.f32.mrb[54].mxu0  ;;  %v2932_v43 = vsel %vm2916_vm6, %v6712_v37, 1.0  ;;  %v2940_v37 = vsel %vm2924_vm15, %v6739_v58, 1.0 }
 0x557   : > { %v3693_v53 = vpop.f32.mrb[55].mxu0  ;;  %4154 = vrcp.f32 %v2932_v43 }
 0x558   : > { %v2478_v47 = vmul.f32 %v3691_v60, %v2301_v17  ;;  %v3694_v33 = vadd.f32 %v3693_v53, %v3692_v44  ;;  %v2933_v44 = vsel %vm2917_vm7, %v6794_v1, 1.0  ;;  %v2934_v17 = vsel %vm2918_vm8, %v6716_v11, 1.0  ;;  %v4145_v53 = vpop.eup %4144 }
 0x559   : > { %4156 = vrcp.f32 %v2933_v44  ;;  %v2305_v25 = vsel %vm2257_vm1, %v4145_v53, 0.0  ;;  %vm2926_vm1 = vcmp.gt.f32.partialorder %v6741_v4, 0.0 }
 0x55a   : > { %v2479_v50 = vmul.f32 %v3694_v33, %v2302_v7  ;;  %3254 = vrot.lane.b32.xlu0 %v2478_v47, %s4253_s21  ;;  %v4147_v33 = vpop.eup %4146  ;;  %v2935_v7 = vsel %vm2919_vm9, %v6813_v46, 1.0  ;;  %4158 = vrcp.f32 %v2934_v17 }
 0x55b   : > { %4160 = vrcp.f32 %v2935_v7 }
 0x55c   : > { %v3753_v29 = vpop.f32.mrb[52].mxu1  ;;  %3256 = vrot.lane.b32.xlu1 %v2479_v50, %s4253_s21  ;;  %v6849_v50 = vpop.xlane.xlu0 %2896 }
 0x55d   : > { %v3754_v35 = vpop.f32.mrb[53].mxu1  ;;  %vm2923_vm13 = vcmp.gt.f32.partialorder %v6849_v50, 0.0 }
 0x55e   : > { %v6792_v57 = vadd.f32 %v3754_v35, %v3753_v29  ;;  %v3756_v28 = vpop.f32.mrb[54].mxu1  ;;  %v4149_v35 = vpop.eup %4148 }
 0x55f   : > { %v3757_v49 = vpop.f32.mrb[55].mxu1 }
 0x560   : > { %v6797_v19 = vadd.f32 %v3757_v49, %v3756_v28 }
 0x562   : > { %v3695_v62 = vpop.f32.mrb[56].mxu0 }
 0x563   : > { %v3696_v63 = vpop.f32.mrb[57].mxu0 }
 0x564   : > { %v3697_v23 = vadd.f32 %v3696_v63, %v3695_v62  ;;  %v3698_v42 = vpop.f32.mrb[58].mxu0  ;;  %v2936_v62 = vsel %vm2920_vm10, %v6723_v51, 1.0  ;;  %v4151_v63 = vpop.eup %4150 }
 0x565   : > { %v3699_v36 = vpop.f32.mrb[59].mxu0  ;;  %4162 = vrcp.f32 %v2936_v62  ;;  %v2962_v24 = vsel %vm2914_vm4, %v4151_v63, 0.0 }
 0x566   : > { %v2480_v12 = vmul.f32 %v3697_v23, %v2303_v48  ;;  %v3700_v32 = vadd.f32 %v3699_v36, %v3698_v42  ;;  %v2306_v23 = vsel %vm2258_vm2, %v4147_v33, 0.0  ;;  %v2961_v42 = vsel %vm2913_vm3, %v4149_v35, 0.0  ;;  %v4153_v48 = vpop.eup %4152 }
 0x567   : > { %v2937_v36 = vsel %vm2921_vm11, %v6833_v20, 1.0  ;;  %v4155_v41 = vpop.eup %4154  ;;  %v3138_v21 = vmul.f32 %v6693_v15, %v2961_v42  ;;  %vm2928_vm3 = vcmp.gt.f32.partialorder %v6748_v16, 0.0 }
 0x568   : > { %v2481_v8 = vmul.f32 %v3700_v32, %v2304_v40  ;;  %3258 = vrot.lane.b32.xlu0 %v2480_v12, %s4253_s21  ;;  %v3759_v52 = vpop.f32.mrb[56].mxu1  ;;  %v6868_v12 = vpop.xlane.xlu0 %2902  ;;  %v2963_v40 = vsel %vm2915_vm5, %v4153_v48, 0.0  ;;  %4164 = vrcp.f32 %v2937_v36  ;;  %v2964_v26 = vsel %vm2916_vm6, %v4155_v41, 0.0 }
 0x569   : > { %v3760_v10 = vpop.f32.mrb[57].mxu1  ;;  %4166 = vrcp.f32 %v2938_v34  ;;  %vm2925_vm0 = vcmp.gt.f32.partialorder %v6868_v12, 0.0 }
 0x56a   : > { %v6827_v45 = vadd.f32 %v3760_v10, %v3759_v52  ;;  %3260 = vrot.lane.b32.xlu1 %v2481_v8, %s4253_s21  ;;  %v3762_v55 = vpop.f32.mrb[58].mxu1  ;;  %v4157_v8 = vpop.eup %4156  ;;  %v3139_v52 = vmul.f32 %v6698_v6, %v2962_v24  ;;  %v2939_v10 = vsel %vm2923_vm13, %v6849_v50, 1.0  ;;  %v2941_v1 = vsel %vm2925_vm0, %v6868_v12, 1.0 }
 0x56b   : > { %v3763_v27 = vpop.f32.mrb[59].mxu1  ;;  %v4159_v43 = vpop.eup %4158  ;;  %v2965_v44 = vsel %vm2917_vm7, %v4157_v8, 0.0  ;;  %4168 = vrcp.f32 %v2939_v10 }
 0x56c   : > { %v6836_v60 = vadd.f32 %v3763_v27, %v3762_v55  ;;  %v3140_v27 = vmul.f32 %v6702_v61, %v2963_v40  ;;  %v2909_v17 = vpop.xlane.xlu0 %2908  ;;  %v4161_v53 = vpop.eup %4160  ;;  %v2966_v61 = vsel %vm2918_vm8, %v4159_v43, 0.0  ;;  %v3142_v7 = vmul.f32 %v6710_v56, %v2965_v44  ;;  %v8012_v43 = vld [vmem:[#allocation83_spill] sm:$0xff] }
 0x56d   : > { %4170 = vrcp.f32 %v2940_v37  ;;  %vm2927_vm2 = vcmp.gt.f32.partialorder %v2909_v17, 0.0  ;;  %v3143_v11 = vmul.f32 %v6714_v22, %v2966_v61  ;;  %v2944_v22 = vsel %vm2928_vm3, %v6748_v16, 1.0 }
 0x56e   : > { %4172 = vrcp.f32 %v2941_v1  ;;  %v2943_v35 = vsel %vm2927_vm2, %v2909_v17, 1.0  ;;  %vm823_vm4 = vcmp.gt.f32.partialorder %v8012_v43, 0.0  ;;  %v8013_v17 = vld [vmem:[#allocation94_spill] sm:$0xff] }
 0x56f   : > { %v4163_v33 = vpop.eup %4162  ;;  %vm826_vm5 = vcmp.gt.f32.partialorder %v8013_v17, 0.0 }
 0x570   : > { %v3701_v47 = vpop.f32.mrb[60].mxu0  ;;  %v2968_v56 = vsel %vm2920_vm10, %v4163_v33, 0.0  ;;  %v842_v1 = vsel %vm826_vm5, %v8013_v17, 1.0  ;;  %v8015_v33 = vld [vmem:[#allocation96_spill] sm:$0xff] }
 0x571   : > { %v3702_v29 = vpop.f32.mrb[61].mxu0  ;;  %vm828_vm7 = vcmp.gt.f32.partialorder %v8015_v33, 0.0 }
 0x572   : > { %v3703_v28 = vadd.f32 %v3702_v29, %v3701_v47  ;;  %v3704_v49 = vpop.f32.mrb[62].mxu0  ;;  %v3141_v47 = vmul.f32 %v6706_v59, %v2964_v26  ;;  %v2967_v59 = vsel %vm2919_vm9, %v4161_v53, 0.0  ;;  %v2942_v29 = vsel %vm2926_vm1, %v6741_v4, 1.0  ;;  %v6958_v4 = vpop.permute.xlu0 %3170 }
 0x573   : > { %v3705_v2 = vpop.f32.mrb[63].mxu0  ;;  %v3144_v46 = vmul.f32 %v6721_v5, %v2967_v59  ;;  %4174 = vrcp.f32 %v2942_v29  ;;  %v8016_v29 = vld [vmem:[#allocation97_spill] sm:$0xff] }
 0x574   : > { %v2482_v38 = vmul.f32 %v3703_v28, %v2305_v25  ;;  %v3706_v39 = vadd.f32 %v3705_v2, %v3704_v49  ;;  %v4165_v28 = vpop.eup %4164  ;;  %v3145_v25 = vmul.f32 %v6729_v31, %v2968_v56  ;;  %4176 = vrcp.f32 %v2943_v35  ;;  %v8017_v35 = vld [vmem:[#allocation89_spill] sm:$0xff] }
 0x575   : > { %v4167_v49 = vpop.eup %4166  ;;  %v2969_v51 = vsel %vm2921_vm11, %v4165_v28, 0.0  ;;  %4178 = vrcp.f32 %v2944_v22  ;;  %vm829_vm8 = vcmp.gt.f32.partialorder %v8016_v29, 0.0  ;;  %vm830_vm9 = vcmp.gt.f32.partialorder %v8017_v35, 0.0 }
 0x576   : > { %v2483_v14 = vmul.f32 %v3706_v39, %v2306_v23  ;;  %3262 = vrot.lane.b32.xlu0 %v2482_v38, %s4253_s21  ;;  %v4169_v62 = vpop.eup %4168  ;;  %v3146_v5 = vmul.f32 %v6767_v54, %v2969_v51  ;;  %v2970_v2 = vsel %vm2922_vm12, %v4167_v49, 0.0  ;;  %v6962_v36 = vpop.permute.xlu0 %3178  ;;  %v845_v28 = vsel %vm829_vm8, %v8016_v29, 1.0  ;;  %v8018_v49 = vld [vmem:[#allocation102_spill] sm:$0xff] }
 0x577   : > { %v4171_v63 = vpop.eup %4170  ;;  %v3147_v38 = vmul.f32 %v6770_v3, %v2970_v2  ;;  %v2971_v31 = vsel %vm2923_vm13, %v4169_v62, 0.0  ;;  %vm831_vm10 = vcmp.gt.f32.partialorder %v8018_v49, 0.0  ;;  %v846_v51 = vsel %vm830_vm9, %v8017_v35, 1.0  ;;  %v8019_v62 = vld [vmem:[#allocation66_spill] sm:$0xff] }
 0x578   : > { %v3765_v32 = vpop.f32.mrb[60].mxu1  ;;  %3264 = vrot.lane.b32.xlu1 %v2483_v14, %s4253_s21  ;;  %v4173_v39 = vpop.eup %4172  ;;  %v3148_v20 = vmul.f32 %v6792_v57, %v2971_v31  ;;  %v2972_v54 = vsel %vm2924_vm15, %v4171_v63, 0.0  ;;  %vm832_vm11 = vcmp.gt.f32.partialorder %v8019_v62, 0.0  ;;  %v847_v2 = vsel %vm831_vm10, %v8018_v49, 1.0 }
 0x579   : > { %v3766_v13 = vpop.f32.mrb[61].mxu1  ;;  %v3149_v30 = vmul.f32 %v6797_v19, %v2972_v54  ;;  %v2973_v3 = vsel %vm2925_vm0, %v4173_v39, 0.0  ;;  %v848_v39 = vsel %vm832_vm11, %v8019_v62, 1.0  ;;  %vm3363_vm13 = vcmask 523264  }
 0x57a   : > { %v6880_v15 = vadd.f32 %v3766_v13, %v3765_v32  ;;  %v3768_v0 = vpop.f32.mrb[62].mxu1  ;;  %3298 = vrot.lane.b32.xlu0 %v3138_v21, %s4250_s20  ;;  %v3150_v50 = vmul.f32 %v6827_v45, %v2973_v3  ;;  %v6966_v41 = vpop.permute.xlu0 %3182  ;;  %vm3380_vm0 = vcmask 785408  }
 0x57b   : > { %v3769_v55 = vpop.f32.mrb[63].mxu1 }
 0x57c   : > { %v6890_v6 = vadd.f32 %v3769_v55, %v3768_v0  ;;  %3300 = vrot.lane.b32.xlu1 %v3139_v52, %s4250_s20 }
 0x57d   : > { %v4175_v23 = vpop.eup %4174 }
 0x57e   : > { %3302 = vrot.lane.b32.xlu0 %v3140_v27, %s4250_s20  ;;  %v4177_v42 = vpop.eup %4176  ;;  %v2974_v57 = vsel %vm2926_vm1, %v4175_v23, 0.0  ;;  %v6970_v16 = vpop.permute.xlu0 %3186 }
 0x57f   : > { %v4179_v48 = vpop.eup %4178  ;;  %v3151_v58 = vmul.f32 %v6836_v60, %v2974_v57  ;;  %v2975_v19 = vsel %vm2927_vm2, %v4177_v42, 0.0  ;;  %v6960_v60 = vpop.permute.xlu1 %3176 }
 0x580   : > { %3304 = vrot.lane.b32.xlu1 %v3141_v47, %s4250_s20  ;;  %v3152_v14 = vmul.f32 %v6880_v15, %v2975_v19  ;;  %v2976_v24 = vsel %vm2928_vm3, %v4179_v48, 0.0  ;;  %v8014_v47 = vld [vmem:[#allocation90_spill] sm:$0xff] }
 0x581   : > { %v3153_v45 = vmul.f32 %v6890_v6, %v2976_v24  ;;  %v839_v6 = vsel %vm823_vm4, %v8012_v43, 1.0  ;;  %vm827_vm6 = vcmp.gt.f32.partialorder %v8014_v47, 0.0  ;;  %v8023_v24 = vld [vmem:[#allocation107_spill] sm:$0xff] }
 0x582   : > { %3306 = vrot.lane.b32.xlu0 %v3142_v7, %s4250_s20  ;;  %v6974_v40 = vpop.permute.xlu0 %3190  ;;  %4180 = vrcp.f32 %v839_v6  ;;  %v843_v7 = vsel %vm827_vm6, %v8014_v47, 1.0  ;;  %vm835_vm1 = vcmp.gt.f32.partialorder %v8023_v24, 0.0 }
 0x583   : > { %v6964_v12 = vpop.permute.xlu1 %3180  ;;  %4182 = vrcp.f32 %v842_v1  ;;  %v851_v47 = vsel %vm835_vm1, %v8023_v24, 1.0 }
 0x584   : > { %3308 = vrot.lane.b32.xlu1 %v3143_v11, %s4250_s20  ;;  %v844_v11 = vsel %vm828_vm7, %v8015_v33, 1.0  ;;  %4184 = vrcp.f32 %v843_v7  ;;  %v8024_v7 = vld [vmem:[#allocation106_spill] sm:$0xff] }
 0x585   : > { %4186 = vrcp.f32 %v844_v11  ;;  %vm836_vm2 = vcmp.gt.f32.partialorder %v8024_v7, 0.0  ;;  %v8025_v11 = vld [vmem:[#allocation77_spill] sm:$0xff] }
 0x586   : > { %3310 = vrot.lane.b32.xlu0 %v3144_v46, %s4250_s20  ;;  %v6978_v13 = vpop.permute.xlu0 %3194  ;;  %4188 = vrcp.f32 %v845_v28 }
 0x587   : > { %v6968_v21 = vpop.permute.xlu1 %3184  ;;  %4190 = vrcp.f32 %v846_v51  ;;  %v8026_v51 = vld [vmem:[#allocation76_spill] sm:$0xff] }
 0x588   : > { %3312 = vrot.lane.b32.xlu1 %v3145_v25, %s4250_s20  ;;  %4192 = vrcp.f32 %v847_v2  ;;  %v8027_v2 = vld [vmem:[#allocation70_spill] sm:$0xff] }
 0x589   : > { %4194 = vrcp.f32 %v848_v39  ;;  %vm837_vm3 = vcmp.gt.f32.partialorder %v8027_v2, 0.0 }
 0x58a   : > { %3314 = vrot.lane.b32.xlu0 %v3146_v5, %s4250_s20  ;;  %v6982_v52 = vpop.permute.xlu0 %3198  ;;  %v853_v29 = vsel %vm837_vm3, %v8027_v2, 1.0 }
 0x58b   : > { %v6972_v32 = vpop.permute.xlu1 %3188 }
 0x58c   : > { %3316 = vrot.lane.b32.xlu1 %v3147_v38, %s4250_s20  ;;  %v4181_v22 = vpop.eup %4180  ;;  %v8020_v38 = vld [vmem:[#allocation104_spill] sm:$0xff] }
 0x58d   : > { %v871_v5 = vsel %vm823_vm4, %v4181_v22, 0.0  ;;  %vm833_vm12 = vcmp.gt.f32.partialorder %v8020_v38, 0.0  ;;  %v4183_v23 = vpop.eup %4182 }
 0x58e   : > { %3318 = vrot.lane.b32.xlu0 %v3148_v20, %s4250_s20  ;;  %v3235_v0 = vpop.permute.xlu0 %3234  ;;  %v8021_v20 = vld [vmem:[#allocation74_spill] sm:$0xff]  ;;  %v849_v3 = vsel %vm833_vm12, %v8020_v38, 1.0 }
 0x58f   : > { %v6976_v34 = vpop.permute.xlu1 %3192  ;;  %v1128_v54 = vmul.f32 %v8021_v20, %v871_v5  ;;  %4196 = vrcp.f32 %v849_v3 }
 0x590   : > { %3320 = vrot.lane.b32.xlu1 %v3149_v30, %s4250_s20  ;;  %v8022_v30 = vld [vmem:[#allocation101_spill] sm:$0xff] }
 0x591   : > { %vm834_vm15 = vcmp.gt.f32.partialorder %v8022_v30, 0.0  ;;  %v3347_v57 = vsel %vm3346_vm14, %v1128_v54, %v6958_v4  ;;  %v874_v4 = vsel %vm826_vm5, %v4183_v23, 0.0  ;;  %v852_v54 = vsel %vm836_vm2, %v8024_v7, 1.0  ;;  %v8028_v23 = vld [vmem:[#allocation67_spill] sm:$0xff] }
 0x592   : > { %3322 = vrot.lane.b32.xlu0 %v3150_v50, %s4250_s20  ;;  %v6986_v10 = vpop.permute.xlu0 %3238  ;;  %v4185_v50 = vpop.eup %4184  ;;  %v3364_v48 = vsel %vm3363_vm13, %v3347_v57, %v3235_v0  ;;  %v1131_v28 = vmul.f32 %v8025_v11, %v874_v4  ;;  %vm838_vm4 = vcmp.gt.f32.partialorder %v8028_v23, 0.0 }
 0x593   : > { %v6980_v8 = vpop.permute.xlu1 %3196  ;;  %v4187_v19 = vpop.eup %4186  ;;  %v875_v43 = vsel %vm827_vm6, %v4185_v50, 0.0 }
 0x594   : > { %3324 = vrot.lane.b32.xlu1 %v3151_v58, %s4250_s20  ;;  %v4189_v1 = vpop.eup %4188  ;;  %v876_v17 = vsel %vm828_vm7, %v4187_v19, 0.0  ;;  %v1132_v5 = vmul.f32 %v8026_v51, %v875_v43  ;;  %v3350_v39 = vsel %vm3346_vm14, %v1131_v28, %v6960_v60  ;;  %v8029_v60 = vld [vmem:[#allocation81_spill] sm:$0xff] }
 0x595   : > { %v4191_v20 = vpop.eup %4190  ;;  %v1133_v57 = vmul.f32 %v8029_v60, %v876_v17 }
 0x596   : > { %3326 = vrot.lane.b32.xlu0 %v3152_v14, %s4250_s20  ;;  %v6991_v27 = vpop.permute.xlu0 %3242  ;;  %v850_v14 = vsel %vm834_vm15, %v8022_v30, 1.0  ;;  %v4193_v50 = vpop.eup %4192 }
 0x597   : > { %v6984_v15 = vpop.permute.xlu1 %3200  ;;  %4198 = vrcp.f32 %v850_v14  ;;  %v8030_v14 = vld [vmem:[#allocation84_spill] sm:$0xff]  ;;  %v3352_v4 = vsel %vm3346_vm14, %v1133_v57, %v6964_v12  ;;  %v4195_v43 = vpop.eup %4194  ;;  %v8031_v12 = vld [vmem:[#allocation82_spill] sm:$0xff] }
 0x598   : > { %3328 = vrot.lane.b32.xlu1 %v3153_v45, %s4250_s20  ;;  %4200 = vrcp.f32 %v851_v47 }
 0x599   : > { %4202 = vrcp.f32 %v852_v54  ;;  %v4197_v28 = vpop.eup %4196 }
 0x59a   : > { %v6998_v37 = vpop.permute.xlu0 %3246  ;;  %4204 = vrcp.f32 %v853_v29 }
 0x59b   : > { %v3237_v26 = vpop.permute.xlu1 %3236 }
 0x59c   : > { %v3365_v0 = vsel %vm3363_vm13, %v6765_v18, %v3237_v26  ;;  %v3366_v18 = vsel %vm3363_vm13, %v6774_v9, %v6986_v10  ;;  %v877_v9 = vsel %vm829_vm8, %v4189_v1, 0.0 }
 0x59f   : > { %v6988_v55 = vpop.permute.xlu1 %3240 }
 0x5a0   : > { %v3367_v10 = vsel %vm3363_vm13, %v3350_v39, %v6988_v55  ;;  %v881_v39 = vsel %vm833_vm12, %v4197_v28, 0.0  ;;  %v8038_v28 = vld [vmem:[#allocation103_spill] sm:$0xff] }
 0x5a3   : > { %v6996_v44 = vpop.permute.xlu1 %3244 }
 0x5a4   : > { %v3369_v1 = vsel %vm3363_vm13, %v3352_v4, %v6996_v44  ;;  %v8032_v44 = vld [vmem:[#allocation86_spill] sm:$0xff] }
 0x5a7   : > { %v7001_v53 = vpop.permute.xlu1 %3248 }
 0x5bc   : > { %v7004_v61 = vpop.permute.xlu0 %3250 }
 0x5be   : > { %v7013_v59 = vpop.permute.xlu1 %3252 }
 0x5cc   : > { %v7019_v56 = vpop.permute.xlu0 %3254 }
 0x5ce   : > { %v7025_v46 = vpop.permute.xlu1 %3256 }
 0x5da   : > { %v7028_v25 = vpop.permute.xlu0 %3258 }
 0x5dc   : > { %v7039_v63 = vpop.permute.xlu1 %3260 }
 0x5e8   : > { %v7042_v31 = vpop.permute.xlu0 %3262 }
 0x5ea   : > { %v7052_v42 = vpop.permute.xlu1 %3264 }
 0x5ec   : > { %v3299_v58 = vpop.permute.xlu0 %3298 }
 0x5ed   : > { %v3381_v45 = vsel %vm3380_vm0, %v3364_v48, %v3299_v58  ;;  %v3351_v48 = vsel %vm3346_vm14, %v1132_v5, %v6962_v36  ;;  %v4199_v5 = vpop.eup %4198 }
 0x5ee   : > { %3397 = vst [vmem:[%s7061_s11] sm:$0xff] %v3381_v45  ;;  %v3301_v6 = vpop.permute.xlu1 %3300  ;;  %v3368_v19 = vsel %vm3363_vm13, %v3351_v48, %v6991_v27  ;;  %v1134_v45 = vmul.f32 %v8030_v14, %v877_v9  ;;  %v879_v27 = vsel %vm831_vm10, %v4193_v50, 0.0  ;;  %v882_v57 = vsel %vm834_vm15, %v4199_v5, 0.0 }
 0x5ef   : > { %v3382_v22 = vsel %vm3380_vm0, %v3365_v0, %v3301_v6  ;;  %v854_v0 = vsel %vm838_vm4, %v8028_v23, 1.0  ;;  %v878_v6 = vsel %vm830_vm9, %v4191_v20, 0.0  ;;  %v8033_v20 = vld [vmem:[#allocation87_spill] sm:$0xff] }
 0x5f0   : > { %3398 = vst [vmem:[%s7061_s11 + $0x8] sm:$0xff] %v3382_v22  ;;  %v3303_v26 = vpop.permute.xlu0 %3302  ;;  %v1135_v22 = vmul.f32 %v8031_v12, %v878_v6  ;;  %v3353_v17 = vsel %vm3346_vm14, %v1134_v45, %v6966_v41  ;;  %4206 = vrcp.f32 %v854_v0  ;;  %v880_v41 = vsel %vm832_vm11, %v4195_v43, 0.0  ;;  %v8036_v45 = vld [vmem:[#allocation98_spill] sm:$0xff]  ;;  %v8037_v6 = vld [vmem:[#allocation99_spill] sm:$0xff] }
 0x5f1   : > { %v3383_v33 = vsel %vm3380_vm0, %v3366_v18, %v3303_v26  ;;  %v3370_v35 = vsel %vm3363_vm13, %v3353_v17, %v6998_v37  ;;  %v1136_v18 = vmul.f32 %v8032_v44, %v879_v27  ;;  %v1137_v54 = vmul.f32 %v8033_v20, %v880_v41 }
 0x5f2   : > { %3399 = vst [vmem:[%s7061_s11 + $0x10] sm:$0xff] %v3383_v33  ;;  %v3305_v3 = vpop.permute.xlu1 %3304  ;;  %v3354_v26 = vsel %vm3346_vm14, %v1135_v22, %v6968_v21 }
 0x5f3   : > { %v3384_v58 = vsel %vm3380_vm0, %v3367_v10, %v3305_v3  ;;  %v3371_v37 = vsel %vm3363_vm13, %v3354_v26, %v7001_v53  ;;  %v3355_v21 = vsel %vm3346_vm14, %v1136_v18, %v6970_v16  ;;  %v4201_v10 = vpop.eup %4200  ;;  %v8034_v3 = vld [vmem:[#allocation85_spill] sm:$0xff]  ;;  %v3356_v53 = vsel %vm3346_vm14, %v1137_v54, %v6972_v32 }
 0x5f4   : > { %3400 = vst [vmem:[%s7061_s11 + $0x18] sm:$0xff] %v3384_v58  ;;  %v3307_v55 = vpop.permute.xlu0 %3306  ;;  %v3372_v62 = vsel %vm3363_vm13, %v3355_v21, %v7004_v61  ;;  %v1138_v50 = vmul.f32 %v8034_v3, %v881_v39  ;;  %v3373_v16 = vsel %vm3363_vm13, %v3356_v53, %v7013_v59  ;;  %v4203_v48 = vpop.eup %4202  ;;  %v8035_v58 = vld [vmem:[#allocation95_spill] sm:$0xff]  ;;  %v883_v32 = vsel %vm835_vm1, %v4201_v10, 0.0 }
 0x5f5   : > { %v3385_v36 = vsel %vm3380_vm0, %v3368_v19, %v3307_v55  ;;  %v1139_v29 = vmul.f32 %v8035_v58, %v882_v57  ;;  %v4205_v14 = vpop.eup %4204  ;;  %v1140_v4 = vmul.f32 %v8036_v45, %v883_v32 }
 0x5f6   : > { %3401 = vst [vmem:[%s7061_s11 + $0x20] sm:$0xff] %v3385_v36  ;;  %v3309_v11 = vpop.permute.xlu1 %3308  ;;  %v3357_v19 = vsel %vm3346_vm14, %v1138_v50, %v6974_v40  ;;  %v884_v40 = vsel %vm836_vm2, %v4203_v48, 0.0 }
 0x5f7   : > { %v3386_v47 = vsel %vm3380_vm0, %v3369_v1, %v3309_v11  ;;  %v3374_v30 = vsel %vm3363_vm13, %v3357_v19, %v7019_v56  ;;  %v3358_v36 = vsel %vm3346_vm14, %v1139_v29, %v6976_v34  ;;  %v1141_v27 = vmul.f32 %v8037_v6, %v884_v40 }
 0x5f8   : > { %3402 = vst [vmem:[%s7061_s11 + $0x28] sm:$0xff] %v3386_v47  ;;  %v3311_v49 = vpop.permute.xlu0 %3310  ;;  %v3375_v24 = vsel %vm3363_vm13, %v3358_v36, %v7025_v46  ;;  %v3359_v1 = vsel %vm3346_vm14, %v1140_v4, %v6978_v13  ;;  %v885_v34 = vsel %vm837_vm3, %v4205_v14, 0.0 }
 0x5f9   : > { %v3387_v51 = vsel %vm3380_vm0, %v3370_v35, %v3311_v49  ;;  %v3376_v7 = vsel %vm3363_vm13, %v3359_v1, %v7028_v25  ;;  %v1142_v12 = vmul.f32 %v8038_v28, %v885_v34  ;;  %v3360_v22 = vsel %vm3346_vm14, %v1141_v27, %v6980_v8  ;;  %v8039_v25 = vld [vmem:[#allocation100_spill] sm:$0xff] }
 0x5fa   : > { %3403 = vst [vmem:[%s7061_s11 + $0x30] sm:$0xff] %v3387_v51  ;;  %v3313_v33 = vpop.permute.xlu1 %3312  ;;  %v4207_v0 = vpop.eup %4206  ;;  %v3377_v2 = vsel %vm3363_vm13, %v3360_v22, %v7039_v63 }
 0x5fb   : > { %v3388_v9 = vsel %vm3380_vm0, %v3371_v37, %v3313_v33  ;;  %v886_v13 = vsel %vm838_vm4, %v4207_v0, 0.0  ;;  %v3361_v49 = vsel %vm3346_vm14, %v1142_v12, %v6982_v52 }
 0x5fc   : > { %3404 = vst [vmem:[%s7061_s11 + $0x38] sm:$0xff] %v3388_v9  ;;  %v3315_v38 = vpop.permute.xlu0 %3314  ;;  %v1143_v35 = vmul.f32 %v8039_v25, %v886_v13  ;;  %v3378_v8 = vsel %vm3363_vm13, %v3361_v49, %v7042_v31 }
 0x5fd   : > { %v3389_v60 = vsel %vm3380_vm0, %v3372_v62, %v3315_v38 }
 0x5fe   : > { %3405 = vst [vmem:[%s7061_s11 + $0x40] sm:$0xff] %v3389_v60  ;;  %v3317_v61 = vpop.permute.xlu1 %3316  ;;  %v3362_v23 = vsel %vm3346_vm14, %v1143_v35, %v6984_v15 }
 0x5ff   : > { %v3390_v55 = vsel %vm3380_vm0, %v3373_v16, %v3317_v61  ;;  %v3379_v63 = vsel %vm3363_vm13, %v3362_v23, %v7052_v42 }
 0x600   : > { %3406 = vst [vmem:[%s7061_s11 + $0x48] sm:$0xff] %v3390_v55  ;;  %v3319_v59 = vpop.permute.xlu0 %3318 }
 0x601   : > { %v3391_v43 = vsel %vm3380_vm0, %v3374_v30, %v3319_v59 }
 0x602   : > { %3407 = vst [vmem:[%s7061_s11 + $0x50] sm:$0xff] %v3391_v43  ;;  %v3321_v56 = vpop.permute.xlu1 %3320 }
 0x603   : > { %v3392_v11 = vsel %vm3380_vm0, %v3375_v24, %v3321_v56 }
 0x604   : > { %3408 = vst [vmem:[%s7061_s11 + $0x58] sm:$0xff] %v3392_v11  ;;  %v3323_v46 = vpop.permute.xlu0 %3322 }
 0x605   : > { %v3393_v17 = vsel %vm3380_vm0, %v3376_v7, %v3323_v46 }
 0x606   : > { %3409 = vst [vmem:[%s7061_s11 + $0x60] sm:$0xff] %v3393_v17  ;;  %v3325_v47 = vpop.permute.xlu1 %3324 }
 0x607   : > { %v3394_v44 = vsel %vm3380_vm0, %v3377_v2, %v3325_v47 }
 0x608   : > { %3410 = vst [vmem:[%s7061_s11 + $0x68] sm:$0xff] %v3394_v44  ;;  %v3327_v18 = vpop.permute.xlu0 %3326 }
 0x609   : > { %v3395_v26 = vsel %vm3380_vm0, %v3378_v8, %v3327_v18 }
 0x60a   : > { %3411 = vst [vmem:[%s7061_s11 + $0x70] sm:$0xff] %v3395_v26  ;;  %v3329_v51 = vpop.permute.xlu1 %3328 }
 0x60b   : > { %v3396_v5 = vsel %vm3380_vm0, %v3379_v63, %v3329_v51 }
 0x60c   : > { %3412 = vst [vmem:[%s7061_s11 + $0x78] sm:$0xff] %v3396_v5 }
 0x60d PF: > { %s14_s15 = sadd.s32 1, %s4246_s15  }
 0x60e   : > { %p11_p5 = scmp.ge.s32.totalorder %s14_s15, 4  }
 0x610   :  { %13 = sbr.rel (!%p11_p5) target bundleno = 1 (0x1), region = 72 }

</bundles_post_ra>
